<compile_context>
chip_gen: v7x
topology: tpu7x:2x2x1
jax: 0.10.0
libtpu: 0.0.40
codegen_flags: <defaults>
</compile_context>

<pallas_src>
import numpy as np

import jax
import jax.numpy as jnp
from jax import lax
from jax.experimental import pallas as pl
from jax.experimental.pallas import tpu as pltpu

# Static network geometry (GRID_SIZE must be 32 so 32*9*9 matches fc1).
_K = 4           # conv kernel size
_S = 2           # conv stride
_P = 2           # conv padding
_C_IN = 2        # input channels (spec + canvas planes)
_C1 = 16         # conv1 out channels
_C2 = 32         # conv2 out channels
_H1 = 17         # conv1 output spatial size (32 -> 17)
_H2 = 9          # conv2 output spatial size (17 -> 9)
_N1 = _H1 * _H1            # 289 conv1 positions
_N2 = _H2 * _H2            # 81  conv2 positions
_TAPS = _K * _K            # 16
_RPAD = 128                # conv2 positions padded 81 -> 128 (one lane tile / sample)
_FC1_OUT = 64
_KIN = _TAPS * _C_IN + 1   # 33 = 32 patch features + validity column (bias fold)
_FC1_KPAD = _C2 * _RPAD    # 4096 fc1 contraction length (zero rows at padding)


# ----------------------------------------------------------------------------
# Fused forward kernel (factory closes over TB = samples per grid step).
# ----------------------------------------------------------------------------
def _make_kernel(tb):
    lanes = tb * _RPAD     # lanes per conv2 tap = (sample, padded position)

    def kernel(p1_ref, w1_ref, w2_ref, wf1_ref, wf2_ref, bias_ref, o_ref, fin_ref):
        w1 = w1_ref[...]                                        # (16, 33)

        # conv1 (tap-expanded, bias folded via validity col) + conv2, tap by tap.
        # Each tap is a lane-aligned static slice; both matmuls are lane-dense.
        acc = jnp.zeros((_C2, lanes), jnp.float32)
        for t in range(_TAPS):
            a_t = p1_ref[:, t * lanes:(t + 1) * lanes]          # (33, lanes)
            h1_t = jnp.maximum(
                jnp.dot(w1, a_t, preferred_element_type=jnp.float32), 0.0)
            acc = acc + jnp.dot(w2_ref[t * _C2:(t + 1) * _C2, :], h1_t,
                                preferred_element_type=jnp.float32)
        h2 = jnp.maximum(acc + bias_ref[0:_C2, 0:1], 0.0)       # (32, lanes)

        # Relayout (c2, (b, r)) -> (b, c2*128 + r): the PyTorch flatten order,
        # via 32*TB lane-tile-aligned (1,128) copies into a small VMEM scratch.
        for b in range(tb):
            for c in range(_C2):
                fin_ref[b:b + 1, c * _RPAD:(c + 1) * _RPAD] = \
                    h2[c:c + 1, b * _RPAD:(b + 1) * _RPAD]

        # fc1: ONE GEMM against pre-padded weights (zero rows at pad positions).
        f1 = jnp.dot(fin_ref[...], wf1_ref[...],
                     preferred_element_type=jnp.float32)        # (tb, 64)
        f1 = jnp.maximum(f1 + bias_ref[_C2:_C2 + 1, 0:_FC1_OUT], 0.0)

        # fc2 (+ final ReLU), padded to 128 lanes -> unmasked lane-dense store.
        out = jnp.dot(f1, wf2_ref[...], preferred_element_type=jnp.float32)
        o_ref[...] = jnp.maximum(out + bias_ref[_C2 + 1:_C2 + 2, :], 0.0)

    return kernel


# ----------------------------------------------------------------------------
# Host-side one-time weight layout + per-input patch expansion (XLA glue).
# ----------------------------------------------------------------------------
def prepare_params(params):
    f32 = jnp.float32
    # conv1 weights (16, 2, 4, 4) -> (16, 32) with feature order (ci, kh, kw);
    # append the bias as column 32 (matched by the patches' validity column).
    w1 = params["conv1_w"].astype(f32).reshape(_C1, _TAPS * _C_IN)
    w1aug = jnp.concatenate([w1, params["conv1_b"].astype(f32).reshape(_C1, 1)],
                            axis=1)                                   # (16, 33)
    # conv2 weights (32, 16, 4, 4) -> (512, 16), rows ordered (tap, c2), cols c1.
    w2 = jnp.transpose(params["conv2_w"].astype(f32),
                       (2, 3, 0, 1)).reshape(_TAPS * _C2, _C1)        # (512, 16)
    # fc1 weights (64, 2592) -> (4096, 64): per-channel positions padded 81->128
    # with zero rows so the kernel's padded flatten feeds it directly.
    wf1 = params["fc1_w"].astype(f32).reshape(_FC1_OUT, _C2, _N2)
    wf1 = jnp.pad(wf1, ((0, 0), (0, 0), (0, _RPAD - _N2)))            # (64,32,128)
    wf1 = wf1.reshape(_FC1_OUT, _FC1_KPAD).T                          # (4096, 64)
    # fc2 weights padded to 128 output lanes (only lane 0 is real).
    wf2 = jnp.pad(params["fc2_w"].astype(f32).T, ((0, 0), (0, 127)))  # (64, 128)
    # All small biases packed into one (34, 128) constant input.
    bias = jnp.zeros((34, 128), f32)
    bias = bias.at[0:_C2, 0].set(params["conv2_b"].astype(f32))
    bias = bias.at[_C2, 0:_FC1_OUT].set(params["fc1_b"].astype(f32))
    bias = bias.at[_C2 + 1, 0].set(params["fc2_b"].astype(f32)[0])
    return {"w1": w1aug, "w2": w2, "wf1": wf1, "wf2": wf2, "bias": bias}


def _conv2_pos_tables():
    """Static tables: for tap t and padded conv2 position r (<128), the conv1
    position index it reads (clipped) and whether it is in range (else zero)."""
    idx = np.zeros((_TAPS, _RPAD), np.int32)
    valid = np.zeros((_TAPS, _RPAD), np.float32)
    for kh in range(_K):
        for kw in range(_K):
            t = kh * _K + kw
            for oh in range(_H2):
                for ow in range(_H2):
                    r = oh * _H2 + ow
                    ih = _S * oh + kh - _P
                    iw = _S * ow + kw - _P
                    if 0 <= ih < _H1 and 0 <= iw < _H1:
                        idx[t, r] = ih * _H1 + iw
                        valid[t, r] = 1.0
    return idx, valid


_IDX_NP, _VALID_NP = _conv2_pos_tables()


def _build_patch_input(x_nchw, tb):
    """(B,2,32,32) -> (nb, 33, 16*tb*128) tap-expanded conv1 patches.
    Columns are ordered (tap, sample_in_block, padded_position); feature 32 is
    the validity indicator (1 real / 0 conv2-padding) that folds in conv1's bias."""
    B = x_nchw.shape[0]
    bp = ((B + tb - 1) // tb) * tb
    x = x_nchw.astype(jnp.float32)
    if bp != B:
        x = jnp.pad(x, ((0, bp - B), (0, 0), (0, 0), (0, 0)))
    xp = jnp.pad(x, ((0, 0), (0, 0), (_P, _P), (_P, _P)))      # (bp, 2, 36, 36)

    # conv1 im2col patches at all 17x17 positions, feature order (ci, kh, kw).
    cols = []
    for ci in range(_C_IN):
        for kh in range(_K):
            for kw in range(_K):
                cols.append(xp[:, ci, kh:kh + _S * _H1:_S, kw:kw + _S * _H1:_S])
    p = jnp.stack(cols, axis=1).reshape(bp, _TAPS * _C_IN, _N1)  # (bp, 32, 289)

    idx = jnp.asarray(_IDX_NP.reshape(-1))
    valid = jnp.asarray(_VALID_NP)
    pe = p[:, :, idx].reshape(bp, _TAPS * _C_IN, _TAPS, _RPAD) * valid[None, None]
    vrow = jnp.broadcast_to(valid[None, None], (bp, 1, _TAPS, _RPAD))
    pe = jnp.concatenate([pe, vrow], axis=1)                    # (bp, 33, 16, 128)

    nb = bp // tb
    pe = pe.reshape(nb, tb, _KIN, _TAPS, _RPAD)
    pe = pe.transpose(0, 2, 3, 1, 4).reshape(nb, _KIN, _TAPS * tb * _RPAD)
    return pe, bp, nb


# ----------------------------------------------------------------------------
# QNet forward: one fused pallas_call, grid over batch blocks.
# ----------------------------------------------------------------------------
def qnet_forward(x_nchw, prepped):
    B = x_nchw.shape[0]
    # TB samples per grid step: one step for small batches (v5e/v6e sweet spot);
    # for larger B the grid still yields >= 2 steps so v7x's 2nd core is used.
    tb = max(1, min(B, 8))
    pe, bp, nb = _build_patch_input(x_nchw, tb)
    lanes = tb * _RPAD

    out3 = pl.pallas_call(
        _make_kernel(tb),
        out_shape=jax.ShapeDtypeStruct((nb, tb, 128), jnp.float32),
        grid=(nb,),
        in_specs=[
            pl.BlockSpec((None, _KIN, _TAPS * lanes), lambda g: (g, 0, 0)),  # patches
            pl.BlockSpec((_C1, _KIN), lambda g: (0, 0)),                     # w1 (+b1)
            pl.BlockSpec((_TAPS * _C2, _C1), lambda g: (0, 0)),              # w2
            pl.BlockSpec((_FC1_KPAD, _FC1_OUT), lambda g: (0, 0)),           # wf1
            pl.BlockSpec((_FC1_OUT, 128), lambda g: (0, 0)),                 # wf2 (padded)
            pl.BlockSpec((34, 128), lambda g: (0, 0)),                       # packed biases
        ],
        out_specs=pl.BlockSpec((None, tb, 128), lambda g: (g, 0, 0)),
        scratch_shapes=[pltpu.VMEM((tb, _FC1_KPAD), jnp.float32)],
        compiler_params=pltpu.CompilerParams(
            dimension_semantics=("parallel",)),
    )(pe, prepped["w1"], prepped["w2"], prepped["wf1"], prepped["wf2"],
      prepped["bias"])

    return out3.reshape(bp, 128)[:B, :1]                        # (B, 1)


# ----------------------------------------------------------------------------
# Pure-JAX reference (XLA conv) for correctness checking only.
# ----------------------------------------------------------------------------
def qnet_forward_ref(x_nchw, params):
    def conv(x, w, b):
        dn = lax.conv_dimension_numbers(x.shape, w.shape, ("NCHW", "OIHW", "NCHW"))
        y = lax.conv_general_dilated(x, w, (_S, _S), [(_P, _P), (_P, _P)],
                                     dimension_numbers=dn)
        return jax.nn.relu(y + b[None, :, None, None])

    x = conv(x_nchw, params["conv1_w"], params["conv1_b"])
    x = conv(x, params["conv2_w"], params["conv2_b"])
    x = x.reshape(x.shape[0], -1)
    x = jax.nn.relu(x @ params["fc1_w"].T + params["fc1_b"])
    x = jax.nn.relu(x @ params["fc2_w"].T + params["fc2_b"])
    return x


def init_params(key, input_num_channels=2):
    ks = jax.random.split(key, 8)

    def u(k, shape, fan_in):
        bound = 1.0 / jnp.sqrt(fan_in)
        return jax.random.uniform(k, shape, jnp.float32, -bound, bound)

    c_in = input_num_channels
    return {
        "conv1_w": u(ks[0], (_C1, c_in, _K, _K), c_in * _K * _K),
        "conv1_b": u(ks[1], (_C1,), c_in * _K * _K),
        "conv2_w": u(ks[2], (_C2, _C1, _K, _K), _C1 * _K * _K),
        "conv2_b": u(ks[3], (_C2,), _C1 * _K * _K),
        "fc1_w":   u(ks[4], (_FC1_OUT, _C2 * _N2), _C2 * _N2),
        "fc1_b":   u(ks[5], (_FC1_OUT,), _C2 * _N2),
        "fc2_w":   u(ks[6], (1, _FC1_OUT), _FC1_OUT),
        "fc2_b":   u(ks[7], (1,), _FC1_OUT),
    }


if __name__ == "__main__":
    key = jax.random.PRNGKey(0)
    kp, kx = jax.random.split(key)

    # GRID_SIZE must be 32 so that 32*9*9 matches fc1's input features;
    # input channels = 2 (spec + canvas planes), batch = 2.
    B, C, H, W = 2, 2, 32, 32
    x = (jax.random.uniform(kx, (B, C, H, W)) > 0.5).astype(jnp.float32)

    params = init_params(kp, input_num_channels=C)
    prepped = prepare_params(params)        # weight pre-layout, done once

    fwd = jax.jit(qnet_forward)
    out = jax.block_until_ready(fwd(x, prepped))

    ref = jax.block_until_ready(jax.jit(qnet_forward_ref)(x, params))

    assert out.shape == (B, 1), out.shape
    assert jnp.allclose(out, ref, rtol=1e-3, atol=1e-3), (out, ref)
    print("KERNEL_OK")
</pallas_src>

<mosaic_0001>
module attributes {stable_mosaic.version = 11 : i64} {
  func.func @kernel(%arg0: i32, %arg1: memref<1x33x4096xf32, #tpu.memory_space<vmem>>, %arg2: memref<16x33xf32, #tpu.memory_space<vmem>>, %arg3: memref<512x16xf32, #tpu.memory_space<vmem>>, %arg4: memref<4096x64xf32, #tpu.memory_space<vmem>>, %arg5: memref<64x128xf32, #tpu.memory_space<vmem>>, %arg6: memref<34x128xf32, #tpu.memory_space<vmem>>, %arg7: memref<1x2x128xf32, #tpu.memory_space<vmem>>, %arg8: memref<2x4096xf32, #tpu.memory_space<vmem>>) attributes {dimension_semantics = [#tpu.dimension_semantics<parallel>], iteration_bounds = array<i64: 1>, scalar_prefetch = 0 : i64, scratch_operands = 1 : i64, tpu.core_type = #tpu.core_type<tc>, window_params = [{transform_indices = @transform_0, window_bounds = array<i64: 1, 33, 4096>}, {pipeline_mode = #tpu.pipeline_mode<synchronous>, transform_indices = @transform_1, window_bounds = array<i64: 16, 33>}, {pipeline_mode = #tpu.pipeline_mode<synchronous>, transform_indices = @transform_2, window_bounds = array<i64: 512, 16>}, {pipeline_mode = #tpu.pipeline_mode<synchronous>, transform_indices = @transform_3, window_bounds = array<i64: 4096, 64>}, {pipeline_mode = #tpu.pipeline_mode<synchronous>, transform_indices = @transform_4, window_bounds = array<i64: 64, 128>}, {pipeline_mode = #tpu.pipeline_mode<synchronous>, transform_indices = @transform_5, window_bounds = array<i64: 34, 128>}, {transform_indices = @transform_6, window_bounds = array<i64: 1, 2, 128>}]} {
    %c0 = arith.constant 0 : index
    %c0_0 = arith.constant 0 : index
    %0 = vector.load %arg2[%c0, %c0_0] : memref<16x33xf32, #tpu.memory_space<vmem>>, vector<16x33xf32>
    %cst = arith.constant 0.000000e+00 : f32
    %1 = vector.broadcast %cst : f32 to vector<32x256xf32>
    %c0_1 = arith.constant 0 : index
    %c0_2 = arith.constant 0 : index
    %c0_3 = arith.constant 0 : index
    %2 = vector.load %arg1[%c0_1, %c0_2, %c0_3] : memref<1x33x4096xf32, #tpu.memory_space<vmem>>, vector<1x33x256xf32>
    %3 = vector.shape_cast %2 : vector<1x33x256xf32> to vector<33x256xf32>
    %cst_4 = arith.constant dense<0.000000e+00> : vector<16x256xf32>
    %4 = tpu.matmul %0, %3, %cst_4 {dimension_numbers = #tpu.dot_dimension_numbers<[1], [0], [0], [1], [0, 0, 1, 1], [], []>} : vector<16x33xf32>, vector<33x256xf32>, vector<16x256xf32> -> vector<16x256xf32>
    %cst_5 = arith.constant 0.000000e+00 : f32
    %5 = vector.broadcast %cst_5 : f32 to vector<16x256xf32>
    %6 = arith.maximumf %4, %5 : vector<16x256xf32>
    %c0_6 = arith.constant 0 : index
    %c0_7 = arith.constant 0 : index
    %7 = vector.load %arg3[%c0_6, %c0_7] : memref<512x16xf32, #tpu.memory_space<vmem>>, vector<32x16xf32>
    %cst_8 = arith.constant dense<0.000000e+00> : vector<32x256xf32>
    %8 = tpu.matmul %7, %6, %cst_8 {dimension_numbers = #tpu.dot_dimension_numbers<[1], [0], [0], [1], [0, 0, 1, 1], [], []>} : vector<32x16xf32>, vector<16x256xf32>, vector<32x256xf32> -> vector<32x256xf32>
    %9 = arith.addf %1, %8 : vector<32x256xf32>
    %c0_9 = arith.constant 0 : index
    %c0_10 = arith.constant 0 : index
    %c256 = arith.constant 256 : index
    %10 = vector.load %arg1[%c0_9, %c0_10, %c256] : memref<1x33x4096xf32, #tpu.memory_space<vmem>>, vector<1x33x256xf32>
    %11 = vector.shape_cast %10 : vector<1x33x256xf32> to vector<33x256xf32>
    %cst_11 = arith.constant dense<0.000000e+00> : vector<16x256xf32>
    %12 = tpu.matmul %0, %11, %cst_11 {dimension_numbers = #tpu.dot_dimension_numbers<[1], [0], [0], [1], [0, 0, 1, 1], [], []>} : vector<16x33xf32>, vector<33x256xf32>, vector<16x256xf32> -> vector<16x256xf32>
    %cst_12 = arith.constant 0.000000e+00 : f32
    %13 = vector.broadcast %cst_12 : f32 to vector<16x256xf32>
    %14 = arith.maximumf %12, %13 : vector<16x256xf32>
    %c32 = arith.constant 32 : index
    %c0_13 = arith.constant 0 : index
    %15 = vector.load %arg3[%c32, %c0_13] : memref<512x16xf32, #tpu.memory_space<vmem>>, vector<32x16xf32>
    %cst_14 = arith.constant dense<0.000000e+00> : vector<32x256xf32>
    %16 = tpu.matmul %15, %14, %cst_14 {dimension_numbers = #tpu.dot_dimension_numbers<[1], [0], [0], [1], [0, 0, 1, 1], [], []>} : vector<32x16xf32>, vector<16x256xf32>, vector<32x256xf32> -> vector<32x256xf32>
    %17 = arith.addf %9, %16 : vector<32x256xf32>
    %c0_15 = arith.constant 0 : index
    %c0_16 = arith.constant 0 : index
    %c512 = arith.constant 512 : index
    %18 = vector.load %arg1[%c0_15, %c0_16, %c512] : memref<1x33x4096xf32, #tpu.memory_space<vmem>>, vector<1x33x256xf32>
    %19 = vector.shape_cast %18 : vector<1x33x256xf32> to vector<33x256xf32>
    %cst_17 = arith.constant dense<0.000000e+00> : vector<16x256xf32>
    %20 = tpu.matmul %0, %19, %cst_17 {dimension_numbers = #tpu.dot_dimension_numbers<[1], [0], [0], [1], [0, 0, 1, 1], [], []>} : vector<16x33xf32>, vector<33x256xf32>, vector<16x256xf32> -> vector<16x256xf32>
    %cst_18 = arith.constant 0.000000e+00 : f32
    %21 = vector.broadcast %cst_18 : f32 to vector<16x256xf32>
    %22 = arith.maximumf %20, %21 : vector<16x256xf32>
    %c64 = arith.constant 64 : index
    %c0_19 = arith.constant 0 : index
    %23 = vector.load %arg3[%c64, %c0_19] : memref<512x16xf32, #tpu.memory_space<vmem>>, vector<32x16xf32>
    %cst_20 = arith.constant dense<0.000000e+00> : vector<32x256xf32>
    %24 = tpu.matmul %23, %22, %cst_20 {dimension_numbers = #tpu.dot_dimension_numbers<[1], [0], [0], [1], [0, 0, 1, 1], [], []>} : vector<32x16xf32>, vector<16x256xf32>, vector<32x256xf32> -> vector<32x256xf32>
    %25 = arith.addf %17, %24 : vector<32x256xf32>
    %c0_21 = arith.constant 0 : index
    %c0_22 = arith.constant 0 : index
    %c768 = arith.constant 768 : index
    %26 = vector.load %arg1[%c0_21, %c0_22, %c768] : memref<1x33x4096xf32, #tpu.memory_space<vmem>>, vector<1x33x256xf32>
    %27 = vector.shape_cast %26 : vector<1x33x256xf32> to vector<33x256xf32>
    %cst_23 = arith.constant dense<0.000000e+00> : vector<16x256xf32>
    %28 = tpu.matmul %0, %27, %cst_23 {dimension_numbers = #tpu.dot_dimension_numbers<[1], [0], [0], [1], [0, 0, 1, 1], [], []>} : vector<16x33xf32>, vector<33x256xf32>, vector<16x256xf32> -> vector<16x256xf32>
    %cst_24 = arith.constant 0.000000e+00 : f32
    %29 = vector.broadcast %cst_24 : f32 to vector<16x256xf32>
    %30 = arith.maximumf %28, %29 : vector<16x256xf32>
    %c96 = arith.constant 96 : index
    %c0_25 = arith.constant 0 : index
    %31 = vector.load %arg3[%c96, %c0_25] : memref<512x16xf32, #tpu.memory_space<vmem>>, vector<32x16xf32>
    %cst_26 = arith.constant dense<0.000000e+00> : vector<32x256xf32>
    %32 = tpu.matmul %31, %30, %cst_26 {dimension_numbers = #tpu.dot_dimension_numbers<[1], [0], [0], [1], [0, 0, 1, 1], [], []>} : vector<32x16xf32>, vector<16x256xf32>, vector<32x256xf32> -> vector<32x256xf32>
    %33 = arith.addf %25, %32 : vector<32x256xf32>
    %c0_27 = arith.constant 0 : index
    %c0_28 = arith.constant 0 : index
    %c1024 = arith.constant 1024 : index
    %34 = vector.load %arg1[%c0_27, %c0_28, %c1024] : memref<1x33x4096xf32, #tpu.memory_space<vmem>>, vector<1x33x256xf32>
    %35 = vector.shape_cast %34 : vector<1x33x256xf32> to vector<33x256xf32>
    %cst_29 = arith.constant dense<0.000000e+00> : vector<16x256xf32>
    %36 = tpu.matmul %0, %35, %cst_29 {dimension_numbers = #tpu.dot_dimension_numbers<[1], [0], [0], [1], [0, 0, 1, 1], [], []>} : vector<16x33xf32>, vector<33x256xf32>, vector<16x256xf32> -> vector<16x256xf32>
    %cst_30 = arith.constant 0.000000e+00 : f32
    %37 = vector.broadcast %cst_30 : f32 to vector<16x256xf32>
    %38 = arith.maximumf %36, %37 : vector<16x256xf32>
    %c128 = arith.constant 128 : index
    %c0_31 = arith.constant 0 : index
    %39 = vector.load %arg3[%c128, %c0_31] : memref<512x16xf32, #tpu.memory_space<vmem>>, vector<32x16xf32>
    %cst_32 = arith.constant dense<0.000000e+00> : vector<32x256xf32>
    %40 = tpu.matmul %39, %38, %cst_32 {dimension_numbers = #tpu.dot_dimension_numbers<[1], [0], [0], [1], [0, 0, 1, 1], [], []>} : vector<32x16xf32>, vector<16x256xf32>, vector<32x256xf32> -> vector<32x256xf32>
    %41 = arith.addf %33, %40 : vector<32x256xf32>
    %c0_33 = arith.constant 0 : index
    %c0_34 = arith.constant 0 : index
    %c1280 = arith.constant 1280 : index
    %42 = vector.load %arg1[%c0_33, %c0_34, %c1280] : memref<1x33x4096xf32, #tpu.memory_space<vmem>>, vector<1x33x256xf32>
    %43 = vector.shape_cast %42 : vector<1x33x256xf32> to vector<33x256xf32>
    %cst_35 = arith.constant dense<0.000000e+00> : vector<16x256xf32>
    %44 = tpu.matmul %0, %43, %cst_35 {dimension_numbers = #tpu.dot_dimension_numbers<[1], [0], [0], [1], [0, 0, 1, 1], [], []>} : vector<16x33xf32>, vector<33x256xf32>, vector<16x256xf32> -> vector<16x256xf32>
    %cst_36 = arith.constant 0.000000e+00 : f32
    %45 = vector.broadcast %cst_36 : f32 to vector<16x256xf32>
    %46 = arith.maximumf %44, %45 : vector<16x256xf32>
    %c160 = arith.constant 160 : index
    %c0_37 = arith.constant 0 : index
    %47 = vector.load %arg3[%c160, %c0_37] : memref<512x16xf32, #tpu.memory_space<vmem>>, vector<32x16xf32>
    %cst_38 = arith.constant dense<0.000000e+00> : vector<32x256xf32>
    %48 = tpu.matmul %47, %46, %cst_38 {dimension_numbers = #tpu.dot_dimension_numbers<[1], [0], [0], [1], [0, 0, 1, 1], [], []>} : vector<32x16xf32>, vector<16x256xf32>, vector<32x256xf32> -> vector<32x256xf32>
    %49 = arith.addf %41, %48 : vector<32x256xf32>
    %c0_39 = arith.constant 0 : index
    %c0_40 = arith.constant 0 : index
    %c1536 = arith.constant 1536 : index
    %50 = vector.load %arg1[%c0_39, %c0_40, %c1536] : memref<1x33x4096xf32, #tpu.memory_space<vmem>>, vector<1x33x256xf32>
    %51 = vector.shape_cast %50 : vector<1x33x256xf32> to vector<33x256xf32>
    %cst_41 = arith.constant dense<0.000000e+00> : vector<16x256xf32>
    %52 = tpu.matmul %0, %51, %cst_41 {dimension_numbers = #tpu.dot_dimension_numbers<[1], [0], [0], [1], [0, 0, 1, 1], [], []>} : vector<16x33xf32>, vector<33x256xf32>, vector<16x256xf32> -> vector<16x256xf32>
    %cst_42 = arith.constant 0.000000e+00 : f32
    %53 = vector.broadcast %cst_42 : f32 to vector<16x256xf32>
    %54 = arith.maximumf %52, %53 : vector<16x256xf32>
    %c192 = arith.constant 192 : index
    %c0_43 = arith.constant 0 : index
    %55 = vector.load %arg3[%c192, %c0_43] : memref<512x16xf32, #tpu.memory_space<vmem>>, vector<32x16xf32>
    %cst_44 = arith.constant dense<0.000000e+00> : vector<32x256xf32>
    %56 = tpu.matmul %55, %54, %cst_44 {dimension_numbers = #tpu.dot_dimension_numbers<[1], [0], [0], [1], [0, 0, 1, 1], [], []>} : vector<32x16xf32>, vector<16x256xf32>, vector<32x256xf32> -> vector<32x256xf32>
    %57 = arith.addf %49, %56 : vector<32x256xf32>
    %c0_45 = arith.constant 0 : index
    %c0_46 = arith.constant 0 : index
    %c1792 = arith.constant 1792 : index
    %58 = vector.load %arg1[%c0_45, %c0_46, %c1792] : memref<1x33x4096xf32, #tpu.memory_space<vmem>>, vector<1x33x256xf32>
    %59 = vector.shape_cast %58 : vector<1x33x256xf32> to vector<33x256xf32>
    %cst_47 = arith.constant dense<0.000000e+00> : vector<16x256xf32>
    %60 = tpu.matmul %0, %59, %cst_47 {dimension_numbers = #tpu.dot_dimension_numbers<[1], [0], [0], [1], [0, 0, 1, 1], [], []>} : vector<16x33xf32>, vector<33x256xf32>, vector<16x256xf32> -> vector<16x256xf32>
    %cst_48 = arith.constant 0.000000e+00 : f32
    %61 = vector.broadcast %cst_48 : f32 to vector<16x256xf32>
    %62 = arith.maximumf %60, %61 : vector<16x256xf32>
    %c224 = arith.constant 224 : index
    %c0_49 = arith.constant 0 : index
    %63 = vector.load %arg3[%c224, %c0_49] : memref<512x16xf32, #tpu.memory_space<vmem>>, vector<32x16xf32>
    %cst_50 = arith.constant dense<0.000000e+00> : vector<32x256xf32>
    %64 = tpu.matmul %63, %62, %cst_50 {dimension_numbers = #tpu.dot_dimension_numbers<[1], [0], [0], [1], [0, 0, 1, 1], [], []>} : vector<32x16xf32>, vector<16x256xf32>, vector<32x256xf32> -> vector<32x256xf32>
    %65 = arith.addf %57, %64 : vector<32x256xf32>
    %c0_51 = arith.constant 0 : index
    %c0_52 = arith.constant 0 : index
    %c2048 = arith.constant 2048 : index
    %66 = vector.load %arg1[%c0_51, %c0_52, %c2048] : memref<1x33x4096xf32, #tpu.memory_space<vmem>>, vector<1x33x256xf32>
    %67 = vector.shape_cast %66 : vector<1x33x256xf32> to vector<33x256xf32>
    %cst_53 = arith.constant dense<0.000000e+00> : vector<16x256xf32>
    %68 = tpu.matmul %0, %67, %cst_53 {dimension_numbers = #tpu.dot_dimension_numbers<[1], [0], [0], [1], [0, 0, 1, 1], [], []>} : vector<16x33xf32>, vector<33x256xf32>, vector<16x256xf32> -> vector<16x256xf32>
    %cst_54 = arith.constant 0.000000e+00 : f32
    %69 = vector.broadcast %cst_54 : f32 to vector<16x256xf32>
    %70 = arith.maximumf %68, %69 : vector<16x256xf32>
    %c256_55 = arith.constant 256 : index
    %c0_56 = arith.constant 0 : index
    %71 = vector.load %arg3[%c256_55, %c0_56] : memref<512x16xf32, #tpu.memory_space<vmem>>, vector<32x16xf32>
    %cst_57 = arith.constant dense<0.000000e+00> : vector<32x256xf32>
    %72 = tpu.matmul %71, %70, %cst_57 {dimension_numbers = #tpu.dot_dimension_numbers<[1], [0], [0], [1], [0, 0, 1, 1], [], []>} : vector<32x16xf32>, vector<16x256xf32>, vector<32x256xf32> -> vector<32x256xf32>
    %73 = arith.addf %65, %72 : vector<32x256xf32>
    %c0_58 = arith.constant 0 : index
    %c0_59 = arith.constant 0 : index
    %c2304 = arith.constant 2304 : index
    %74 = vector.load %arg1[%c0_58, %c0_59, %c2304] : memref<1x33x4096xf32, #tpu.memory_space<vmem>>, vector<1x33x256xf32>
    %75 = vector.shape_cast %74 : vector<1x33x256xf32> to vector<33x256xf32>
    %cst_60 = arith.constant dense<0.000000e+00> : vector<16x256xf32>
    %76 = tpu.matmul %0, %75, %cst_60 {dimension_numbers = #tpu.dot_dimension_numbers<[1], [0], [0], [1], [0, 0, 1, 1], [], []>} : vector<16x33xf32>, vector<33x256xf32>, vector<16x256xf32> -> vector<16x256xf32>
    %cst_61 = arith.constant 0.000000e+00 : f32
    %77 = vector.broadcast %cst_61 : f32 to vector<16x256xf32>
    %78 = arith.maximumf %76, %77 : vector<16x256xf32>
    %c288 = arith.constant 288 : index
    %c0_62 = arith.constant 0 : index
    %79 = vector.load %arg3[%c288, %c0_62] : memref<512x16xf32, #tpu.memory_space<vmem>>, vector<32x16xf32>
    %cst_63 = arith.constant dense<0.000000e+00> : vector<32x256xf32>
    %80 = tpu.matmul %79, %78, %cst_63 {dimension_numbers = #tpu.dot_dimension_numbers<[1], [0], [0], [1], [0, 0, 1, 1], [], []>} : vector<32x16xf32>, vector<16x256xf32>, vector<32x256xf32> -> vector<32x256xf32>
    %81 = arith.addf %73, %80 : vector<32x256xf32>
    %c0_64 = arith.constant 0 : index
    %c0_65 = arith.constant 0 : index
    %c2560 = arith.constant 2560 : index
    %82 = vector.load %arg1[%c0_64, %c0_65, %c2560] : memref<1x33x4096xf32, #tpu.memory_space<vmem>>, vector<1x33x256xf32>
    %83 = vector.shape_cast %82 : vector<1x33x256xf32> to vector<33x256xf32>
    %cst_66 = arith.constant dense<0.000000e+00> : vector<16x256xf32>
    %84 = tpu.matmul %0, %83, %cst_66 {dimension_numbers = #tpu.dot_dimension_numbers<[1], [0], [0], [1], [0, 0, 1, 1], [], []>} : vector<16x33xf32>, vector<33x256xf32>, vector<16x256xf32> -> vector<16x256xf32>
    %cst_67 = arith.constant 0.000000e+00 : f32
    %85 = vector.broadcast %cst_67 : f32 to vector<16x256xf32>
    %86 = arith.maximumf %84, %85 : vector<16x256xf32>
    %c320 = arith.constant 320 : index
    %c0_68 = arith.constant 0 : index
    %87 = vector.load %arg3[%c320, %c0_68] : memref<512x16xf32, #tpu.memory_space<vmem>>, vector<32x16xf32>
    %cst_69 = arith.constant dense<0.000000e+00> : vector<32x256xf32>
    %88 = tpu.matmul %87, %86, %cst_69 {dimension_numbers = #tpu.dot_dimension_numbers<[1], [0], [0], [1], [0, 0, 1, 1], [], []>} : vector<32x16xf32>, vector<16x256xf32>, vector<32x256xf32> -> vector<32x256xf32>
    %89 = arith.addf %81, %88 : vector<32x256xf32>
    %c0_70 = arith.constant 0 : index
    %c0_71 = arith.constant 0 : index
    %c2816 = arith.constant 2816 : index
    %90 = vector.load %arg1[%c0_70, %c0_71, %c2816] : memref<1x33x4096xf32, #tpu.memory_space<vmem>>, vector<1x33x256xf32>
    %91 = vector.shape_cast %90 : vector<1x33x256xf32> to vector<33x256xf32>
    %cst_72 = arith.constant dense<0.000000e+00> : vector<16x256xf32>
    %92 = tpu.matmul %0, %91, %cst_72 {dimension_numbers = #tpu.dot_dimension_numbers<[1], [0], [0], [1], [0, 0, 1, 1], [], []>} : vector<16x33xf32>, vector<33x256xf32>, vector<16x256xf32> -> vector<16x256xf32>
    %cst_73 = arith.constant 0.000000e+00 : f32
    %93 = vector.broadcast %cst_73 : f32 to vector<16x256xf32>
    %94 = arith.maximumf %92, %93 : vector<16x256xf32>
    %c352 = arith.constant 352 : index
    %c0_74 = arith.constant 0 : index
    %95 = vector.load %arg3[%c352, %c0_74] : memref<512x16xf32, #tpu.memory_space<vmem>>, vector<32x16xf32>
    %cst_75 = arith.constant dense<0.000000e+00> : vector<32x256xf32>
    %96 = tpu.matmul %95, %94, %cst_75 {dimension_numbers = #tpu.dot_dimension_numbers<[1], [0], [0], [1], [0, 0, 1, 1], [], []>} : vector<32x16xf32>, vector<16x256xf32>, vector<32x256xf32> -> vector<32x256xf32>
    %97 = arith.addf %89, %96 : vector<32x256xf32>
    %c0_76 = arith.constant 0 : index
    %c0_77 = arith.constant 0 : index
    %c3072 = arith.constant 3072 : index
    %98 = vector.load %arg1[%c0_76, %c0_77, %c3072] : memref<1x33x4096xf32, #tpu.memory_space<vmem>>, vector<1x33x256xf32>
    %99 = vector.shape_cast %98 : vector<1x33x256xf32> to vector<33x256xf32>
    %cst_78 = arith.constant dense<0.000000e+00> : vector<16x256xf32>
    %100 = tpu.matmul %0, %99, %cst_78 {dimension_numbers = #tpu.dot_dimension_numbers<[1], [0], [0], [1], [0, 0, 1, 1], [], []>} : vector<16x33xf32>, vector<33x256xf32>, vector<16x256xf32> -> vector<16x256xf32>
    %cst_79 = arith.constant 0.000000e+00 : f32
    %101 = vector.broadcast %cst_79 : f32 to vector<16x256xf32>
    %102 = arith.maximumf %100, %101 : vector<16x256xf32>
    %c384 = arith.constant 384 : index
    %c0_80 = arith.constant 0 : index
    %103 = vector.load %arg3[%c384, %c0_80] : memref<512x16xf32, #tpu.memory_space<vmem>>, vector<32x16xf32>
    %cst_81 = arith.constant dense<0.000000e+00> : vector<32x256xf32>
    %104 = tpu.matmul %103, %102, %cst_81 {dimension_numbers = #tpu.dot_dimension_numbers<[1], [0], [0], [1], [0, 0, 1, 1], [], []>} : vector<32x16xf32>, vector<16x256xf32>, vector<32x256xf32> -> vector<32x256xf32>
    %105 = arith.addf %97, %104 : vector<32x256xf32>
    %c0_82 = arith.constant 0 : index
    %c0_83 = arith.constant 0 : index
    %c3328 = arith.constant 3328 : index
    %106 = vector.load %arg1[%c0_82, %c0_83, %c3328] : memref<1x33x4096xf32, #tpu.memory_space<vmem>>, vector<1x33x256xf32>
    %107 = vector.shape_cast %106 : vector<1x33x256xf32> to vector<33x256xf32>
    %cst_84 = arith.constant dense<0.000000e+00> : vector<16x256xf32>
    %108 = tpu.matmul %0, %107, %cst_84 {dimension_numbers = #tpu.dot_dimension_numbers<[1], [0], [0], [1], [0, 0, 1, 1], [], []>} : vector<16x33xf32>, vector<33x256xf32>, vector<16x256xf32> -> vector<16x256xf32>
    %cst_85 = arith.constant 0.000000e+00 : f32
    %109 = vector.broadcast %cst_85 : f32 to vector<16x256xf32>
    %110 = arith.maximumf %108, %109 : vector<16x256xf32>
    %c416 = arith.constant 416 : index
    %c0_86 = arith.constant 0 : index
    %111 = vector.load %arg3[%c416, %c0_86] : memref<512x16xf32, #tpu.memory_space<vmem>>, vector<32x16xf32>
    %cst_87 = arith.constant dense<0.000000e+00> : vector<32x256xf32>
    %112 = tpu.matmul %111, %110, %cst_87 {dimension_numbers = #tpu.dot_dimension_numbers<[1], [0], [0], [1], [0, 0, 1, 1], [], []>} : vector<32x16xf32>, vector<16x256xf32>, vector<32x256xf32> -> vector<32x256xf32>
    %113 = arith.addf %105, %112 : vector<32x256xf32>
    %c0_88 = arith.constant 0 : index
    %c0_89 = arith.constant 0 : index
    %c3584 = arith.constant 3584 : index
    %114 = vector.load %arg1[%c0_88, %c0_89, %c3584] : memref<1x33x4096xf32, #tpu.memory_space<vmem>>, vector<1x33x256xf32>
    %115 = vector.shape_cast %114 : vector<1x33x256xf32> to vector<33x256xf32>
    %cst_90 = arith.constant dense<0.000000e+00> : vector<16x256xf32>
    %116 = tpu.matmul %0, %115, %cst_90 {dimension_numbers = #tpu.dot_dimension_numbers<[1], [0], [0], [1], [0, 0, 1, 1], [], []>} : vector<16x33xf32>, vector<33x256xf32>, vector<16x256xf32> -> vector<16x256xf32>
    %cst_91 = arith.constant 0.000000e+00 : f32
    %117 = vector.broadcast %cst_91 : f32 to vector<16x256xf32>
    %118 = arith.maximumf %116, %117 : vector<16x256xf32>
    %c448 = arith.constant 448 : index
    %c0_92 = arith.constant 0 : index
    %119 = vector.load %arg3[%c448, %c0_92] : memref<512x16xf32, #tpu.memory_space<vmem>>, vector<32x16xf32>
    %cst_93 = arith.constant dense<0.000000e+00> : vector<32x256xf32>
    %120 = tpu.matmul %119, %118, %cst_93 {dimension_numbers = #tpu.dot_dimension_numbers<[1], [0], [0], [1], [0, 0, 1, 1], [], []>} : vector<32x16xf32>, vector<16x256xf32>, vector<32x256xf32> -> vector<32x256xf32>
    %121 = arith.addf %113, %120 : vector<32x256xf32>
    %c0_94 = arith.constant 0 : index
    %c0_95 = arith.constant 0 : index
    %c3840 = arith.constant 3840 : index
    %122 = vector.load %arg1[%c0_94, %c0_95, %c3840] : memref<1x33x4096xf32, #tpu.memory_space<vmem>>, vector<1x33x256xf32>
    %123 = vector.shape_cast %122 : vector<1x33x256xf32> to vector<33x256xf32>
    %cst_96 = arith.constant dense<0.000000e+00> : vector<16x256xf32>
    %124 = tpu.matmul %0, %123, %cst_96 {dimension_numbers = #tpu.dot_dimension_numbers<[1], [0], [0], [1], [0, 0, 1, 1], [], []>} : vector<16x33xf32>, vector<33x256xf32>, vector<16x256xf32> -> vector<16x256xf32>
    %cst_97 = arith.constant 0.000000e+00 : f32
    %125 = vector.broadcast %cst_97 : f32 to vector<16x256xf32>
    %126 = arith.maximumf %124, %125 : vector<16x256xf32>
    %c480 = arith.constant 480 : index
    %c0_98 = arith.constant 0 : index
    %127 = vector.load %arg3[%c480, %c0_98] : memref<512x16xf32, #tpu.memory_space<vmem>>, vector<32x16xf32>
    %cst_99 = arith.constant dense<0.000000e+00> : vector<32x256xf32>
    %128 = tpu.matmul %127, %126, %cst_99 {dimension_numbers = #tpu.dot_dimension_numbers<[1], [0], [0], [1], [0, 0, 1, 1], [], []>} : vector<32x16xf32>, vector<16x256xf32>, vector<32x256xf32> -> vector<32x256xf32>
    %129 = arith.addf %121, %128 : vector<32x256xf32>
    %c0_100 = arith.constant 0 : index
    %c0_101 = arith.constant 0 : index
    %130 = vector.load %arg6[%c0_100, %c0_101] : memref<34x128xf32, #tpu.memory_space<vmem>>, vector<32x1xf32>
    %131 = vector.broadcast %130 : vector<32x1xf32> to vector<32x256xf32>
    %132 = arith.addf %129, %131 : vector<32x256xf32>
    %cst_102 = arith.constant 0.000000e+00 : f32
    %133 = vector.broadcast %cst_102 : f32 to vector<32x256xf32>
    %134 = arith.maximumf %132, %133 : vector<32x256xf32>
    %135 = vector.extract_strided_slice %134 {offsets = [0, 0], sizes = [1, 128], strides = [1, 1]} : vector<32x256xf32> to vector<1x128xf32>
    %c0_103 = arith.constant 0 : index
    %c0_104 = arith.constant 0 : index
    %136 = vector.load %arg8[%c0_103, %c0_104] : memref<2x4096xf32, #tpu.memory_space<vmem>>, vector<1x128xf32>
    tpu.vector_store %arg8[%c0_103, %c0_104], %135 {strides = array<i32>} : memref<2x4096xf32, #tpu.memory_space<vmem>>, vector<1x128xf32>,
    %137 = vector.extract_strided_slice %134 {offsets = [1, 0], sizes = [1, 128], strides = [1, 1]} : vector<32x256xf32> to vector<1x128xf32>
    %c0_105 = arith.constant 0 : index
    %c128_106 = arith.constant 128 : index
    %138 = vector.load %arg8[%c0_105, %c128_106] : memref<2x4096xf32, #tpu.memory_space<vmem>>, vector<1x128xf32>
    tpu.vector_store %arg8[%c0_105, %c128_106], %137 {strides = array<i32>} : memref<2x4096xf32, #tpu.memory_space<vmem>>, vector<1x128xf32>,
    %139 = vector.extract_strided_slice %134 {offsets = [2, 0], sizes = [1, 128], strides = [1, 1]} : vector<32x256xf32> to vector<1x128xf32>
    %c0_107 = arith.constant 0 : index
    %c256_108 = arith.constant 256 : index
    %140 = vector.load %arg8[%c0_107, %c256_108] : memref<2x4096xf32, #tpu.memory_space<vmem>>, vector<1x128xf32>
    tpu.vector_store %arg8[%c0_107, %c256_108], %139 {strides = array<i32>} : memref<2x4096xf32, #tpu.memory_space<vmem>>, vector<1x128xf32>,
    %141 = vector.extract_strided_slice %134 {offsets = [3, 0], sizes = [1, 128], strides = [1, 1]} : vector<32x256xf32> to vector<1x128xf32>
    %c0_109 = arith.constant 0 : index
    %c384_110 = arith.constant 384 : index
    %142 = vector.load %arg8[%c0_109, %c384_110] : memref<2x4096xf32, #tpu.memory_space<vmem>>, vector<1x128xf32>
    tpu.vector_store %arg8[%c0_109, %c384_110], %141 {strides = array<i32>} : memref<2x4096xf32, #tpu.memory_space<vmem>>, vector<1x128xf32>,
    %143 = vector.extract_strided_slice %134 {offsets = [4, 0], sizes = [1, 128], strides = [1, 1]} : vector<32x256xf32> to vector<1x128xf32>
    %c0_111 = arith.constant 0 : index
    %c512_112 = arith.constant 512 : index
    %144 = vector.load %arg8[%c0_111, %c512_112] : memref<2x4096xf32, #tpu.memory_space<vmem>>, vector<1x128xf32>
    tpu.vector_store %arg8[%c0_111, %c512_112], %143 {strides = array<i32>} : memref<2x4096xf32, #tpu.memory_space<vmem>>, vector<1x128xf32>,
    %145 = vector.extract_strided_slice %134 {offsets = [5, 0], sizes = [1, 128], strides = [1, 1]} : vector<32x256xf32> to vector<1x128xf32>
    %c0_113 = arith.constant 0 : index
    %c640 = arith.constant 640 : index
    %146 = vector.load %arg8[%c0_113, %c640] : memref<2x4096xf32, #tpu.memory_space<vmem>>, vector<1x128xf32>
    tpu.vector_store %arg8[%c0_113, %c640], %145 {strides = array<i32>} : memref<2x4096xf32, #tpu.memory_space<vmem>>, vector<1x128xf32>,
    %147 = vector.extract_strided_slice %134 {offsets = [6, 0], sizes = [1, 128], strides = [1, 1]} : vector<32x256xf32> to vector<1x128xf32>
    %c0_114 = arith.constant 0 : index
    %c768_115 = arith.constant 768 : index
    %148 = vector.load %arg8[%c0_114, %c768_115] : memref<2x4096xf32, #tpu.memory_space<vmem>>, vector<1x128xf32>
    tpu.vector_store %arg8[%c0_114, %c768_115], %147 {strides = array<i32>} : memref<2x4096xf32, #tpu.memory_space<vmem>>, vector<1x128xf32>,
    %149 = vector.extract_strided_slice %134 {offsets = [7, 0], sizes = [1, 128], strides = [1, 1]} : vector<32x256xf32> to vector<1x128xf32>
    %c0_116 = arith.constant 0 : index
    %c896 = arith.constant 896 : index
    %150 = vector.load %arg8[%c0_116, %c896] : memref<2x4096xf32, #tpu.memory_space<vmem>>, vector<1x128xf32>
    tpu.vector_store %arg8[%c0_116, %c896], %149 {strides = array<i32>} : memref<2x4096xf32, #tpu.memory_space<vmem>>, vector<1x128xf32>,
    %151 = vector.extract_strided_slice %134 {offsets = [8, 0], sizes = [1, 128], strides = [1, 1]} : vector<32x256xf32> to vector<1x128xf32>
    %c0_117 = arith.constant 0 : index
    %c1024_118 = arith.constant 1024 : index
    %152 = vector.load %arg8[%c0_117, %c1024_118] : memref<2x4096xf32, #tpu.memory_space<vmem>>, vector<1x128xf32>
    tpu.vector_store %arg8[%c0_117, %c1024_118], %151 {strides = array<i32>} : memref<2x4096xf32, #tpu.memory_space<vmem>>, vector<1x128xf32>,
    %153 = vector.extract_strided_slice %134 {offsets = [9, 0], sizes = [1, 128], strides = [1, 1]} : vector<32x256xf32> to vector<1x128xf32>
    %c0_119 = arith.constant 0 : index
    %c1152 = arith.constant 1152 : index
    %154 = vector.load %arg8[%c0_119, %c1152] : memref<2x4096xf32, #tpu.memory_space<vmem>>, vector<1x128xf32>
    tpu.vector_store %arg8[%c0_119, %c1152], %153 {strides = array<i32>} : memref<2x4096xf32, #tpu.memory_space<vmem>>, vector<1x128xf32>,
    %155 = vector.extract_strided_slice %134 {offsets = [10, 0], sizes = [1, 128], strides = [1, 1]} : vector<32x256xf32> to vector<1x128xf32>
    %c0_120 = arith.constant 0 : index
    %c1280_121 = arith.constant 1280 : index
    %156 = vector.load %arg8[%c0_120, %c1280_121] : memref<2x4096xf32, #tpu.memory_space<vmem>>, vector<1x128xf32>
    tpu.vector_store %arg8[%c0_120, %c1280_121], %155 {strides = array<i32>} : memref<2x4096xf32, #tpu.memory_space<vmem>>, vector<1x128xf32>,
    %157 = vector.extract_strided_slice %134 {offsets = [11, 0], sizes = [1, 128], strides = [1, 1]} : vector<32x256xf32> to vector<1x128xf32>
    %c0_122 = arith.constant 0 : index
    %c1408 = arith.constant 1408 : index
    %158 = vector.load %arg8[%c0_122, %c1408] : memref<2x4096xf32, #tpu.memory_space<vmem>>, vector<1x128xf32>
    tpu.vector_store %arg8[%c0_122, %c1408], %157 {strides = array<i32>} : memref<2x4096xf32, #tpu.memory_space<vmem>>, vector<1x128xf32>,
    %159 = vector.extract_strided_slice %134 {offsets = [12, 0], sizes = [1, 128], strides = [1, 1]} : vector<32x256xf32> to vector<1x128xf32>
    %c0_123 = arith.constant 0 : index
    %c1536_124 = arith.constant 1536 : index
    %160 = vector.load %arg8[%c0_123, %c1536_124] : memref<2x4096xf32, #tpu.memory_space<vmem>>, vector<1x128xf32>
    tpu.vector_store %arg8[%c0_123, %c1536_124], %159 {strides = array<i32>} : memref<2x4096xf32, #tpu.memory_space<vmem>>, vector<1x128xf32>,
    %161 = vector.extract_strided_slice %134 {offsets = [13, 0], sizes = [1, 128], strides = [1, 1]} : vector<32x256xf32> to vector<1x128xf32>
    %c0_125 = arith.constant 0 : index
    %c1664 = arith.constant 1664 : index
    %162 = vector.load %arg8[%c0_125, %c1664] : memref<2x4096xf32, #tpu.memory_space<vmem>>, vector<1x128xf32>
    tpu.vector_store %arg8[%c0_125, %c1664], %161 {strides = array<i32>} : memref<2x4096xf32, #tpu.memory_space<vmem>>, vector<1x128xf32>,
    %163 = vector.extract_strided_slice %134 {offsets = [14, 0], sizes = [1, 128], strides = [1, 1]} : vector<32x256xf32> to vector<1x128xf32>
    %c0_126 = arith.constant 0 : index
    %c1792_127 = arith.constant 1792 : index
    %164 = vector.load %arg8[%c0_126, %c1792_127] : memref<2x4096xf32, #tpu.memory_space<vmem>>, vector<1x128xf32>
    tpu.vector_store %arg8[%c0_126, %c1792_127], %163 {strides = array<i32>} : memref<2x4096xf32, #tpu.memory_space<vmem>>, vector<1x128xf32>,
    %165 = vector.extract_strided_slice %134 {offsets = [15, 0], sizes = [1, 128], strides = [1, 1]} : vector<32x256xf32> to vector<1x128xf32>
    %c0_128 = arith.constant 0 : index
    %c1920 = arith.constant 1920 : index
    %166 = vector.load %arg8[%c0_128, %c1920] : memref<2x4096xf32, #tpu.memory_space<vmem>>, vector<1x128xf32>
    tpu.vector_store %arg8[%c0_128, %c1920], %165 {strides = array<i32>} : memref<2x4096xf32, #tpu.memory_space<vmem>>, vector<1x128xf32>,
    %167 = vector.extract_strided_slice %134 {offsets = [16, 0], sizes = [1, 128], strides = [1, 1]} : vector<32x256xf32> to vector<1x128xf32>
    %c0_129 = arith.constant 0 : index
    %c2048_130 = arith.constant 2048 : index
    %168 = vector.load %arg8[%c0_129, %c2048_130] : memref<2x4096xf32, #tpu.memory_space<vmem>>, vector<1x128xf32>
    tpu.vector_store %arg8[%c0_129, %c2048_130], %167 {strides = array<i32>} : memref<2x4096xf32, #tpu.memory_space<vmem>>, vector<1x128xf32>,
    %169 = vector.extract_strided_slice %134 {offsets = [17, 0], sizes = [1, 128], strides = [1, 1]} : vector<32x256xf32> to vector<1x128xf32>
    %c0_131 = arith.constant 0 : index
    %c2176 = arith.constant 2176 : index
    %170 = vector.load %arg8[%c0_131, %c2176] : memref<2x4096xf32, #tpu.memory_space<vmem>>, vector<1x128xf32>
    tpu.vector_store %arg8[%c0_131, %c2176], %169 {strides = array<i32>} : memref<2x4096xf32, #tpu.memory_space<vmem>>, vector<1x128xf32>,
    %171 = vector.extract_strided_slice %134 {offsets = [18, 0], sizes = [1, 128], strides = [1, 1]} : vector<32x256xf32> to vector<1x128xf32>
    %c0_132 = arith.constant 0 : index
    %c2304_133 = arith.constant 2304 : index
    %172 = vector.load %arg8[%c0_132, %c2304_133] : memref<2x4096xf32, #tpu.memory_space<vmem>>, vector<1x128xf32>
    tpu.vector_store %arg8[%c0_132, %c2304_133], %171 {strides = array<i32>} : memref<2x4096xf32, #tpu.memory_space<vmem>>, vector<1x128xf32>,
    %173 = vector.extract_strided_slice %134 {offsets = [19, 0], sizes = [1, 128], strides = [1, 1]} : vector<32x256xf32> to vector<1x128xf32>
    %c0_134 = arith.constant 0 : index
    %c2432 = arith.constant 2432 : index
    %174 = vector.load %arg8[%c0_134, %c2432] : memref<2x4096xf32, #tpu.memory_space<vmem>>, vector<1x128xf32>
    tpu.vector_store %arg8[%c0_134, %c2432], %173 {strides = array<i32>} : memref<2x4096xf32, #tpu.memory_space<vmem>>, vector<1x128xf32>,
    %175 = vector.extract_strided_slice %134 {offsets = [20, 0], sizes = [1, 128], strides = [1, 1]} : vector<32x256xf32> to vector<1x128xf32>
    %c0_135 = arith.constant 0 : index
    %c2560_136 = arith.constant 2560 : index
    %176 = vector.load %arg8[%c0_135, %c2560_136] : memref<2x4096xf32, #tpu.memory_space<vmem>>, vector<1x128xf32>
    tpu.vector_store %arg8[%c0_135, %c2560_136], %175 {strides = array<i32>} : memref<2x4096xf32, #tpu.memory_space<vmem>>, vector<1x128xf32>,
    %177 = vector.extract_strided_slice %134 {offsets = [21, 0], sizes = [1, 128], strides = [1, 1]} : vector<32x256xf32> to vector<1x128xf32>
    %c0_137 = arith.constant 0 : index
    %c2688 = arith.constant 2688 : index
    %178 = vector.load %arg8[%c0_137, %c2688] : memref<2x4096xf32, #tpu.memory_space<vmem>>, vector<1x128xf32>
    tpu.vector_store %arg8[%c0_137, %c2688], %177 {strides = array<i32>} : memref<2x4096xf32, #tpu.memory_space<vmem>>, vector<1x128xf32>,
    %179 = vector.extract_strided_slice %134 {offsets = [22, 0], sizes = [1, 128], strides = [1, 1]} : vector<32x256xf32> to vector<1x128xf32>
    %c0_138 = arith.constant 0 : index
    %c2816_139 = arith.constant 2816 : index
    %180 = vector.load %arg8[%c0_138, %c2816_139] : memref<2x4096xf32, #tpu.memory_space<vmem>>, vector<1x128xf32>
    tpu.vector_store %arg8[%c0_138, %c2816_139], %179 {strides = array<i32>} : memref<2x4096xf32, #tpu.memory_space<vmem>>, vector<1x128xf32>,
    %181 = vector.extract_strided_slice %134 {offsets = [23, 0], sizes = [1, 128], strides = [1, 1]} : vector<32x256xf32> to vector<1x128xf32>
    %c0_140 = arith.constant 0 : index
    %c2944 = arith.constant 2944 : index
    %182 = vector.load %arg8[%c0_140, %c2944] : memref<2x4096xf32, #tpu.memory_space<vmem>>, vector<1x128xf32>
    tpu.vector_store %arg8[%c0_140, %c2944], %181 {strides = array<i32>} : memref<2x4096xf32, #tpu.memory_space<vmem>>, vector<1x128xf32>,
    %183 = vector.extract_strided_slice %134 {offsets = [24, 0], sizes = [1, 128], strides = [1, 1]} : vector<32x256xf32> to vector<1x128xf32>
    %c0_141 = arith.constant 0 : index
    %c3072_142 = arith.constant 3072 : index
    %184 = vector.load %arg8[%c0_141, %c3072_142] : memref<2x4096xf32, #tpu.memory_space<vmem>>, vector<1x128xf32>
    tpu.vector_store %arg8[%c0_141, %c3072_142], %183 {strides = array<i32>} : memref<2x4096xf32, #tpu.memory_space<vmem>>, vector<1x128xf32>,
    %185 = vector.extract_strided_slice %134 {offsets = [25, 0], sizes = [1, 128], strides = [1, 1]} : vector<32x256xf32> to vector<1x128xf32>
    %c0_143 = arith.constant 0 : index
    %c3200 = arith.constant 3200 : index
    %186 = vector.load %arg8[%c0_143, %c3200] : memref<2x4096xf32, #tpu.memory_space<vmem>>, vector<1x128xf32>
    tpu.vector_store %arg8[%c0_143, %c3200], %185 {strides = array<i32>} : memref<2x4096xf32, #tpu.memory_space<vmem>>, vector<1x128xf32>,
    %187 = vector.extract_strided_slice %134 {offsets = [26, 0], sizes = [1, 128], strides = [1, 1]} : vector<32x256xf32> to vector<1x128xf32>
    %c0_144 = arith.constant 0 : index
    %c3328_145 = arith.constant 3328 : index
    %188 = vector.load %arg8[%c0_144, %c3328_145] : memref<2x4096xf32, #tpu.memory_space<vmem>>, vector<1x128xf32>
    tpu.vector_store %arg8[%c0_144, %c3328_145], %187 {strides = array<i32>} : memref<2x4096xf32, #tpu.memory_space<vmem>>, vector<1x128xf32>,
    %189 = vector.extract_strided_slice %134 {offsets = [27, 0], sizes = [1, 128], strides = [1, 1]} : vector<32x256xf32> to vector<1x128xf32>
    %c0_146 = arith.constant 0 : index
    %c3456 = arith.constant 3456 : index
    %190 = vector.load %arg8[%c0_146, %c3456] : memref<2x4096xf32, #tpu.memory_space<vmem>>, vector<1x128xf32>
    tpu.vector_store %arg8[%c0_146, %c3456], %189 {strides = array<i32>} : memref<2x4096xf32, #tpu.memory_space<vmem>>, vector<1x128xf32>,
    %191 = vector.extract_strided_slice %134 {offsets = [28, 0], sizes = [1, 128], strides = [1, 1]} : vector<32x256xf32> to vector<1x128xf32>
    %c0_147 = arith.constant 0 : index
    %c3584_148 = arith.constant 3584 : index
    %192 = vector.load %arg8[%c0_147, %c3584_148] : memref<2x4096xf32, #tpu.memory_space<vmem>>, vector<1x128xf32>
    tpu.vector_store %arg8[%c0_147, %c3584_148], %191 {strides = array<i32>} : memref<2x4096xf32, #tpu.memory_space<vmem>>, vector<1x128xf32>,
    %193 = vector.extract_strided_slice %134 {offsets = [29, 0], sizes = [1, 128], strides = [1, 1]} : vector<32x256xf32> to vector<1x128xf32>
    %c0_149 = arith.constant 0 : index
    %c3712 = arith.constant 3712 : index
    %194 = vector.load %arg8[%c0_149, %c3712] : memref<2x4096xf32, #tpu.memory_space<vmem>>, vector<1x128xf32>
    tpu.vector_store %arg8[%c0_149, %c3712], %193 {strides = array<i32>} : memref<2x4096xf32, #tpu.memory_space<vmem>>, vector<1x128xf32>,
    %195 = vector.extract_strided_slice %134 {offsets = [30, 0], sizes = [1, 128], strides = [1, 1]} : vector<32x256xf32> to vector<1x128xf32>
    %c0_150 = arith.constant 0 : index
    %c3840_151 = arith.constant 3840 : index
    %196 = vector.load %arg8[%c0_150, %c3840_151] : memref<2x4096xf32, #tpu.memory_space<vmem>>, vector<1x128xf32>
    tpu.vector_store %arg8[%c0_150, %c3840_151], %195 {strides = array<i32>} : memref<2x4096xf32, #tpu.memory_space<vmem>>, vector<1x128xf32>,
    %197 = vector.extract_strided_slice %134 {offsets = [31, 0], sizes = [1, 128], strides = [1, 1]} : vector<32x256xf32> to vector<1x128xf32>
    %c0_152 = arith.constant 0 : index
    %c3968 = arith.constant 3968 : index
    %198 = vector.load %arg8[%c0_152, %c3968] : memref<2x4096xf32, #tpu.memory_space<vmem>>, vector<1x128xf32>
    tpu.vector_store %arg8[%c0_152, %c3968], %197 {strides = array<i32>} : memref<2x4096xf32, #tpu.memory_space<vmem>>, vector<1x128xf32>,
    %199 = vector.extract_strided_slice %134 {offsets = [0, 128], sizes = [1, 128], strides = [1, 1]} : vector<32x256xf32> to vector<1x128xf32>
    %c1 = arith.constant 1 : index
    %c0_153 = arith.constant 0 : index
    %200 = vector.load %arg8[%c1, %c0_153] : memref<2x4096xf32, #tpu.memory_space<vmem>>, vector<1x128xf32>
    tpu.vector_store %arg8[%c1, %c0_153], %199 {strides = array<i32>} : memref<2x4096xf32, #tpu.memory_space<vmem>>, vector<1x128xf32>,
    %201 = vector.extract_strided_slice %134 {offsets = [1, 128], sizes = [1, 128], strides = [1, 1]} : vector<32x256xf32> to vector<1x128xf32>
    %c1_154 = arith.constant 1 : index
    %c128_155 = arith.constant 128 : index
    %202 = vector.load %arg8[%c1_154, %c128_155] : memref<2x4096xf32, #tpu.memory_space<vmem>>, vector<1x128xf32>
    tpu.vector_store %arg8[%c1_154, %c128_155], %201 {strides = array<i32>} : memref<2x4096xf32, #tpu.memory_space<vmem>>, vector<1x128xf32>,
    %203 = vector.extract_strided_slice %134 {offsets = [2, 128], sizes = [1, 128], strides = [1, 1]} : vector<32x256xf32> to vector<1x128xf32>
    %c1_156 = arith.constant 1 : index
    %c256_157 = arith.constant 256 : index
    %204 = vector.load %arg8[%c1_156, %c256_157] : memref<2x4096xf32, #tpu.memory_space<vmem>>, vector<1x128xf32>
    tpu.vector_store %arg8[%c1_156, %c256_157], %203 {strides = array<i32>} : memref<2x4096xf32, #tpu.memory_space<vmem>>, vector<1x128xf32>,
    %205 = vector.extract_strided_slice %134 {offsets = [3, 128], sizes = [1, 128], strides = [1, 1]} : vector<32x256xf32> to vector<1x128xf32>
    %c1_158 = arith.constant 1 : index
    %c384_159 = arith.constant 384 : index
    %206 = vector.load %arg8[%c1_158, %c384_159] : memref<2x4096xf32, #tpu.memory_space<vmem>>, vector<1x128xf32>
    tpu.vector_store %arg8[%c1_158, %c384_159], %205 {strides = array<i32>} : memref<2x4096xf32, #tpu.memory_space<vmem>>, vector<1x128xf32>,
    %207 = vector.extract_strided_slice %134 {offsets = [4, 128], sizes = [1, 128], strides = [1, 1]} : vector<32x256xf32> to vector<1x128xf32>
    %c1_160 = arith.constant 1 : index
    %c512_161 = arith.constant 512 : index
    %208 = vector.load %arg8[%c1_160, %c512_161] : memref<2x4096xf32, #tpu.memory_space<vmem>>, vector<1x128xf32>
    tpu.vector_store %arg8[%c1_160, %c512_161], %207 {strides = array<i32>} : memref<2x4096xf32, #tpu.memory_space<vmem>>, vector<1x128xf32>,
    %209 = vector.extract_strided_slice %134 {offsets = [5, 128], sizes = [1, 128], strides = [1, 1]} : vector<32x256xf32> to vector<1x128xf32>
    %c1_162 = arith.constant 1 : index
    %c640_163 = arith.constant 640 : index
    %210 = vector.load %arg8[%c1_162, %c640_163] : memref<2x4096xf32, #tpu.memory_space<vmem>>, vector<1x128xf32>
    tpu.vector_store %arg8[%c1_162, %c640_163], %209 {strides = array<i32>} : memref<2x4096xf32, #tpu.memory_space<vmem>>, vector<1x128xf32>,
    %211 = vector.extract_strided_slice %134 {offsets = [6, 128], sizes = [1, 128], strides = [1, 1]} : vector<32x256xf32> to vector<1x128xf32>
    %c1_164 = arith.constant 1 : index
    %c768_165 = arith.constant 768 : index
    %212 = vector.load %arg8[%c1_164, %c768_165] : memref<2x4096xf32, #tpu.memory_space<vmem>>, vector<1x128xf32>
    tpu.vector_store %arg8[%c1_164, %c768_165], %211 {strides = array<i32>} : memref<2x4096xf32, #tpu.memory_space<vmem>>, vector<1x128xf32>,
    %213 = vector.extract_strided_slice %134 {offsets = [7, 128], sizes = [1, 128], strides = [1, 1]} : vector<32x256xf32> to vector<1x128xf32>
    %c1_166 = arith.constant 1 : index
    %c896_167 = arith.constant 896 : index
    %214 = vector.load %arg8[%c1_166, %c896_167] : memref<2x4096xf32, #tpu.memory_space<vmem>>, vector<1x128xf32>
    tpu.vector_store %arg8[%c1_166, %c896_167], %213 {strides = array<i32>} : memref<2x4096xf32, #tpu.memory_space<vmem>>, vector<1x128xf32>,
    %215 = vector.extract_strided_slice %134 {offsets = [8, 128], sizes = [1, 128], strides = [1, 1]} : vector<32x256xf32> to vector<1x128xf32>
    %c1_168 = arith.constant 1 : index
    %c1024_169 = arith.constant 1024 : index
    %216 = vector.load %arg8[%c1_168, %c1024_169] : memref<2x4096xf32, #tpu.memory_space<vmem>>, vector<1x128xf32>
    tpu.vector_store %arg8[%c1_168, %c1024_169], %215 {strides = array<i32>} : memref<2x4096xf32, #tpu.memory_space<vmem>>, vector<1x128xf32>,
    %217 = vector.extract_strided_slice %134 {offsets = [9, 128], sizes = [1, 128], strides = [1, 1]} : vector<32x256xf32> to vector<1x128xf32>
    %c1_170 = arith.constant 1 : index
    %c1152_171 = arith.constant 1152 : index
    %218 = vector.load %arg8[%c1_170, %c1152_171] : memref<2x4096xf32, #tpu.memory_space<vmem>>, vector<1x128xf32>
    tpu.vector_store %arg8[%c1_170, %c1152_171], %217 {strides = array<i32>} : memref<2x4096xf32, #tpu.memory_space<vmem>>, vector<1x128xf32>,
    %219 = vector.extract_strided_slice %134 {offsets = [10, 128], sizes = [1, 128], strides = [1, 1]} : vector<32x256xf32> to vector<1x128xf32>
    %c1_172 = arith.constant 1 : index
    %c1280_173 = arith.constant 1280 : index
    %220 = vector.load %arg8[%c1_172, %c1280_173] : memref<2x4096xf32, #tpu.memory_space<vmem>>, vector<1x128xf32>
    tpu.vector_store %arg8[%c1_172, %c1280_173], %219 {strides = array<i32>} : memref<2x4096xf32, #tpu.memory_space<vmem>>, vector<1x128xf32>,
    %221 = vector.extract_strided_slice %134 {offsets = [11, 128], sizes = [1, 128], strides = [1, 1]} : vector<32x256xf32> to vector<1x128xf32>
    %c1_174 = arith.constant 1 : index
    %c1408_175 = arith.constant 1408 : index
    %222 = vector.load %arg8[%c1_174, %c1408_175] : memref<2x4096xf32, #tpu.memory_space<vmem>>, vector<1x128xf32>
    tpu.vector_store %arg8[%c1_174, %c1408_175], %221 {strides = array<i32>} : memref<2x4096xf32, #tpu.memory_space<vmem>>, vector<1x128xf32>,
    %223 = vector.extract_strided_slice %134 {offsets = [12, 128], sizes = [1, 128], strides = [1, 1]} : vector<32x256xf32> to vector<1x128xf32>
    %c1_176 = arith.constant 1 : index
    %c1536_177 = arith.constant 1536 : index
    %224 = vector.load %arg8[%c1_176, %c1536_177] : memref<2x4096xf32, #tpu.memory_space<vmem>>, vector<1x128xf32>
    tpu.vector_store %arg8[%c1_176, %c1536_177], %223 {strides = array<i32>} : memref<2x4096xf32, #tpu.memory_space<vmem>>, vector<1x128xf32>,
    %225 = vector.extract_strided_slice %134 {offsets = [13, 128], sizes = [1, 128], strides = [1, 1]} : vector<32x256xf32> to vector<1x128xf32>
    %c1_178 = arith.constant 1 : index
    %c1664_179 = arith.constant 1664 : index
    %226 = vector.load %arg8[%c1_178, %c1664_179] : memref<2x4096xf32, #tpu.memory_space<vmem>>, vector<1x128xf32>
    tpu.vector_store %arg8[%c1_178, %c1664_179], %225 {strides = array<i32>} : memref<2x4096xf32, #tpu.memory_space<vmem>>, vector<1x128xf32>,
    %227 = vector.extract_strided_slice %134 {offsets = [14, 128], sizes = [1, 128], strides = [1, 1]} : vector<32x256xf32> to vector<1x128xf32>
    %c1_180 = arith.constant 1 : index
    %c1792_181 = arith.constant 1792 : index
    %228 = vector.load %arg8[%c1_180, %c1792_181] : memref<2x4096xf32, #tpu.memory_space<vmem>>, vector<1x128xf32>
    tpu.vector_store %arg8[%c1_180, %c1792_181], %227 {strides = array<i32>} : memref<2x4096xf32, #tpu.memory_space<vmem>>, vector<1x128xf32>,
    %229 = vector.extract_strided_slice %134 {offsets = [15, 128], sizes = [1, 128], strides = [1, 1]} : vector<32x256xf32> to vector<1x128xf32>
    %c1_182 = arith.constant 1 : index
    %c1920_183 = arith.constant 1920 : index
    %230 = vector.load %arg8[%c1_182, %c1920_183] : memref<2x4096xf32, #tpu.memory_space<vmem>>, vector<1x128xf32>
    tpu.vector_store %arg8[%c1_182, %c1920_183], %229 {strides = array<i32>} : memref<2x4096xf32, #tpu.memory_space<vmem>>, vector<1x128xf32>,
    %231 = vector.extract_strided_slice %134 {offsets = [16, 128], sizes = [1, 128], strides = [1, 1]} : vector<32x256xf32> to vector<1x128xf32>
    %c1_184 = arith.constant 1 : index
    %c2048_185 = arith.constant 2048 : index
    %232 = vector.load %arg8[%c1_184, %c2048_185] : memref<2x4096xf32, #tpu.memory_space<vmem>>, vector<1x128xf32>
    tpu.vector_store %arg8[%c1_184, %c2048_185], %231 {strides = array<i32>} : memref<2x4096xf32, #tpu.memory_space<vmem>>, vector<1x128xf32>,
    %233 = vector.extract_strided_slice %134 {offsets = [17, 128], sizes = [1, 128], strides = [1, 1]} : vector<32x256xf32> to vector<1x128xf32>
    %c1_186 = arith.constant 1 : index
    %c2176_187 = arith.constant 2176 : index
    %234 = vector.load %arg8[%c1_186, %c2176_187] : memref<2x4096xf32, #tpu.memory_space<vmem>>, vector<1x128xf32>
    tpu.vector_store %arg8[%c1_186, %c2176_187], %233 {strides = array<i32>} : memref<2x4096xf32, #tpu.memory_space<vmem>>, vector<1x128xf32>,
    %235 = vector.extract_strided_slice %134 {offsets = [18, 128], sizes = [1, 128], strides = [1, 1]} : vector<32x256xf32> to vector<1x128xf32>
    %c1_188 = arith.constant 1 : index
    %c2304_189 = arith.constant 2304 : index
    %236 = vector.load %arg8[%c1_188, %c2304_189] : memref<2x4096xf32, #tpu.memory_space<vmem>>, vector<1x128xf32>
    tpu.vector_store %arg8[%c1_188, %c2304_189], %235 {strides = array<i32>} : memref<2x4096xf32, #tpu.memory_space<vmem>>, vector<1x128xf32>,
    %237 = vector.extract_strided_slice %134 {offsets = [19, 128], sizes = [1, 128], strides = [1, 1]} : vector<32x256xf32> to vector<1x128xf32>
    %c1_190 = arith.constant 1 : index
    %c2432_191 = arith.constant 2432 : index
    %238 = vector.load %arg8[%c1_190, %c2432_191] : memref<2x4096xf32, #tpu.memory_space<vmem>>, vector<1x128xf32>
    tpu.vector_store %arg8[%c1_190, %c2432_191], %237 {strides = array<i32>} : memref<2x4096xf32, #tpu.memory_space<vmem>>, vector<1x128xf32>,
    %239 = vector.extract_strided_slice %134 {offsets = [20, 128], sizes = [1, 128], strides = [1, 1]} : vector<32x256xf32> to vector<1x128xf32>
    %c1_192 = arith.constant 1 : index
    %c2560_193 = arith.constant 2560 : index
    %240 = vector.load %arg8[%c1_192, %c2560_193] : memref<2x4096xf32, #tpu.memory_space<vmem>>, vector<1x128xf32>
    tpu.vector_store %arg8[%c1_192, %c2560_193], %239 {strides = array<i32>} : memref<2x4096xf32, #tpu.memory_space<vmem>>, vector<1x128xf32>,
    %241 = vector.extract_strided_slice %134 {offsets = [21, 128], sizes = [1, 128], strides = [1, 1]} : vector<32x256xf32> to vector<1x128xf32>
    %c1_194 = arith.constant 1 : index
    %c2688_195 = arith.constant 2688 : index
    %242 = vector.load %arg8[%c1_194, %c2688_195] : memref<2x4096xf32, #tpu.memory_space<vmem>>, vector<1x128xf32>
    tpu.vector_store %arg8[%c1_194, %c2688_195], %241 {strides = array<i32>} : memref<2x4096xf32, #tpu.memory_space<vmem>>, vector<1x128xf32>,
    %243 = vector.extract_strided_slice %134 {offsets = [22, 128], sizes = [1, 128], strides = [1, 1]} : vector<32x256xf32> to vector<1x128xf32>
    %c1_196 = arith.constant 1 : index
    %c2816_197 = arith.constant 2816 : index
    %244 = vector.load %arg8[%c1_196, %c2816_197] : memref<2x4096xf32, #tpu.memory_space<vmem>>, vector<1x128xf32>
    tpu.vector_store %arg8[%c1_196, %c2816_197], %243 {strides = array<i32>} : memref<2x4096xf32, #tpu.memory_space<vmem>>, vector<1x128xf32>,
    %245 = vector.extract_strided_slice %134 {offsets = [23, 128], sizes = [1, 128], strides = [1, 1]} : vector<32x256xf32> to vector<1x128xf32>
    %c1_198 = arith.constant 1 : index
    %c2944_199 = arith.constant 2944 : index
    %246 = vector.load %arg8[%c1_198, %c2944_199] : memref<2x4096xf32, #tpu.memory_space<vmem>>, vector<1x128xf32>
    tpu.vector_store %arg8[%c1_198, %c2944_199], %245 {strides = array<i32>} : memref<2x4096xf32, #tpu.memory_space<vmem>>, vector<1x128xf32>,
    %247 = vector.extract_strided_slice %134 {offsets = [24, 128], sizes = [1, 128], strides = [1, 1]} : vector<32x256xf32> to vector<1x128xf32>
    %c1_200 = arith.constant 1 : index
    %c3072_201 = arith.constant 3072 : index
    %248 = vector.load %arg8[%c1_200, %c3072_201] : memref<2x4096xf32, #tpu.memory_space<vmem>>, vector<1x128xf32>
    tpu.vector_store %arg8[%c1_200, %c3072_201], %247 {strides = array<i32>} : memref<2x4096xf32, #tpu.memory_space<vmem>>, vector<1x128xf32>,
    %249 = vector.extract_strided_slice %134 {offsets = [25, 128], sizes = [1, 128], strides = [1, 1]} : vector<32x256xf32> to vector<1x128xf32>
    %c1_202 = arith.constant 1 : index
    %c3200_203 = arith.constant 3200 : index
    %250 = vector.load %arg8[%c1_202, %c3200_203] : memref<2x4096xf32, #tpu.memory_space<vmem>>, vector<1x128xf32>
    tpu.vector_store %arg8[%c1_202, %c3200_203], %249 {strides = array<i32>} : memref<2x4096xf32, #tpu.memory_space<vmem>>, vector<1x128xf32>,
    %251 = vector.extract_strided_slice %134 {offsets = [26, 128], sizes = [1, 128], strides = [1, 1]} : vector<32x256xf32> to vector<1x128xf32>
    %c1_204 = arith.constant 1 : index
    %c3328_205 = arith.constant 3328 : index
    %252 = vector.load %arg8[%c1_204, %c3328_205] : memref<2x4096xf32, #tpu.memory_space<vmem>>, vector<1x128xf32>
    tpu.vector_store %arg8[%c1_204, %c3328_205], %251 {strides = array<i32>} : memref<2x4096xf32, #tpu.memory_space<vmem>>, vector<1x128xf32>,
    %253 = vector.extract_strided_slice %134 {offsets = [27, 128], sizes = [1, 128], strides = [1, 1]} : vector<32x256xf32> to vector<1x128xf32>
    %c1_206 = arith.constant 1 : index
    %c3456_207 = arith.constant 3456 : index
    %254 = vector.load %arg8[%c1_206, %c3456_207] : memref<2x4096xf32, #tpu.memory_space<vmem>>, vector<1x128xf32>
    tpu.vector_store %arg8[%c1_206, %c3456_207], %253 {strides = array<i32>} : memref<2x4096xf32, #tpu.memory_space<vmem>>, vector<1x128xf32>,
    %255 = vector.extract_strided_slice %134 {offsets = [28, 128], sizes = [1, 128], strides = [1, 1]} : vector<32x256xf32> to vector<1x128xf32>
    %c1_208 = arith.constant 1 : index
    %c3584_209 = arith.constant 3584 : index
    %256 = vector.load %arg8[%c1_208, %c3584_209] : memref<2x4096xf32, #tpu.memory_space<vmem>>, vector<1x128xf32>
    tpu.vector_store %arg8[%c1_208, %c3584_209], %255 {strides = array<i32>} : memref<2x4096xf32, #tpu.memory_space<vmem>>, vector<1x128xf32>,
    %257 = vector.extract_strided_slice %134 {offsets = [29, 128], sizes = [1, 128], strides = [1, 1]} : vector<32x256xf32> to vector<1x128xf32>
    %c1_210 = arith.constant 1 : index
    %c3712_211 = arith.constant 3712 : index
    %258 = vector.load %arg8[%c1_210, %c3712_211] : memref<2x4096xf32, #tpu.memory_space<vmem>>, vector<1x128xf32>
    tpu.vector_store %arg8[%c1_210, %c3712_211], %257 {strides = array<i32>} : memref<2x4096xf32, #tpu.memory_space<vmem>>, vector<1x128xf32>,
    %259 = vector.extract_strided_slice %134 {offsets = [30, 128], sizes = [1, 128], strides = [1, 1]} : vector<32x256xf32> to vector<1x128xf32>
    %c1_212 = arith.constant 1 : index
    %c3840_213 = arith.constant 3840 : index
    %260 = vector.load %arg8[%c1_212, %c3840_213] : memref<2x4096xf32, #tpu.memory_space<vmem>>, vector<1x128xf32>
    tpu.vector_store %arg8[%c1_212, %c3840_213], %259 {strides = array<i32>} : memref<2x4096xf32, #tpu.memory_space<vmem>>, vector<1x128xf32>,
    %261 = vector.extract_strided_slice %134 {offsets = [31, 128], sizes = [1, 128], strides = [1, 1]} : vector<32x256xf32> to vector<1x128xf32>
    %c1_214 = arith.constant 1 : index
    %c3968_215 = arith.constant 3968 : index
    %262 = vector.load %arg8[%c1_214, %c3968_215] : memref<2x4096xf32, #tpu.memory_space<vmem>>, vector<1x128xf32>
    tpu.vector_store %arg8[%c1_214, %c3968_215], %261 {strides = array<i32>} : memref<2x4096xf32, #tpu.memory_space<vmem>>, vector<1x128xf32>,
    %c0_216 = arith.constant 0 : index
    %c0_217 = arith.constant 0 : index
    %263 = vector.load %arg8[%c0_216, %c0_217] : memref<2x4096xf32, #tpu.memory_space<vmem>>, vector<2x4096xf32>
    %c0_218 = arith.constant 0 : index
    %c0_219 = arith.constant 0 : index
    %264 = vector.load %arg4[%c0_218, %c0_219] : memref<4096x64xf32, #tpu.memory_space<vmem>>, vector<4096x64xf32>
    %cst_220 = arith.constant dense<0.000000e+00> : vector<2x64xf32>
    %265 = tpu.matmul %263, %264, %cst_220 {dimension_numbers = #tpu.dot_dimension_numbers<[1], [0], [0], [1], [0, 0, 1, 1], [], []>} : vector<2x4096xf32>, vector<4096x64xf32>, vector<2x64xf32> -> vector<2x64xf32>
    %c32_221 = arith.constant 32 : index
    %c0_222 = arith.constant 0 : index
    %266 = vector.load %arg6[%c32_221, %c0_222] : memref<34x128xf32, #tpu.memory_space<vmem>>, vector<1x64xf32>
    %267 = vector.broadcast %266 : vector<1x64xf32> to vector<2x64xf32>
    %268 = arith.addf %265, %267 : vector<2x64xf32>
    %cst_223 = arith.constant 0.000000e+00 : f32
    %269 = vector.broadcast %cst_223 : f32 to vector<2x64xf32>
    %270 = arith.maximumf %268, %269 : vector<2x64xf32>
    %c0_224 = arith.constant 0 : index
    %c0_225 = arith.constant 0 : index
    %271 = vector.load %arg5[%c0_224, %c0_225] : memref<64x128xf32, #tpu.memory_space<vmem>>, vector<64x128xf32>
    %cst_226 = arith.constant dense<0.000000e+00> : vector<2x128xf32>
    %272 = tpu.matmul %270, %271, %cst_226 {dimension_numbers = #tpu.dot_dimension_numbers<[1], [0], [0], [1], [0, 0, 1, 1], [], []>} : vector<2x64xf32>, vector<64x128xf32>, vector<2x128xf32> -> vector<2x128xf32>
    %c33 = arith.constant 33 : index
    %c0_227 = arith.constant 0 : index
    %273 = vector.load %arg6[%c33, %c0_227] : memref<34x128xf32, #tpu.memory_space<vmem>>, vector<1x128xf32>
    %274 = vector.broadcast %273 : vector<1x128xf32> to vector<2x128xf32>
    %275 = arith.addf %272, %274 : vector<2x128xf32>
    %cst_228 = arith.constant 0.000000e+00 : f32
    %276 = vector.broadcast %cst_228 : f32 to vector<2x128xf32>
    %277 = arith.maximumf %275, %276 : vector<2x128xf32>
    %c0_229 = arith.constant 0 : index
    %c0_230 = arith.constant 0 : index
    %c0_231 = arith.constant 0 : index
    %278 = vector.load %arg7[%c0_229, %c0_230, %c0_231] : memref<1x2x128xf32, #tpu.memory_space<vmem>>, vector<1x2x128xf32>
    %279 = vector.shape_cast %278 : vector<1x2x128xf32> to vector<2x128xf32>
    %280 = vector.shape_cast %277 : vector<2x128xf32> to vector<1x2x128xf32>
    tpu.vector_store %arg7[%c0_229, %c0_230, %c0_231], %280 {strides = array<i32>} : memref<1x2x128xf32, #tpu.memory_space<vmem>>, vector<1x2x128xf32>,
    return
  }
  func.func @transform_0(%arg0: i32) -> (i32, i32, i32) {
    %c0_i32 = arith.constant 0 : i32
    %c0_i32_0 = arith.constant 0 : i32
    %c0_i32_1 = arith.constant 0 : i32
    return %arg0, %c0_i32, %c0_i32_0 : i32, i32, i32
  }
  func.func @transform_1(%arg0: i32) -> (i32, i32) {
    %c0_i32 = arith.constant 0 : i32
    %c0_i32_0 = arith.constant 0 : i32
    %c0_i32_1 = arith.constant 0 : i32
    return %c0_i32, %c0_i32_0 : i32, i32
  }
  func.func @transform_2(%arg0: i32) -> (i32, i32) {
    %c0_i32 = arith.constant 0 : i32
    %c0_i32_0 = arith.constant 0 : i32
    %c0_i32_1 = arith.constant 0 : i32
    return %c0_i32, %c0_i32_0 : i32, i32
  }
  func.func @transform_3(%arg0: i32) -> (i32, i32) {
    %c0_i32 = arith.constant 0 : i32
    %c0_i32_0 = arith.constant 0 : i32
    %c0_i32_1 = arith.constant 0 : i32
    return %c0_i32, %c0_i32_0 : i32, i32
  }
  func.func @transform_4(%arg0: i32) -> (i32, i32) {
    %c0_i32 = arith.constant 0 : i32
    %c0_i32_0 = arith.constant 0 : i32
    %c0_i32_1 = arith.constant 0 : i32
    return %c0_i32, %c0_i32_0 : i32, i32
  }
  func.func @transform_5(%arg0: i32) -> (i32, i32) {
    %c0_i32 = arith.constant 0 : i32
    %c0_i32_0 = arith.constant 0 : i32
    %c0_i32_1 = arith.constant 0 : i32
    return %c0_i32, %c0_i32_0 : i32, i32
  }
  func.func @transform_6(%arg0: i32) -> (i32, i32, i32) {
    %c0_i32 = arith.constant 0 : i32
    %c0_i32_0 = arith.constant 0 : i32
    %c0_i32_1 = arith.constant 0 : i32
    return %arg0, %c0_i32, %c0_i32_0 : i32, i32, i32
  }
}

</mosaic_0001>

<bundles_post_ra>
// kernel: qnet_forward.1
= control target key start
LH: loop header
LB: loop body
LE: loop exit
PB: predicated region body
PF: predicated region fallthrough
CT: control target
= control target key end

     0   :  { %v7271_v3 = vmov 0.0   ;;  %vm42_vm0 = vcmask 1040384   ;;  %vm35_vm1 = vcmask 269312   ;;  %vm235_vm2 = vcmask 130048   ;;  %s10028_s0 = inlined_call_operand.vmem [shape: f32[1,33,4096], index: 0, kind: input, shape index: {}]   ;;  %s10029_s1 = inlined_call_operand.vmem [shape: f32[16,33], index: 1, kind: input, shape index: {}]   ;;  %s10030_s2 = inlined_call_operand.vmem [shape: f32[512,16], index: 2, kind: input, shape index: {}]   ;;  %s10031_s5 = inlined_call_operand.vmem [shape: f32[34,128], index: 5, kind: input, shape index: {}]   ;;  %s10032_s3 = inlined_call_operand.vmem [shape: f32[4096,64], index: 3, kind: input, shape index: {}]   ;;  %s10033_s4 = inlined_call_operand.vmem [shape: f32[64,128], index: 4, kind: input, shape index: {}]   ;;  %s10034_s6 = inlined_call_operand.vmem [shape: f32[1,2,128], index: 6, kind: output, shape index: {}]  }
   0x1   :  { %v135_v0 = vld [vmem:[%s10028_s0 + $0x18] sm:$0xff]  ;;  %v134_v2 = vld [vmem:[%s10028_s0 + $0x10] sm:$0xff]  ;;  %214 = vmatprep.mubr.f32.mxu1 %v7271_v3  ;;  %113 = vmatprep.mubr.f32.mxu0 %v7271_v3  ;;  %v26_v6 = vld [vmem:[%s10028_s0 + $0x8] sm:$0xff]  ;;  %vm7275_vm3 = vmmov 0   ;;  %vm5581_vm4 = vcmask 523264  }
   0x2   :  { %v137_v1 = vld [vmem:[%s10028_s0 + $0x118] sm:$0xff]  ;;  %v136_v5 = vld [vmem:[%s10028_s0 + $0x110] sm:$0xff]  ;;  %v28_v7 = vld [vmem:[%s10028_s0 + $0x108] sm:$0xff] }
   0x3   :  { %v6428_v4 = vpack.c.bf16 %v137_v1, %v135_v0  ;;  %v6430_v8 = vpack.c.bf16 %v136_v5, %v134_v2  ;;  %v6420_v9 = vpack.c.bf16 %v28_v7, %v26_v6  ;;  %v25_v10 = vld [vmem:[%s10028_s0] sm:$0xff]  ;;  %v139_v12 = vld [vmem:[%s10028_s0 + $0x218] sm:$0xff]  ;;  %v138_v15 = vld [vmem:[%s10028_s0 + $0x210] sm:$0xff] }
   0x4   :  { %v27_v11 = vld [vmem:[%s10028_s0 + $0x100] sm:$0xff]  ;;  %v141_v14 = vld [vmem:[%s10028_s0 + $0x318] sm:$0xff]  ;;  %v140_v16 = vld [vmem:[%s10028_s0 + $0x310] sm:$0xff] }
   0x5   :  { %6429 = vmatprep.subr.bf16.mxu1 %v6428_v4  ;;  %v6422_v13 = vpack.c.bf16 %v27_v11, %v25_v10  ;;  %6421 = vmatprep.subr.bf16.mxu0 %v6420_v9  ;;  %v6432_v17 = vpack.c.bf16 %v141_v14, %v139_v12  ;;  %v6434_v18 = vpack.c.bf16 %v140_v16, %v138_v15  ;;  %v30_v19 = vld [vmem:[%s10028_s0 + $0x208] sm:$0xff]  ;;  %v29_v21 = vld [vmem:[%s10028_s0 + $0x200] sm:$0xff]  ;;  %v143_v25 = vld [vmem:[%s10028_s0 + $0x418] sm:$0x1] }
   0x6   :  { %6431 = vmatpush1.bf16.msra.mxu1 %v6430_v8  ;;  %v32_v20 = vld [vmem:[%s10028_s0 + $0x308] sm:$0xff]  ;;  %v31_v23 = vld [vmem:[%s10028_s0 + $0x300] sm:$0xff]  ;;  %v142_v27 = vld [vmem:[%s10028_s0 + $0x410] sm:$0x1] }
   0x7   :  { %6423 = vmatpush1.bf16.msra.mxu0 %v6422_v13  ;;  %v6424_v22 = vpack.c.bf16 %v32_v20, %v30_v19  ;;  %6433 = vmatprep.subr.bf16.mxu1 %v6432_v17  ;;  %v6426_v24 = vpack.c.bf16 %v31_v23, %v29_v21  ;;  %v34_v26 = vld [vmem:[%s10028_s0 + $0x408] sm:$0x1]  ;;  %v7380_v30 = vld [vmem:[%s10029_s1] sm:$0xff]  ;;  %v649_v44 = vld [vmem:[%s10028_s0 + $0x38] sm:$0xff] }
   0x8   :  { %v439_v28 = vld [vmem:[%s10028_s0 + $0x28] sm:$0xff]  ;;  %v438_v31 = vld [vmem:[%s10028_s0 + $0x20] sm:$0xff]  ;;  %v651_v45 = vld [vmem:[%s10028_s0 + $0x138] sm:$0xff] }
   0x9   :  { %6425 = vmatprep.subr.bf16.mxu0 %v6424_v22  ;;  %v441_v29 = vld [vmem:[%s10028_s0 + $0x128] sm:$0xff]  ;;  %v440_v32 = vld [vmem:[%s10028_s0 + $0x120] sm:$0xff]  ;;  %v648_v46 = vld [vmem:[%s10028_s0 + $0x30] sm:$0xff]  ;;  %v6456_v51 = vpack.c.bf16 %v651_v45, %v649_v44 }
   0xa   :  { %6435 = vmatpush1.bf16.msra.mxu1 %v6434_v18  ;;  %v33_v33 = vld [vmem:[%s10028_s0 + $0x400] sm:$0x1]  ;;  %v443_v34 = vld [vmem:[%s10028_s0 + $0x228] sm:$0xff]  ;;  %v6444_v36 = vpack.c.bf16 %v441_v29, %v439_v28  ;;  %v6446_v37 = vpack.c.bf16 %v440_v32, %v438_v31  ;;  %v650_v47 = vld [vmem:[%s10028_s0 + $0x130] sm:$0xff] }
   0xb   :  { %6427 = vmatpush1.bf16.msra.mxu0 %v6426_v24  ;;  %5665 = vmatprep.subr.msk.mxu1 %vm42_vm0, %v143_v25  ;;  %v445_v35 = vld [vmem:[%s10028_s0 + $0x328] sm:$0xff]  ;;  %v442_v39 = vld [vmem:[%s10028_s0 + $0x220] sm:$0xff]  ;;  %v653_v48 = vld [vmem:[%s10028_s0 + $0x238] sm:$0xff]  ;;  %v6458_v52 = vpack.c.bf16 %v650_v47, %v648_v46 }
   0xc   :  { %5661 = vmatprep.subr.msk.mxu0 %vm42_vm0, %v34_v26  ;;  %v6448_v38 = vpack.c.bf16 %v445_v35, %v443_v34  ;;  %v444_v40 = vld [vmem:[%s10028_s0 + $0x320] sm:$0xff]  ;;  %v7414_v41 = vld [vmem:[%s10029_s1 + $0x8] sm:$0xff]  ;;  %v655_v49 = vld [vmem:[%s10028_s0 + $0x338] sm:$0xff] }
   0xd   :  { %v6450_v42 = vpack.c.bf16 %v444_v40, %v442_v39  ;;  %v447_v43 = vld [vmem:[%s10028_s0 + $0x428] sm:$0x1]  ;;  %v446_v50 = vld [vmem:[%s10028_s0 + $0x420] sm:$0x1]  ;;  %v6460_v53 = vpack.c.bf16 %v655_v49, %v653_v48  ;;  %v652_v54 = vld [vmem:[%s10028_s0 + $0x230] sm:$0xff] }
   0xe   :  { %5666 = vmatpush1.msk.msra.mxu1 %vm42_vm0, %v142_v27  ;;  %v654_v55 = vld [vmem:[%s10028_s0 + $0x330] sm:$0xff]  ;;  %v657_v57 = vld [vmem:[%s10028_s0 + $0x438] sm:$0x1]  ;;  %v859_v58 = vld [vmem:[%s10028_s0 + $0x48] sm:$0xff] }
   0xf   :  { %5667 = vmatmul.mubr.msk.f32.vlgmr.msra.gmra.mrb[0].mxu1 %vm35_vm1, %v7380_v30  ;;  %5662 = vmatpush1.msk.msra.mxu0 %vm42_vm0, %v33_v33  ;;  %v6462_v56 = vpack.c.bf16 %v654_v55, %v652_v54  ;;  %v861_v59 = vld [vmem:[%s10028_s0 + $0x148] sm:$0xff]  ;;  %v858_v60 = vld [vmem:[%s10028_s0 + $0x40] sm:$0xff]  ;;  %v656_v0 = vld [vmem:[%s10028_s0 + $0x430] sm:$0x1] }
  0x10   :  { %5663 = vmatmul.mubr.msk.f32.vlgmr.msra.gmra.mrb[0].mxu0 %vm35_vm1, %v7380_v30  ;;  %220 = vmatprep.mubr.f32.mxu1 %v7271_v3  ;;  %v860_v61 = vld [vmem:[%s10028_s0 + $0x140] sm:$0xff]  ;;  %v863_v62 = vld [vmem:[%s10028_s0 + $0x248] sm:$0xff]  ;;  %v6468_v1 = vpack.c.bf16 %v861_v59, %v859_v58  ;;  %v1069_v9 = vld [vmem:[%s10028_s0 + $0x58] sm:$0xff] }
  0x11   :  { %119 = vmatprep.mubr.f32.mxu0 %v7271_v3  ;;  %6445 = vmatprep.subr.bf16.mxu1 %v6444_v36  ;;  %v865_v63 = vld [vmem:[%s10028_s0 + $0x348] sm:$0xff]  ;;  %v6470_v2 = vpack.c.bf16 %v860_v61, %v858_v60  ;;  %v862_v5 = vld [vmem:[%s10028_s0 + $0x240] sm:$0xff]  ;;  %v1071_v10 = vld [vmem:[%s10028_s0 + $0x158] sm:$0xff] }
  0x12   :  { %6447 = vmatpush1.bf16.msra.mxu1 %v6446_v37  ;;  %v6472_v4 = vpack.c.bf16 %v865_v63, %v863_v62  ;;  %v864_v6 = vld [vmem:[%s10028_s0 + $0x340] sm:$0xff]  ;;  %v867_v8 = vld [vmem:[%s10028_s0 + $0x448] sm:$0x1]  ;;  %v1068_v11 = vld [vmem:[%s10028_s0 + $0x50] sm:$0xff]  ;;  %v6480_v16 = vpack.c.bf16 %v1071_v10, %v1069_v9 }
  0x13   :  { %5668 = vmatmul.mubr.msk.f32.gmra.mrb[2].mxu1 %vm35_vm1, %v7414_v41  ;;  %6449 = vmatprep.subr.bf16.mxu1 %v6448_v38  ;;  %v6474_v7 = vpack.c.bf16 %v864_v6, %v862_v5  ;;  %v1070_v12 = vld [vmem:[%s10028_s0 + $0x150] sm:$0xff]  ;;  %v1073_v13 = vld [vmem:[%s10028_s0 + $0x258] sm:$0xff]  ;;  %v866_v15 = vld [vmem:[%s10028_s0 + $0x440] sm:$0x1] }
  0x14   :  { %5664 = vmatmul.mubr.msk.f32.gmra.mrb[2].mxu0 %vm35_vm1, %v7414_v41  ;;  %518 = vmatprep.mubr.f32.mxu1 %v7271_v3  ;;  %v1075_v14 = vld [vmem:[%s10028_s0 + $0x358] sm:$0xff]  ;;  %v6482_v17 = vpack.c.bf16 %v1070_v12, %v1068_v11  ;;  %v1072_v19 = vld [vmem:[%s10028_s0 + $0x250] sm:$0xff]  ;;  %v1279_v23 = vld [vmem:[%s10028_s0 + $0x68] sm:$0xff] }
  0x15   :  { %312 = vmatprep.mubr.f32.mxu0 %v7271_v3  ;;  %v6484_v18 = vpack.c.bf16 %v1075_v14, %v1073_v13  ;;  %v1074_v20 = vld [vmem:[%s10028_s0 + $0x350] sm:$0xff]  ;;  %v1077_v22 = vld [vmem:[%s10028_s0 + $0x458] sm:$0x1]  ;;  %v1281_v24 = vld [vmem:[%s10028_s0 + $0x168] sm:$0xff] }
  0x16   :  { %6451 = vmatpush1.bf16.msra.mxu1 %v6450_v42  ;;  %v6486_v21 = vpack.c.bf16 %v1074_v20, %v1072_v19  ;;  %v1278_v25 = vld [vmem:[%s10028_s0 + $0x60] sm:$0xff]  ;;  %v1283_v27 = vld [vmem:[%s10028_s0 + $0x268] sm:$0xff]  ;;  %v1076_v29 = vld [vmem:[%s10028_s0 + $0x450] sm:$0x1]  ;;  %v6492_v31 = vpack.c.bf16 %v1281_v24, %v1279_v23 }
  0x17   :  { %5677 = vmatprep.subr.msk.mxu1 %vm42_vm0, %v447_v43  ;;  %v1280_v26 = vld [vmem:[%s10028_s0 + $0x160] sm:$0xff]  ;;  %v1285_v28 = vld [vmem:[%s10028_s0 + $0x368] sm:$0xff]  ;;  %v1489_v38 = vld [vmem:[%s10028_s0 + $0x78] sm:$0xff] }
  0x18   :  { %v6494_v32 = vpack.c.bf16 %v1280_v26, %v1278_v25  ;;  %v6496_v33 = vpack.c.bf16 %v1285_v28, %v1283_v27  ;;  %v1282_v34 = vld [vmem:[%s10028_s0 + $0x260] sm:$0xff]  ;;  %v1287_v37 = vld [vmem:[%s10028_s0 + $0x468] sm:$0x1]  ;;  %v1491_v39 = vld [vmem:[%s10028_s0 + $0x178] sm:$0xff] }
  0x19   :  { %v1284_v35 = vld [vmem:[%s10028_s0 + $0x360] sm:$0xff]  ;;  %v1488_v40 = vld [vmem:[%s10028_s0 + $0x70] sm:$0xff]  ;;  %v1493_v43 = vld [vmem:[%s10028_s0 + $0x278] sm:$0xff]  ;;  %v6504_v46 = vpack.c.bf16 %v1491_v39, %v1489_v38 }
  0x1a   :  { %5678 = vmatpush1.msk.msra.mxu1 %vm42_vm0, %v446_v50  ;;  %v6498_v36 = vpack.c.bf16 %v1284_v35, %v1282_v34  ;;  %v1490_v42 = vld [vmem:[%s10028_s0 + $0x170] sm:$0xff]  ;;  %v1495_v44 = vld [vmem:[%s10028_s0 + $0x378] sm:$0xff]  ;;  %v1286_v45 = vld [vmem:[%s10028_s0 + $0x460] sm:$0x1] }
  0x1b   :  { %5679 = vmatmul.mubr.msk.f32.vlgmr.msra.gmra.mrb[4].mxu1 %vm35_vm1, %v7380_v30  ;;  %6457 = vmatprep.subr.bf16.mxu1 %v6456_v51  ;;  %v6506_v47 = vpack.c.bf16 %v1490_v42, %v1488_v40  ;;  %v6508_v48 = vpack.c.bf16 %v1495_v44, %v1493_v43  ;;  %v1492_v49 = vld [vmem:[%s10028_s0 + $0x270] sm:$0xff]  ;;  %v1701_v54 = vld [vmem:[%s10028_s0 + $0x188] sm:$0xff]  ;;  %v1698_v55 = vld [vmem:[%s10028_s0 + $0x80] sm:$0xff] }
  0x1c   :  { %524 = vmatprep.mubr.f32.mxu1 %v7271_v3  ;;  %6459 = vmatpush1.bf16.msra.mxu1 %v6458_v52  ;;  %v1494_v50 = vld [vmem:[%s10028_s0 + $0x370] sm:$0xff]  ;;  %v1497_v52 = vld [vmem:[%s10028_s0 + $0x478] sm:$0x1]  ;;  %v1705_v58 = vld [vmem:[%s10028_s0 + $0x388] sm:$0xff] }
  0x1d   :  { %6461 = vmatprep.subr.bf16.mxu1 %v6460_v53  ;;  %v6510_v51 = vpack.c.bf16 %v1494_v50, %v1492_v49  ;;  %v1699_v53 = vld [vmem:[%s10028_s0 + $0x88] sm:$0xff]  ;;  %v1496_v59 = vld [vmem:[%s10028_s0 + $0x470] sm:$0x1]  ;;  %v1702_v63 = vld [vmem:[%s10028_s0 + $0x280] sm:$0xff] }
  0x1e   :  { %v6516_v60 = vpack.c.bf16 %v1701_v54, %v1699_v53  ;;  %v1911_v5 = vld [vmem:[%s10028_s0 + $0x198] sm:$0xff]  ;;  %v1908_v6 = vld [vmem:[%s10028_s0 + $0x90] sm:$0xff]  ;;  %v1706_v10 = vld [vmem:[%s10028_s0 + $0x480] sm:$0x1] }
  0x1f   :  { %5680 = vmatmul.mubr.msk.f32.gmra.mrb[6].mxu1 %vm35_vm1, %v7414_v41  ;;  %v1915_v9 = vld [vmem:[%s10028_s0 + $0x398] sm:$0xff]  ;;  %v1912_v14 = vld [vmem:[%s10028_s0 + $0x290] sm:$0xff]  ;;  %v2121_v19 = vld [vmem:[%s10028_s0 + $0x1a8] sm:$0xff] }
  0x20   :  { %6463 = vmatpush1.bf16.msra.mxu1 %v6462_v56  ;;  %728 = vmatprep.mubr.f32.mxu1 %v7271_v3  ;;  %v1700_v56 = vld [vmem:[%s10028_s0 + $0x180] sm:$0xff]  ;;  %v2125_v23 = vld [vmem:[%s10028_s0 + $0x3a8] sm:$0xff]  ;;  %v1916_v24 = vld [vmem:[%s10028_s0 + $0x490] sm:$0x1] }
  0x21   :  { %5685 = vmatprep.subr.msk.mxu1 %vm42_vm0, %v657_v57  ;;  %v1703_v57 = vld [vmem:[%s10028_s0 + $0x288] sm:$0xff]  ;;  %v6518_v61 = vpack.c.bf16 %v1700_v56, %v1698_v55  ;;  %v2118_v20 = vld [vmem:[%s10028_s0 + $0xa0] sm:$0xff]  ;;  %v2331_v34 = vld [vmem:[%s10028_s0 + $0x1b8] sm:$0xff] }
  0x22   :  { %v6520_v62 = vpack.c.bf16 %v1705_v58, %v1703_v57  ;;  %v2122_v28 = vld [vmem:[%s10028_s0 + $0x2a0] sm:$0xff]  ;;  %v2328_v35 = vld [vmem:[%s10028_s0 + $0xb0] sm:$0xff]  ;;  %v2335_v38 = vld [vmem:[%s10028_s0 + $0x3b8] sm:$0xff] }
  0x23   :  { %v2126_v39 = vld [vmem:[%s10028_s0 + $0x4a0] sm:$0x1]  ;;  %v2332_v44 = vld [vmem:[%s10028_s0 + $0x2b0] sm:$0xff]  ;;  %v2541_v49 = vld [vmem:[%s10028_s0 + $0x1c8] sm:$0xff] }
  0x24   :  { %5686 = vmatpush1.msk.msra.mxu1 %vm42_vm0, %v656_v0  ;;  %v1704_v0 = vld [vmem:[%s10028_s0 + $0x380] sm:$0xff]  ;;  %v2545_v53 = vld [vmem:[%s10028_s0 + $0x3c8] sm:$0xff]  ;;  %v2336_v54 = vld [vmem:[%s10028_s0 + $0x4b0] sm:$0x1] }
  0x25   :  { %5687 = vmatmul.mubr.msk.f32.vlgmr.msra.gmra.mrb[8].mxu1 %vm35_vm1, %v7380_v30  ;;  %6469 = vmatprep.subr.bf16.mxu1 %v6468_v1  ;;  %v6522_v1 = vpack.c.bf16 %v1704_v0, %v1702_v63  ;;  %v2538_v50 = vld [vmem:[%s10028_s0 + $0xc0] sm:$0xff]  ;;  %v2751_v63 = vld [vmem:[%s10028_s0 + $0x1d8] sm:$0xff]  ;;  %v2748_v0 = vld [vmem:[%s10028_s0 + $0xd0] sm:$0xff] }
  0x26   :  { %734 = vmatprep.mubr.f32.mxu1 %v7271_v3  ;;  %6471 = vmatpush1.bf16.msra.mxu1 %v6470_v2  ;;  %v1707_v2 = vld [vmem:[%s10028_s0 + $0x488] sm:$0x1]  ;;  %v2542_v58 = vld [vmem:[%s10028_s0 + $0x2c0] sm:$0xff] }
  0x27   :  { %6473 = vmatprep.subr.bf16.mxu1 %v6472_v4  ;;  %v1909_v4 = vld [vmem:[%s10028_s0 + $0x98] sm:$0xff] }
  0x28   :  { %v6528_v11 = vpack.c.bf16 %v1911_v5, %v1909_v4  ;;  %v2755_v4 = vld [vmem:[%s10028_s0 + $0x3d8] sm:$0xff]  ;;  %v2546_v5 = vld [vmem:[%s10028_s0 + $0x4c0] sm:$0x1] }
  0x29   :  { %5688 = vmatmul.mubr.msk.f32.gmra.mrb[10].mxu1 %vm35_vm1, %v7414_v41 }
  0x2a   :  { %6475 = vmatpush1.bf16.msra.mxu1 %v6474_v7  ;;  %938 = vmatprep.mubr.f32.mxu1 %v7271_v3  ;;  %v1910_v7 = vld [vmem:[%s10028_s0 + $0x190] sm:$0xff] }
  0x2b   :  { %5693 = vmatprep.subr.msk.mxu1 %vm42_vm0, %v867_v8  ;;  %v1913_v8 = vld [vmem:[%s10028_s0 + $0x298] sm:$0xff]  ;;  %v6530_v12 = vpack.c.bf16 %v1910_v7, %v1908_v6 }
  0x2c   :  { %v6532_v13 = vpack.c.bf16 %v1915_v9, %v1913_v8  ;;  %v2752_v9 = vld [vmem:[%s10028_s0 + $0x2d0] sm:$0xff] }
  0x2e   :  { %5694 = vmatpush1.msk.msra.mxu1 %vm42_vm0, %v866_v15  ;;  %v1914_v15 = vld [vmem:[%s10028_s0 + $0x390] sm:$0xff] }
  0x2f   :  { %5695 = vmatmul.mubr.msk.f32.vlgmr.msra.gmra.mrb[12].mxu1 %vm35_vm1, %v7380_v30  ;;  %6481 = vmatprep.subr.bf16.mxu1 %v6480_v16  ;;  %v6534_v16 = vpack.c.bf16 %v1914_v15, %v1912_v14  ;;  %v2961_v14 = vld [vmem:[%s10028_s0 + $0x1e8] sm:$0xff]  ;;  %v2958_v15 = vld [vmem:[%s10028_s0 + $0xe0] sm:$0xff] }
  0x30   :  { %944 = vmatprep.mubr.f32.mxu1 %v7271_v3  ;;  %6483 = vmatpush1.bf16.msra.mxu1 %v6482_v17  ;;  %v1917_v17 = vld [vmem:[%s10028_s0 + $0x498] sm:$0x1] }
  0x31   :  { %6485 = vmatprep.subr.bf16.mxu1 %v6484_v18  ;;  %v2119_v18 = vld [vmem:[%s10028_s0 + $0xa8] sm:$0xff] }
  0x32   :  { %v6540_v25 = vpack.c.bf16 %v2121_v19, %v2119_v18  ;;  %v2965_v18 = vld [vmem:[%s10028_s0 + $0x3e8] sm:$0xff]  ;;  %v2756_v19 = vld [vmem:[%s10028_s0 + $0x4d0] sm:$0x1] }
  0x33   :  { %5696 = vmatmul.mubr.msk.f32.gmra.mrb[14].mxu1 %vm35_vm1, %v7414_v41 }
  0x34   :  { %6487 = vmatpush1.bf16.msra.mxu1 %v6486_v21  ;;  %1148 = vmatprep.mubr.f32.mxu1 %v7271_v3  ;;  %v2120_v21 = vld [vmem:[%s10028_s0 + $0x1a0] sm:$0xff] }
  0x35   :  { %5701 = vmatprep.subr.msk.mxu1 %vm42_vm0, %v1077_v22  ;;  %v2123_v22 = vld [vmem:[%s10028_s0 + $0x2a8] sm:$0xff]  ;;  %v6542_v26 = vpack.c.bf16 %v2120_v21, %v2118_v20 }
  0x36   :  { %v6544_v27 = vpack.c.bf16 %v2125_v23, %v2123_v22  ;;  %v2962_v23 = vld [vmem:[%s10028_s0 + $0x2e0] sm:$0xff] }
  0x38   :  { %5702 = vmatpush1.msk.msra.mxu1 %vm42_vm0, %v1076_v29  ;;  %v2124_v29 = vld [vmem:[%s10028_s0 + $0x3a0] sm:$0xff] }
  0x39   :  { %5703 = vmatmul.mubr.msk.f32.vlgmr.msra.gmra.mrb[16].mxu1 %vm35_vm1, %v7380_v30  ;;  %6493 = vmatprep.subr.bf16.mxu1 %v6492_v31  ;;  %v6546_v31 = vpack.c.bf16 %v2124_v29, %v2122_v28  ;;  %v3171_v28 = vld [vmem:[%s10028_s0 + $0x1f8] sm:$0xff]  ;;  %v3168_v29 = vld [vmem:[%s10028_s0 + $0xf0] sm:$0xff] }
  0x3a   :  { %1154 = vmatprep.mubr.f32.mxu1 %v7271_v3  ;;  %6495 = vmatpush1.bf16.msra.mxu1 %v6494_v32  ;;  %v2127_v32 = vld [vmem:[%s10028_s0 + $0x4a8] sm:$0x1] }
  0x3b   :  { %6497 = vmatprep.subr.bf16.mxu1 %v6496_v33  ;;  %v2329_v33 = vld [vmem:[%s10028_s0 + $0xb8] sm:$0xff] }
  0x3c   :  { %v6552_v40 = vpack.c.bf16 %v2331_v34, %v2329_v33  ;;  %v3175_v33 = vld [vmem:[%s10028_s0 + $0x3f8] sm:$0xff]  ;;  %v2966_v34 = vld [vmem:[%s10028_s0 + $0x4e0] sm:$0x1] }
  0x3d   :  { %5704 = vmatmul.mubr.msk.f32.gmra.mrb[18].mxu1 %vm35_vm1, %v7414_v41 }
  0x3e   :  { %6499 = vmatpush1.bf16.msra.mxu1 %v6498_v36  ;;  %1358 = vmatprep.mubr.f32.mxu1 %v7271_v3  ;;  %v2330_v36 = vld [vmem:[%s10028_s0 + $0x1b0] sm:$0xff] }
  0x3f   :  { %5709 = vmatprep.subr.msk.mxu1 %vm42_vm0, %v1287_v37  ;;  %v2333_v37 = vld [vmem:[%s10028_s0 + $0x2b8] sm:$0xff]  ;;  %v6554_v42 = vpack.c.bf16 %v2330_v36, %v2328_v35 }
  0x40   :  { %v6556_v43 = vpack.c.bf16 %v2335_v38, %v2333_v37  ;;  %v3172_v38 = vld [vmem:[%s10028_s0 + $0x2f0] sm:$0xff] }
  0x42   :  { %5710 = vmatpush1.msk.msra.mxu1 %vm42_vm0, %v1286_v45  ;;  %v2334_v45 = vld [vmem:[%s10028_s0 + $0x3b0] sm:$0xff] }
  0x43   :  { %5711 = vmatmul.mubr.msk.f32.vlgmr.msra.gmra.mrb[20].mxu1 %vm35_vm1, %v7380_v30  ;;  %6505 = vmatprep.subr.bf16.mxu1 %v6504_v46  ;;  %v6558_v46 = vpack.c.bf16 %v2334_v45, %v2332_v44 }
  0x44   :  { %1364 = vmatprep.mubr.f32.mxu1 %v7271_v3  ;;  %6507 = vmatpush1.bf16.msra.mxu1 %v6506_v47  ;;  %v2337_v47 = vld [vmem:[%s10028_s0 + $0x4b8] sm:$0x1] }
  0x45   :  { %6509 = vmatprep.subr.bf16.mxu1 %v6508_v48  ;;  %v2539_v48 = vld [vmem:[%s10028_s0 + $0xc8] sm:$0xff] }
  0x46   :  { %v6564_v55 = vpack.c.bf16 %v2541_v49, %v2539_v48 }
  0x47   :  { %5712 = vmatmul.mubr.msk.f32.gmra.mrb[22].mxu1 %vm35_vm1, %v7414_v41 }
  0x48   :  { %6511 = vmatpush1.bf16.msra.mxu1 %v6510_v51  ;;  %1568 = vmatprep.mubr.f32.mxu1 %v7271_v3  ;;  %v2540_v51 = vld [vmem:[%s10028_s0 + $0x1c0] sm:$0xff] }
  0x49   :  { %5717 = vmatprep.subr.msk.mxu1 %vm42_vm0, %v1497_v52  ;;  %v2543_v52 = vld [vmem:[%s10028_s0 + $0x2c8] sm:$0xff]  ;;  %v6566_v56 = vpack.c.bf16 %v2540_v51, %v2538_v50 }
  0x4a   :  { %v6568_v57 = vpack.c.bf16 %v2545_v53, %v2543_v52 }
  0x4c   :  { %5718 = vmatpush1.msk.msra.mxu1 %vm42_vm0, %v1496_v59  ;;  %v2544_v59 = vld [vmem:[%s10028_s0 + $0x3c0] sm:$0xff] }
  0x4d   :  { %5719 = vmatmul.mubr.msk.f32.vlgmr.msra.gmra.mrb[24].mxu1 %vm35_vm1, %v7380_v30  ;;  %6517 = vmatprep.subr.bf16.mxu1 %v6516_v60  ;;  %v6570_v60 = vpack.c.bf16 %v2544_v59, %v2542_v58 }
  0x4e   :  { %1574 = vmatprep.mubr.f32.mxu1 %v7271_v3  ;;  %6519 = vmatpush1.bf16.msra.mxu1 %v6518_v61  ;;  %v2547_v61 = vld [vmem:[%s10028_s0 + $0x4c8] sm:$0x1] }
  0x4f   :  { %6521 = vmatprep.subr.bf16.mxu1 %v6520_v62  ;;  %v2749_v62 = vld [vmem:[%s10028_s0 + $0xd8] sm:$0xff] }
  0x50   :  { %v6576_v6 = vpack.c.bf16 %v2751_v63, %v2749_v62  ;;  %v231_v62 = vld [vmem:[%s10030_s2 + $0x20] sm:$0xff] }
  0x51   :  { %5720 = vmatmul.mubr.msk.f32.gmra.mrb[26].mxu1 %vm35_vm1, %v7414_v41 }
  0x52   :  { %6523 = vmatpush1.bf16.msra.mxu1 %v6522_v1  ;;  %1778 = vmatprep.mubr.f32.mxu1 %v7271_v3  ;;  %v2750_v1 = vld [vmem:[%s10028_s0 + $0x1d0] sm:$0xff] }
  0x53   :  { %5725 = vmatprep.subr.msk.mxu1 %vm42_vm0, %v1707_v2  ;;  %v2753_v2 = vld [vmem:[%s10028_s0 + $0x2d8] sm:$0xff]  ;;  %v6578_v7 = vpack.c.bf16 %v2750_v1, %v2748_v0  ;;  %v232_v1 = vld [vmem:[%s10030_s2 + $0x28] sm:$0xff] }
  0x54   :  { %v6580_v8 = vpack.c.bf16 %v2755_v4, %v2753_v2 }
  0x56   :  { %5726 = vmatpush1.msk.msra.mxu1 %vm42_vm0, %v1706_v10  ;;  %v2754_v10 = vld [vmem:[%s10028_s0 + $0x3d0] sm:$0xff] }
  0x57   :  { %5727 = vmatmul.mubr.msk.f32.vlgmr.msra.gmra.mrb[28].mxu1 %vm35_vm1, %v7380_v30  ;;  %6529 = vmatprep.subr.bf16.mxu1 %v6528_v11  ;;  %v6582_v11 = vpack.c.bf16 %v2754_v10, %v2752_v9  ;;  %v233_v9 = vld [vmem:[%s10030_s2 + $0x30] sm:$0xff] }
  0x58   :  { %1784 = vmatprep.mubr.f32.mxu1 %v7271_v3  ;;  %6531 = vmatpush1.bf16.msra.mxu1 %v6530_v12  ;;  %v2757_v12 = vld [vmem:[%s10028_s0 + $0x4d8] sm:$0x1] }
  0x59   :  { %6533 = vmatprep.subr.bf16.mxu1 %v6532_v13  ;;  %v2959_v13 = vld [vmem:[%s10028_s0 + $0xe8] sm:$0xff] }
  0x5a   :  { %v6588_v20 = vpack.c.bf16 %v2961_v14, %v2959_v13  ;;  %v234_v13 = vld [vmem:[%s10030_s2 + $0x38] sm:$0xff] }
  0x5b   :  { %5728 = vmatmul.mubr.msk.f32.gmra.mrb[30].mxu1 %vm35_vm1, %v7414_v41 }
  0x5c   :  { %6535 = vmatpush1.bf16.msra.mxu1 %v6534_v16  ;;  %1988 = vmatprep.mubr.f32.mxu1 %v7271_v3  ;;  %v2960_v16 = vld [vmem:[%s10028_s0 + $0x1e0] sm:$0xff] }
  0x5d   :  { %5733 = vmatprep.subr.msk.mxu1 %vm42_vm0, %v1917_v17  ;;  %v2963_v17 = vld [vmem:[%s10028_s0 + $0x2e8] sm:$0xff]  ;;  %v6590_v21 = vpack.c.bf16 %v2960_v16, %v2958_v15 }
  0x5e   :  { %v6592_v22 = vpack.c.bf16 %v2965_v18, %v2963_v17  ;;  %v130_v18 = vld [vmem:[%s10030_s2] sm:$0xff] }
  0x60   :  { %5734 = vmatpush1.msk.msra.mxu1 %vm42_vm0, %v1916_v24  ;;  %v2964_v24 = vld [vmem:[%s10028_s0 + $0x3e0] sm:$0xff] }
  0x61   :  { %5735 = vmatmul.mubr.msk.f32.vlgmr.msra.gmra.mrb[32].mxu1 %vm35_vm1, %v7380_v30  ;;  %6541 = vmatprep.subr.bf16.mxu1 %v6540_v25  ;;  %v6594_v25 = vpack.c.bf16 %v2964_v24, %v2962_v23  ;;  %v131_v24 = vld [vmem:[%s10030_s2 + $0x8] sm:$0xff] }
  0x62   :  { %1994 = vmatprep.mubr.f32.mxu1 %v7271_v3  ;;  %6543 = vmatpush1.bf16.msra.mxu1 %v6542_v26  ;;  %v2967_v26 = vld [vmem:[%s10028_s0 + $0x4e8] sm:$0x1] }
  0x63   :  { %6545 = vmatprep.subr.bf16.mxu1 %v6544_v27  ;;  %v3169_v27 = vld [vmem:[%s10028_s0 + $0xf8] sm:$0xff] }
  0x64   :  { %v6600_v35 = vpack.c.bf16 %v3171_v28, %v3169_v27  ;;  %v132_v27 = vld [vmem:[%s10030_s2 + $0x10] sm:$0xff] }
  0x65   :  { %5736 = vmatmul.mubr.msk.f32.gmra.mrb[34].mxu1 %vm35_vm1, %v7414_v41 }
  0x66   :  { %6547 = vmatpush1.bf16.msra.mxu1 %v6546_v31  ;;  %2198 = vmatprep.mubr.f32.mxu1 %v7271_v3  ;;  %v3170_v31 = vld [vmem:[%s10028_s0 + $0x1f0] sm:$0xff] }
  0x67   :  { %5741 = vmatprep.subr.msk.mxu1 %vm42_vm0, %v2127_v32  ;;  %v3173_v32 = vld [vmem:[%s10028_s0 + $0x2f8] sm:$0xff]  ;;  %v6602_v36 = vpack.c.bf16 %v3170_v31, %v3168_v29 }
  0x68   :  { %v6604_v37 = vpack.c.bf16 %v3175_v33, %v3173_v32 }
  0x6a   :  { %5742 = vmatpush1.msk.msra.mxu1 %vm42_vm0, %v2126_v39  ;;  %v3174_v39 = vld [vmem:[%s10028_s0 + $0x3f0] sm:$0xff] }
  0x6b   :  { %5743 = vmatmul.mubr.msk.f32.vlgmr.msra.gmra.mrb[36].mxu1 %vm35_vm1, %v7380_v30  ;;  %6553 = vmatprep.subr.bf16.mxu1 %v6552_v40  ;;  %v6606_v40 = vpack.c.bf16 %v3174_v39, %v3172_v38  ;;  %v535_v39 = vld [vmem:[%s10030_s2 + $0x40] sm:$0xff] }
  0x6c   :  { %2204 = vmatprep.mubr.f32.mxu1 %v7271_v3  ;;  %6555 = vmatpush1.bf16.msra.mxu1 %v6554_v42  ;;  %v3177_v42 = vld [vmem:[%s10028_s0 + $0x4f8] sm:$0x1] }
  0x6d   :  { %6557 = vmatprep.subr.bf16.mxu1 %v6556_v43  ;;  %v3176_v43 = vld [vmem:[%s10028_s0 + $0x4f0] sm:$0x1] }
  0x6f   :  { %5744 = vmatmul.mubr.msk.f32.gmra.mrb[38].mxu1 %vm35_vm1, %v7414_v41 }
  0x70   :  { %6559 = vmatpush1.bf16.msra.mxu1 %v6558_v46  ;;  %2408 = vmatprep.mubr.f32.mxu1 %v7271_v3 }
  0x71   :  { %5749 = vmatprep.subr.msk.mxu1 %vm42_vm0, %v2337_v47 }
  0x74   :  { %5750 = vmatpush1.msk.msra.mxu1 %vm42_vm0, %v2336_v54 }
  0x75   :  { %5751 = vmatmul.mubr.msk.f32.vlgmr.msra.gmra.mrb[40].mxu1 %vm35_vm1, %v7380_v30  ;;  %6565 = vmatprep.subr.bf16.mxu1 %v6564_v55 }
  0x76   :  { %2414 = vmatprep.mubr.f32.mxu1 %v7271_v3  ;;  %6567 = vmatpush1.bf16.msra.mxu1 %v6566_v56 }
  0x77   :  { %6569 = vmatprep.subr.bf16.mxu1 %v6568_v57 }
  0x79   :  { %5752 = vmatmul.mubr.msk.f32.gmra.mrb[42].mxu1 %vm35_vm1, %v7414_v41 }
  0x7a   :  { %6571 = vmatpush1.bf16.msra.mxu1 %v6570_v60  ;;  %2618 = vmatprep.mubr.f32.mxu1 %v7271_v3 }
  0x7b   :  { %5757 = vmatprep.subr.msk.mxu1 %vm42_vm0, %v2547_v61 }
  0x7e   :  { %5758 = vmatpush1.msk.msra.mxu1 %vm42_vm0, %v2546_v5 }
  0x7f   :  { %5759 = vmatmul.mubr.msk.f32.vlgmr.msra.gmra.mrb[44].mxu1 %vm35_vm1, %v7380_v30  ;;  %6577 = vmatprep.subr.bf16.mxu1 %v6576_v6 }
  0x80   :  { %2624 = vmatprep.mubr.f32.mxu1 %v7271_v3  ;;  %6579 = vmatpush1.bf16.msra.mxu1 %v6578_v7 }
  0x81   :  { %6581 = vmatprep.subr.bf16.mxu1 %v6580_v8 }
  0x83   :  { %5760 = vmatmul.mubr.msk.f32.gmra.mrb[46].mxu1 %vm35_vm1, %v7414_v41 }
  0x84   :  { %6583 = vmatpush1.bf16.msra.mxu1 %v6582_v11  ;;  %2828 = vmatprep.mubr.f32.mxu1 %v7271_v3 }
  0x85   :  { %5765 = vmatprep.subr.msk.mxu1 %vm42_vm0, %v2757_v12 }
  0x88   :  { %5766 = vmatpush1.msk.msra.mxu1 %vm42_vm0, %v2756_v19 }
  0x89   :  { %5767 = vmatmul.mubr.msk.f32.vlgmr.msra.gmra.mrb[48].mxu1 %vm35_vm1, %v7380_v30  ;;  %6589 = vmatprep.subr.bf16.mxu1 %v6588_v20 }
  0x8a   :  { %2834 = vmatprep.mubr.f32.mxu1 %v7271_v3  ;;  %6591 = vmatpush1.bf16.msra.mxu1 %v6590_v21 }
  0x8b   :  { %6593 = vmatprep.subr.bf16.mxu1 %v6592_v22 }
  0x8d   :  { %5768 = vmatmul.mubr.msk.f32.gmra.mrb[50].mxu1 %vm35_vm1, %v7414_v41 }
  0x8e   :  { %6595 = vmatpush1.bf16.msra.mxu1 %v6594_v25  ;;  %3038 = vmatprep.mubr.f32.mxu1 %v7271_v3 }
  0x8f   :  { %5773 = vmatprep.subr.msk.mxu1 %vm42_vm0, %v2967_v26 }
  0x92   :  { %5774 = vmatpush1.msk.msra.mxu1 %vm42_vm0, %v2966_v34 }
  0x93   :  { %5775 = vmatmul.mubr.msk.f32.vlgmr.msra.gmra.mrb[52].mxu1 %vm35_vm1, %v7380_v30  ;;  %6601 = vmatprep.subr.bf16.mxu1 %v6600_v35  ;;  %v133_v35 = vld [vmem:[%s10030_s2 + $0x18] sm:$0xff] }
  0x94   :  { %3044 = vmatprep.mubr.f32.mxu1 %v7271_v3  ;;  %6603 = vmatpush1.bf16.msra.mxu1 %v6602_v36 }
  0x95   :  { %6605 = vmatprep.subr.bf16.mxu1 %v6604_v37 }
  0x97   :  { %5776 = vmatmul.mubr.msk.f32.gmra.mrb[54].mxu1 %vm35_vm1, %v7414_v41 }
  0x98   :  { %6607 = vmatpush1.bf16.msra.mxu1 %v6606_v40  ;;  %3248 = vmatprep.mubr.f32.mxu1 %v7271_v3 }
  0x99   :  { %5781 = vmatprep.subr.msk.mxu1 %vm42_vm0, %v3177_v42 }
  0x9c   :  { %5782 = vmatpush1.msk.msra.mxu1 %vm42_vm0, %v3176_v43 }
  0x9d   :  { %5783 = vmatmul.mubr.msk.f32.vlgmr.msra.gmra.mrb[56].mxu1 %vm35_vm1, %v7380_v30 }
  0x9e   :  { %3254 = vmatprep.mubr.f32.mxu1 %v7271_v3 }
  0xa1   :  { %5784 = vmatmul.mubr.msk.f32.gmra.mrb[58].mxu1 %vm35_vm1, %v7414_v41 }
  0xe2   :  { %v216_v44 = vpop.f32.mrb[0].mxu1 }
  0xe3   :  { %v218_v45 = vpop.f32.mrb[1].mxu1  ;;  %v115_v46 = vpop.f32.mrb[0].mxu0  ;;  %v227_v50 = vmax.f32 %v216_v44, 0.0 }
  0xe4   :  { %v117_v47 = vpop.f32.mrb[1].mxu0  ;;  %v126_v49 = vmax.f32 %v115_v46, 0.0  ;;  %v228_v55 = vmax.f32 %v218_v45, 0.0  ;;  %v536_v45 = vld [vmem:[%s10030_s2 + $0x48] sm:$0xff] }
  0xe5   :  { %v127_v53 = vmax.f32 %v117_v47, 0.0 }
  0xe6   :  { %v222_v48 = vpop.f32.mrb[2].mxu1 }
  0xe7   :  { %v229_v51 = vmax.f32 %v222_v48, 0.0  ;;  %v224_v52 = vpop.f32.mrb[3].mxu1  ;;  %v121_v54 = vpop.f32.mrb[2].mxu0 }
  0xe8   :  { %v230_v56 = vmax.f32 %v224_v52, 0.0  ;;  %v128_v57 = vmax.f32 %v121_v54, 0.0  ;;  %v123_v30 = vpop.f32.mrb[3].mxu0  ;;  %v538_v54 = vld [vmem:[%s10030_s2 + $0x58] sm:$0xff] }
  0xe9   :  { %v6438_v58 = vpack.c.bf16 %v229_v51, %v227_v50  ;;  %v129_v59 = vmax.f32 %v123_v30, 0.0  ;;  %v537_v51 = vld [vmem:[%s10030_s2 + $0x50] sm:$0xff] }
  0xea   :  { %v6436_v60 = vpack.c.bf16 %v230_v56, %v228_v55  ;;  %v6442_v61 = vpack.c.bf16 %v128_v57, %v126_v49 }
  0xeb   :  { %v6440_v41 = vpack.c.bf16 %v129_v59, %v127_v53 }
  0xec   :  { %6437 = vmatprep.subr.bf16.mxu0 %v6436_v60  ;;  %v745_v60 = vld [vmem:[%s10030_s2 + $0x60] sm:$0xff] }
  0xed   :  { %6439 = vmatpush1.bf16.msra.mxu0 %v6438_v58 }
  0xee   :  { %6441 = vmatprep.subr.bf16.mxu0 %v6440_v41  ;;  %v520_v63 = vpop.f32.mrb[4].mxu1 }
  0xef   :  { %v522_v0 = vpop.f32.mrb[5].mxu1  ;;  %v531_v2 = vmax.f32 %v520_v63, 0.0  ;;  %v746_v63 = vld [vmem:[%s10030_s2 + $0x68] sm:$0xff] }
  0xf0   :  { %5669 = vmatmul.mubr.msk.f32.vlgmr.msra.gmra.mrb[4].mxu0 %vm235_vm2, %v231_v62  ;;  %v532_v4 = vmax.f32 %v522_v0, 0.0 }
  0xf1   :  { %6443 = vmatpush1.bf16.msra.mxu0 %v6442_v61  ;;  %318 = vmatprep.mubr.f32.mxu0 %v7271_v3 }
  0xf2   :  { %v526_v5 = vpop.f32.mrb[6].mxu1 }
  0xf3   :  { %v533_v6 = vmax.f32 %v526_v5, 0.0  ;;  %v528_v7 = vpop.f32.mrb[7].mxu1  ;;  %v747_v5 = vld [vmem:[%s10030_s2 + $0x70] sm:$0xff] }
  0xf4   :  { %5670 = vmatmul.mubr.msk.f32.gmra.mrb[6].mxu0 %vm235_vm2, %v232_v1  ;;  %v534_v8 = vmax.f32 %v528_v7, 0.0 }
  0xf5   :  { %324 = vmatprep.mubr.f32.mxu0 %v7271_v3  ;;  %v6454_v10 = vpack.c.bf16 %v533_v6, %v531_v2 }
  0xf6   :  { %v6452_v11 = vpack.c.bf16 %v534_v8, %v532_v4 }
  0xf8   :  { %5671 = vmatmul.mubr.msk.f32.gmra.mrb[8].mxu0 %vm235_vm2, %v233_v9  ;;  %6453 = vmatprep.subr.bf16.mxu0 %v6452_v11  ;;  %v730_v12 = vpop.f32.mrb[8].mxu1  ;;  %v748_v11 = vld [vmem:[%s10030_s2 + $0x78] sm:$0xff] }
  0xf9   :  { %330 = vmatprep.mubr.f32.mxu0 %v7271_v3  ;;  %v732_v14 = vpop.f32.mrb[9].mxu1  ;;  %v741_v15 = vmax.f32 %v730_v12, 0.0 }
  0xfa   :  { %v742_v16 = vmax.f32 %v732_v14, 0.0  ;;  %v955_v14 = vld [vmem:[%s10030_s2 + $0x80] sm:$0xff] }
  0xfc   :  { %5672 = vmatmul.mubr.msk.f32.gmra.mrb[10].mxu0 %vm235_vm2, %v234_v13  ;;  %v736_v17 = vpop.f32.mrb[10].mxu1 }
  0xfd   :  { %413 = vmatprep.mubr.f32.mxu0 %v7271_v3  ;;  %v743_v19 = vmax.f32 %v736_v17, 0.0  ;;  %v738_v20 = vpop.f32.mrb[11].mxu1 }
  0xfe   :  { %v744_v21 = vmax.f32 %v738_v20, 0.0 }
  0xff   :  { %v6466_v22 = vpack.c.bf16 %v743_v19, %v741_v15 }
 0x100   :  { %5673 = vmatmul.mubr.msk.f32.vlgmr.msra.gmra.mrb[4].mxu0 %vm235_vm2, %v130_v18  ;;  %v6464_v23 = vpack.c.bf16 %v744_v21, %v742_v16  ;;  %v956_v21 = vld [vmem:[%s10030_s2 + $0x88] sm:$0xff] }
 0x101   :  { %6455 = vmatpush1.bf16.msra.mxu0 %v6454_v10  ;;  %419 = vmatprep.mubr.f32.mxu0 %v7271_v3 }
 0x102   :  { %6465 = vmatprep.subr.bf16.mxu0 %v6464_v23  ;;  %v940_v25 = vpop.f32.mrb[12].mxu1 }
 0x103   :  { %v942_v26 = vpop.f32.mrb[13].mxu1  ;;  %v951_v28 = vmax.f32 %v940_v25, 0.0  ;;  %v957_v25 = vld [vmem:[%s10030_s2 + $0x90] sm:$0xff] }
 0x104   :  { %5674 = vmatmul.mubr.msk.f32.gmra.mrb[6].mxu0 %vm235_vm2, %v131_v24  ;;  %v952_v29 = vmax.f32 %v942_v26, 0.0 }
 0x105   :  { %425 = vmatprep.mubr.f32.mxu0 %v7271_v3 }
 0x106   :  { %v946_v31 = vpop.f32.mrb[14].mxu1 }
 0x107   :  { %v953_v32 = vmax.f32 %v946_v31, 0.0  ;;  %v948_v33 = vpop.f32.mrb[15].mxu1  ;;  %v958_v31 = vld [vmem:[%s10030_s2 + $0x98] sm:$0xff] }
 0x108   :  { %5675 = vmatmul.mubr.msk.f32.gmra.mrb[8].mxu0 %vm235_vm2, %v132_v27  ;;  %v954_v34 = vmax.f32 %v948_v33, 0.0 }
 0x109   :  { %431 = vmatprep.mubr.f32.mxu0 %v7271_v3  ;;  %v6478_v36 = vpack.c.bf16 %v953_v32, %v951_v28 }
 0x10a   :  { %v6476_v37 = vpack.c.bf16 %v954_v34, %v952_v29 }
 0x10c   :  { %5676 = vmatmul.mubr.msk.f32.gmra.mrb[10].mxu0 %vm235_vm2, %v133_v35  ;;  %v1150_v38 = vpop.f32.mrb[16].mxu1 }
 0x10d   :  { %615 = vmatprep.mubr.f32.mxu0 %v7271_v3  ;;  %v1152_v40 = vpop.f32.mrb[17].mxu1  ;;  %v1161_v42 = vmax.f32 %v1150_v38, 0.0 }
 0x10e   :  { %v1162_v43 = vmax.f32 %v1152_v40, 0.0  ;;  %v1166_v40 = vld [vmem:[%s10030_s2 + $0xa8] sm:$0xff] }
 0x110   :  { %5681 = vmatmul.mubr.msk.f32.vlgmr.msra.gmra.mrb[4].mxu0 %vm235_vm2, %v535_v39  ;;  %v1156_v44 = vpop.f32.mrb[18].mxu1 }
 0x111   :  { %6467 = vmatpush1.bf16.msra.mxu0 %v6466_v22  ;;  %621 = vmatprep.mubr.f32.mxu0 %v7271_v3  ;;  %v1163_v46 = vmax.f32 %v1156_v44, 0.0  ;;  %v1158_v47 = vpop.f32.mrb[19].mxu1 }
 0x112   :  { %6477 = vmatprep.subr.bf16.mxu0 %v6476_v37  ;;  %v1164_v48 = vmax.f32 %v1158_v47, 0.0  ;;  %v1165_v37 = vld [vmem:[%s10030_s2 + $0xa0] sm:$0xff] }
 0x113   :  { %v6490_v49 = vpack.c.bf16 %v1163_v46, %v1161_v42 }
 0x114   :  { %5682 = vmatmul.mubr.msk.f32.gmra.mrb[6].mxu0 %vm235_vm2, %v536_v45  ;;  %v6488_v50 = vpack.c.bf16 %v1164_v48, %v1162_v43  ;;  %v1167_v48 = vld [vmem:[%s10030_s2 + $0xb0] sm:$0xff] }
 0x115   :  { %627 = vmatprep.mubr.f32.mxu0 %v7271_v3 }
 0x116   :  { %v1360_v52 = vpop.f32.mrb[20].mxu1 }
 0x117   :  { %v1362_v53 = vpop.f32.mrb[21].mxu1  ;;  %v1371_v55 = vmax.f32 %v1360_v52, 0.0  ;;  %v1168_v52 = vld [vmem:[%s10030_s2 + $0xb8] sm:$0xff] }
 0x118   :  { %5683 = vmatmul.mubr.msk.f32.gmra.mrb[8].mxu0 %vm235_vm2, %v537_v51  ;;  %v1372_v56 = vmax.f32 %v1362_v53, 0.0 }
 0x119   :  { %633 = vmatprep.mubr.f32.mxu0 %v7271_v3 }
 0x11a   :  { %v1366_v57 = vpop.f32.mrb[22].mxu1 }
 0x11b   :  { %v1373_v30 = vmax.f32 %v1366_v57, 0.0  ;;  %v1368_v58 = vpop.f32.mrb[23].mxu1  ;;  %v1375_v57 = vld [vmem:[%s10030_s2 + $0xc0] sm:$0xff] }
 0x11c   :  { %5684 = vmatmul.mubr.msk.f32.gmra.mrb[10].mxu0 %vm235_vm2, %v538_v54  ;;  %v1374_v59 = vmax.f32 %v1368_v58, 0.0 }
 0x11d   :  { %825 = vmatprep.mubr.f32.mxu0 %v7271_v3  ;;  %v7993_v61 = vpack.c.bf16 %v1373_v30, %v1371_v55 }
 0x11e   :  { %v6500_v41 = vpack.c.bf16 %v1374_v59, %v1372_v56 }
 0x120   :  { %5689 = vmatmul.mubr.msk.f32.vlgmr.msra.gmra.mrb[4].mxu0 %vm235_vm2, %v745_v60  ;;  %v1570_v62 = vpop.f32.mrb[24].mxu1 }
 0x121   :  { %6479 = vmatpush1.bf16.msra.mxu0 %v6478_v36  ;;  %831 = vmatprep.mubr.f32.mxu0 %v7271_v3  ;;  %v1572_v0 = vpop.f32.mrb[25].mxu1  ;;  %v1581_v1 = vmax.f32 %v1570_v62, 0.0 }
 0x122   :  { %6489 = vmatprep.subr.bf16.mxu0 %v6488_v50  ;;  %v1582_v2 = vmax.f32 %v1572_v0, 0.0  ;;  %v1377_v0 = vld [vmem:[%s10030_s2 + $0xd0] sm:$0xff] }
 0x124   :  { %5690 = vmatmul.mubr.msk.f32.gmra.mrb[6].mxu0 %vm235_vm2, %v746_v63  ;;  %v1576_v4 = vpop.f32.mrb[26].mxu1 }
 0x125   :  { %837 = vmatprep.mubr.f32.mxu0 %v7271_v3  ;;  %v1583_v6 = vmax.f32 %v1576_v4, 0.0  ;;  %v1578_v7 = vpop.f32.mrb[27].mxu1 }
 0x126   :  { %v1584_v8 = vmax.f32 %v1578_v7, 0.0 }
 0x127   :  { %v8005_v9 = vpack.c.bf16 %v1583_v6, %v1581_v1 }
 0x128   :  { %5691 = vmatmul.mubr.msk.f32.gmra.mrb[8].mxu0 %vm235_vm2, %v747_v5  ;;  %v6512_v10 = vpack.c.bf16 %v1584_v8, %v1582_v2  ;;  %v1378_v8 = vld [vmem:[%s10030_s2 + $0xd8] sm:$0xff] }
 0x129   :  { %843 = vmatprep.mubr.f32.mxu0 %v7271_v3 }
 0x12a   :  { %v1780_v12 = vpop.f32.mrb[28].mxu1 }
 0x12b   :  { %v1782_v13 = vpop.f32.mrb[29].mxu1  ;;  %v1791_v15 = vmax.f32 %v1780_v12, 0.0  ;;  %v1585_v12 = vld [vmem:[%s10030_s2 + $0xe0] sm:$0xff] }
 0x12c   :  { %5692 = vmatmul.mubr.msk.f32.gmra.mrb[10].mxu0 %vm235_vm2, %v748_v11  ;;  %v1792_v16 = vmax.f32 %v1782_v13, 0.0 }
 0x12d   :  { %1035 = vmatprep.mubr.f32.mxu0 %v7271_v3 }
 0x12e   :  { %v1786_v17 = vpop.f32.mrb[30].mxu1 }
 0x12f   :  { %v1793_v18 = vmax.f32 %v1786_v17, 0.0  ;;  %v1788_v19 = vpop.f32.mrb[31].mxu1  ;;  %v1586_v17 = vld [vmem:[%s10030_s2 + $0xe8] sm:$0xff] }
 0x130   :  { %5697 = vmatmul.mubr.msk.f32.vlgmr.msra.gmra.mrb[4].mxu0 %vm235_vm2, %v955_v14  ;;  %v1794_v20 = vmax.f32 %v1788_v19, 0.0 }
 0x131   :  { %6491 = vmatpush1.bf16.msra.mxu0 %v6490_v49  ;;  %1041 = vmatprep.mubr.f32.mxu0 %v7271_v3  ;;  %v8022_v22 = vpack.c.bf16 %v1793_v18, %v1791_v15 }
 0x132   :  { %6501 = vmatprep.subr.bf16.mxu0 %v6500_v41  ;;  %v6524_v23 = vpack.c.bf16 %v1794_v20, %v1792_v16  ;;  %v1376_v41 = vld [vmem:[%s10030_s2 + $0xc8] sm:$0xff] }
 0x134   :  { %5698 = vmatmul.mubr.msk.f32.gmra.mrb[6].mxu0 %vm235_vm2, %v956_v21  ;;  %v1990_v24 = vpop.f32.mrb[32].mxu1 }
 0x135   :  { %1047 = vmatprep.mubr.f32.mxu0 %v7271_v3  ;;  %v1992_v26 = vpop.f32.mrb[33].mxu1  ;;  %v2001_v27 = vmax.f32 %v1990_v24, 0.0 }
 0x136   :  { %v2002_v28 = vmax.f32 %v1992_v26, 0.0  ;;  %v1588_v26 = vld [vmem:[%s10030_s2 + $0xf8] sm:$0xff] }
 0x138   :  { %5699 = vmatmul.mubr.msk.f32.gmra.mrb[8].mxu0 %vm235_vm2, %v957_v25  ;;  %v1996_v29 = vpop.f32.mrb[34].mxu1 }
 0x139   :  { %1053 = vmatprep.mubr.f32.mxu0 %v7271_v3  ;;  %v2003_v32 = vmax.f32 %v1996_v29, 0.0  ;;  %v1998_v33 = vpop.f32.mrb[35].mxu1 }
 0x13a   :  { %v2004_v34 = vmax.f32 %v1998_v33, 0.0 }
 0x13b   :  { %v8034_v35 = vpack.c.bf16 %v2003_v32, %v2001_v27 }
 0x13c   :  { %5700 = vmatmul.mubr.msk.f32.gmra.mrb[10].mxu0 %vm235_vm2, %v958_v31  ;;  %v8037_v36 = vpack.c.bf16 %v2004_v34, %v2002_v28  ;;  %v1795_v34 = vld [vmem:[%s10030_s2 + $0x100] sm:$0xff] }
 0x13d   :  { %1245 = vmatprep.mubr.f32.mxu0 %v7271_v3 }
 0x13e   :  { %v2200_v38 = vpop.f32.mrb[36].mxu1 }
 0x13f   :  { %v2202_v39 = vpop.f32.mrb[37].mxu1  ;;  %v2211_v42 = vmax.f32 %v2200_v38, 0.0  ;;  %v3378_v38 = vld [vmem:[%s10031_s5] sm:$0xff] }
 0x140   :  { %5705 = vmatmul.mubr.msk.f32.vlgmr.msra.gmra.mrb[4].mxu0 %vm235_vm2, %v1165_v37  ;;  %v2212_v43 = vmax.f32 %v2202_v39, 0.0  ;;  %v7272_v37 = vmov 0   ;;  %v3380_v39 = vld [vmem:[%s10031_s5 + $0x10] sm:$0xff] }
 0x141   :  { %6503 = vmatpush1.bf16.msra.mxu0 %v7993_v61  ;;  %1251 = vmatprep.mubr.f32.mxu0 %v7271_v3 }
 0x142   :  { %6513 = vmatprep.subr.bf16.mxu0 %v6512_v10  ;;  %v2206_v44 = vpop.f32.mrb[38].mxu1  ;;  %7261 = vset.pattern.permute.xlu0 %v7272_v37 }
 0x143   :  { %v2213_v45 = vmax.f32 %v2206_v44, 0.0  ;;  %v2208_v46 = vpop.f32.mrb[39].mxu1  ;;  %3384 = vperm.xlu0 %7261, %v3378_v38   ;;  %7262 = vset.pattern.permute.xlu1 %v7272_v37  ;;  %v3771_v44 = vld [vmem:[%s10032_s3 + $0x88] sm:$0xff]  ;;  %v3267_v37 = vld [vmem:[%s10030_s2 + $0x1f0] sm:$0xff]  ;;  %v3268_v38 = vld [vmem:[%s10030_s2 + $0x1f8] sm:$0xff] }
 0x144   :  { %5706 = vmatmul.mubr.msk.f32.gmra.mrb[6].mxu0 %vm235_vm2, %v1166_v40  ;;  %v2214_v47 = vmax.f32 %v2208_v46, 0.0  ;;  %3394 = vperm.xlu1 %7262, %v3380_v39   ;;  %v3754_v46 = vld [vmem:[%s10032_s3] sm:$0xff] }
 0x145   :  { %1257 = vmatprep.mubr.f32.mxu0 %v7271_v3  ;;  %v8054_v49 = vpack.c.bf16 %v2213_v45, %v2211_v42  ;;  %v3379_v42 = vld [vmem:[%s10031_s5 + $0x8] sm:$0xff]  ;;  %v3774_v39 = vld [vmem:[%s10032_s3 + $0xa0] sm:$0xff] }
 0x146   :  { %v8056_v50 = vpack.c.bf16 %v2214_v47, %v2212_v43  ;;  %v3770_v43 = vld [vmem:[%s10032_s3 + $0x80] sm:$0xff]  ;;  %v3755_v47 = vld [vmem:[%s10032_s3 + $0x8] sm:$0xff] }
 0x147   :  { %v6612_v45 = vpack.c.bf16 %v3771_v44, %v3770_v43  ;;  %3389 = vperm.xlu0 %7261, %v3379_v42   ;;  %v3900_v42 = vld [vmem:[%s10032_s3 + $0x490] sm:$0xff]  ;;  %v3901_v44 = vld [vmem:[%s10032_s3 + $0x498] sm:$0xff] }
 0x148   :  { %5707 = vmatmul.mubr.msk.f32.gmra.mrb[8].mxu0 %vm235_vm2, %v1167_v48  ;;  %v2410_v51 = vpop.f32.mrb[40].mxu1  ;;  %v3772_v48 = vld [vmem:[%s10032_s3 + $0x90] sm:$0xff] }
 0x149   :  { %1263 = vmatprep.mubr.f32.mxu0 %v7271_v3  ;;  %v2412_v53 = vpop.f32.mrb[41].mxu1  ;;  %v2421_v54 = vmax.f32 %v2410_v51, 0.0  ;;  %6613 = vmatprep.subr.bf16.mxu1 %v6612_v45  ;;  %v3758_v45 = vld [vmem:[%s10032_s3 + $0x20] sm:$0xff] }
 0x14a   :  { %v2422_v55 = vmax.f32 %v2412_v53, 0.0  ;;  %v6614_v53 = vpack.c.bf16 %v3755_v47, %v3754_v46  ;;  %v3759_v46 = vld [vmem:[%s10032_s3 + $0x28] sm:$0xff]  ;;  %v6744_v47 = vpack.c.bf16 %v3901_v44, %v3900_v42  ;;  %v3768_v42 = vld [vmem:[%s10032_s3 + $0x70] sm:$0xff] }
 0x14c   :  { %5708 = vmatmul.mubr.msk.f32.gmra.mrb[10].mxu0 %vm235_vm2, %v1168_v52  ;;  %v2416_v56 = vpop.f32.mrb[42].mxu1  ;;  %v3381_v52 = vld [vmem:[%s10031_s5 + $0x18] sm:$0xff]  ;;  %6615 = vmatpush3.bf16.msra.mxu1 %v6614_v53 }
 0x14d   :  { %1455 = vmatprep.mubr.f32.mxu0 %v7271_v3  ;;  %v2423_v30 = vmax.f32 %v2416_v56, 0.0  ;;  %v2418_v58 = vpop.f32.mrb[43].mxu1  ;;  %3399 = vperm.xlu1 %7262, %v3381_v52   ;;  %v3885_v52 = vld [vmem:[%s10032_s3 + $0x418] sm:$0xff] }
 0x14e   :  { %v2424_v59 = vmax.f32 %v2418_v58, 0.0  ;;  %v3757_v58 = vld [vmem:[%s10032_s3 + $0x18] sm:$0xff] }
 0x14f   :  { %v8068_v60 = vpack.c.bf16 %v2423_v30, %v2421_v54  ;;  %v3773_v54 = vld [vmem:[%s10032_s3 + $0x98] sm:$0xff]  ;;  %v3756_v30 = vld [vmem:[%s10032_s3 + $0x10] sm:$0xff] }
 0x150   :  { %5713 = vmatmul.mubr.msk.f32.vlgmr.msra.gmra.mrb[4].mxu0 %vm235_vm2, %v1375_v57  ;;  %v8071_v61 = vpack.c.bf16 %v2424_v59, %v2422_v55  ;;  %v1796_v55 = vld [vmem:[%s10030_s2 + $0x108] sm:$0xff]  ;;  %v6616_v57 = vpack.c.bf16 %v3773_v54, %v3772_v48  ;;  %v6622_v48 = vpack.c.bf16 %v3759_v46, %v3758_v45  ;;  %v3776_v54 = vld [vmem:[%s10032_s3 + $0xb0] sm:$0xff]  ;;  %v3894_v46 = vld [vmem:[%s10032_s3 + $0x460] sm:$0xff] }
 0x151   :  { %6515 = vmatpush1.bf16.msra.mxu0 %v8005_v9  ;;  %1461 = vmatprep.mubr.f32.mxu0 %v7271_v3 }
 0x152   :  { %6525 = vmatprep.subr.bf16.mxu0 %v6524_v23  ;;  %v2620_v62 = vpop.f32.mrb[44].mxu1  ;;  %6617 = vmatprep.subr.bf16.mxu1 %v6616_v57 }
 0x153   :  { %v2622_v63 = vpop.f32.mrb[45].mxu1  ;;  %v2631_v1 = vmax.f32 %v2620_v62, 0.0  ;;  %v6618_v62 = vpack.c.bf16 %v3757_v58, %v3756_v30  ;;  %v3903_v30 = vld [vmem:[%s10032_s3 + $0x4a8] sm:$0xff] }
 0x154   :  { %5714 = vmatmul.mubr.msk.f32.gmra.mrb[6].mxu0 %vm235_vm2, %v1376_v41  ;;  %v2632_v2 = vmax.f32 %v2622_v63, 0.0  ;;  %v1797_v63 = vld [vmem:[%s10030_s2 + $0x110] sm:$0xff] }
 0x155   :  { %1467 = vmatprep.mubr.f32.mxu0 %v7271_v3  ;;  %6619 = vmatpush3.bf16.msra.mxu1 %v6618_v62 }
 0x156   :  { %v2626_v4 = vpop.f32.mrb[46].mxu1 }
 0x157   :  { %v2633_v5 = vmax.f32 %v2626_v4, 0.0  ;;  %v2628_v6 = vpop.f32.mrb[47].mxu1 }
 0x158   :  { %5715 = vmatmul.mubr.msk.f32.gmra.mrb[8].mxu0 %vm235_vm2, %v1377_v0  ;;  %v2634_v7 = vmax.f32 %v2628_v6, 0.0  ;;  %v2005_v6 = vld [vmem:[%s10030_s2 + $0x120] sm:$0xff] }
 0x159   :  { %1473 = vmatprep.mubr.f32.mxu0 %v7271_v3  ;;  %v8088_v9 = vpack.c.bf16 %v2633_v5, %v2631_v1  ;;  %v1798_v5 = vld [vmem:[%s10030_s2 + $0x118] sm:$0xff] }
 0x15a   :  { %v8090_v10 = vpack.c.bf16 %v2634_v7, %v2632_v2  ;;  %v2006_v7 = vld [vmem:[%s10030_s2 + $0x128] sm:$0xff] }
 0x15c   :  { %5716 = vmatmul.mubr.msk.f32.gmra.mrb[10].mxu0 %vm235_vm2, %v1378_v8  ;;  %v2830_v11 = vpop.f32.mrb[48].mxu1  ;;  %v2007_v8 = vld [vmem:[%s10030_s2 + $0x130] sm:$0xff] }
 0x15d   :  { %1665 = vmatprep.mubr.f32.mxu0 %v7271_v3  ;;  %v2832_v13 = vpop.f32.mrb[49].mxu1  ;;  %v2841_v14 = vmax.f32 %v2830_v11, 0.0  ;;  %v2216_v11 = vld [vmem:[%s10030_s2 + $0x148] sm:$0xff] }
 0x15e   :  { %v2842_v15 = vmax.f32 %v2832_v13, 0.0  ;;  %v2426_v13 = vld [vmem:[%s10030_s2 + $0x168] sm:$0xff] }
 0x160   :  { %5721 = vmatmul.mubr.msk.f32.vlgmr.msra.gmra.mrb[4].mxu0 %vm235_vm2, %v1585_v12  ;;  %v2836_v16 = vpop.f32.mrb[50].mxu1  ;;  %v2217_v12 = vld [vmem:[%s10030_s2 + $0x150] sm:$0xff] }
 0x161   :  { %6527 = vmatpush1.bf16.msra.mxu0 %v8022_v22  ;;  %1671 = vmatprep.mubr.f32.mxu0 %v7271_v3  ;;  %v2843_v18 = vmax.f32 %v2836_v16, 0.0  ;;  %v2838_v19 = vpop.f32.mrb[51].mxu1  ;;  %v1587_v22 = vld [vmem:[%s10030_s2 + $0xf0] sm:$0xff]  ;;  %v2636_v16 = vld [vmem:[%s10030_s2 + $0x188] sm:$0xff] }
 0x162   :  { %6537 = vmatprep.subr.bf16.mxu0 %v8037_v36  ;;  %v2844_v20 = vmax.f32 %v2838_v19, 0.0  ;;  %v2845_v19 = vld [vmem:[%s10030_s2 + $0x1a0] sm:$0xff] }
 0x163   :  { %v8104_v21 = vpack.c.bf16 %v2843_v18, %v2841_v14  ;;  %v2427_v14 = vld [vmem:[%s10030_s2 + $0x170] sm:$0xff]  ;;  %v2638_v18 = vld [vmem:[%s10030_s2 + $0x198] sm:$0xff] }
 0x164   :  { %5722 = vmatmul.mubr.msk.f32.gmra.mrb[6].mxu0 %vm235_vm2, %v1586_v17  ;;  %v8107_v23 = vpack.c.bf16 %v2844_v20, %v2842_v15  ;;  %v2635_v15 = vld [vmem:[%s10030_s2 + $0x180] sm:$0xff]  ;;  %v2637_v17 = vld [vmem:[%s10030_s2 + $0x190] sm:$0xff]  ;;  %v2846_v20 = vld [vmem:[%s10030_s2 + $0x1a8] sm:$0xff] }
 0x165   :  { %1677 = vmatprep.mubr.f32.mxu0 %v7271_v3 }
 0x166   :  { %v3040_v24 = vpop.f32.mrb[52].mxu1 }
 0x167   :  { %v3042_v25 = vpop.f32.mrb[53].mxu1  ;;  %v3051_v27 = vmax.f32 %v3040_v24, 0.0  ;;  %v3899_v24 = vld [vmem:[%s10032_s3 + $0x488] sm:$0xff] }
 0x168   :  { %5723 = vmatmul.mubr.msk.f32.gmra.mrb[8].mxu0 %vm235_vm2, %v1587_v22  ;;  %v3052_v28 = vmax.f32 %v3042_v25, 0.0  ;;  %v3898_v22 = vld [vmem:[%s10032_s3 + $0x480] sm:$0xff] }
 0x169   :  { %1683 = vmatprep.mubr.f32.mxu0 %v7271_v3  ;;  %v3055_v25 = vld [vmem:[%s10030_s2 + $0x1c0] sm:$0xff] }
 0x16a   :  { %v3046_v29 = vpop.f32.mrb[54].mxu1 }
 0x16b   :  { %v3053_v31 = vmax.f32 %v3046_v29, 0.0  ;;  %v3048_v32 = vpop.f32.mrb[55].mxu1  ;;  %v3058_v29 = vld [vmem:[%s10030_s2 + $0x1d8] sm:$0xff] }
 0x16c   :  { %5724 = vmatmul.mubr.msk.f32.gmra.mrb[10].mxu0 %vm235_vm2, %v1588_v26  ;;  %v3054_v33 = vmax.f32 %v3048_v32, 0.0  ;;  %v6740_v26 = vpack.c.bf16 %v3899_v24, %v3898_v22  ;;  %v3883_v32 = vld [vmem:[%s10032_s3 + $0x408] sm:$0xff]  ;;  %v3908_v24 = vld [vmem:[%s10032_s3 + $0x4d0] sm:$0xff] }
 0x16d   :  { %1875 = vmatprep.mubr.f32.mxu0 %v7271_v3  ;;  %v8123_v36 = vpack.c.bf16 %v3053_v31, %v3051_v27  ;;  %v3056_v27 = vld [vmem:[%s10030_s2 + $0x1c8] sm:$0xff]  ;;  %v3882_v31 = vld [vmem:[%s10032_s3 + $0x400] sm:$0xff] }
 0x16e   :  { %v8131_v40 = vpack.c.bf16 %v3054_v33, %v3052_v28  ;;  %v3057_v28 = vld [vmem:[%s10030_s2 + $0x1d0] sm:$0xff]  ;;  %v3265_v33 = vld [vmem:[%s10030_s2 + $0x1e0] sm:$0xff]  ;;  %v3783_v22 = vld [vmem:[%s10032_s3 + $0xe8] sm:$0xff] }
 0x170   :  { %5729 = vmatmul.mubr.msk.f32.vlgmr.msra.gmra.mrb[4].mxu0 %vm235_vm2, %v1795_v34  ;;  %v3250_v51 = vpop.f32.mrb[56].mxu1  ;;  %v6742_v34 = vpack.c.bf16 %v3883_v32, %v3882_v31  ;;  %v3892_v32 = vld [vmem:[%s10032_s3 + $0x450] sm:$0xff] }
 0x171   :  { %6539 = vmatpush1.bf16.msra.mxu0 %v8034_v35  ;;  %1881 = vmatprep.mubr.f32.mxu0 %v7271_v3  ;;  %v3252_v56 = vpop.f32.mrb[57].mxu1  ;;  %v3261_v35 = vmax.f32 %v3250_v51, 0.0  ;;  %v3884_v51 = vld [vmem:[%s10032_s3 + $0x410] sm:$0xff] }
 0x172   :  { %6549 = vmatprep.subr.bf16.mxu0 %v8056_v50  ;;  %v3262_v59 = vmax.f32 %v3252_v56, 0.0  ;;  %v6746_v53 = vpack.c.bf16 %v3885_v52, %v3884_v51  ;;  %v3902_v56 = vld [vmem:[%s10032_s3 + $0x4a0] sm:$0xff]  ;;  %v3803_v52 = vld [vmem:[%s10032_s3 + $0x188] sm:$0xff] }
 0x173   :  { %v6748_v58 = vpack.c.bf16 %v3903_v30, %v3902_v56  ;;  %v3802_v51 = vld [vmem:[%s10032_s3 + $0x180] sm:$0xff]  ;;  %v3897_v30 = vld [vmem:[%s10032_s3 + $0x478] sm:$0xff] }
 0x174   :  { %5730 = vmatmul.mubr.msk.f32.gmra.mrb[6].mxu0 %vm235_vm2, %v1796_v55  ;;  %v3256_v41 = vpop.f32.mrb[58].mxu1  ;;  %v3777_v55 = vld [vmem:[%s10032_s3 + $0xb8] sm:$0xff] }
 0x175   :  { %1887 = vmatprep.mubr.f32.mxu0 %v7271_v3  ;;  %v3263_v0 = vmax.f32 %v3256_v41, 0.0  ;;  %v3258_v1 = vpop.f32.mrb[59].mxu1  ;;  %v6624_v57 = vpack.c.bf16 %v3777_v55, %v3776_v54  ;;  %v3886_v41 = vld [vmem:[%s10032_s3 + $0x420] sm:$0xff]  ;;  %v6644_v54 = vpack.c.bf16 %v3803_v52, %v3802_v51  ;;  %v3913_v55 = vld [vmem:[%s10032_s3 + $0x4f8] sm:$0xff] }
 0x176   :  { %v3264_v50 = vmax.f32 %v3258_v1, 0.0  ;;  %v3778_v1 = vld [vmem:[%s10032_s3 + $0xc0] sm:$0xff] }
 0x177   :  { %v8175_v2 = vpack.c.bf16 %v3263_v0, %v3261_v35  ;;  %v3760_v35 = vld [vmem:[%s10032_s3 + $0x30] sm:$0xff] }
 0x178   :  { %5731 = vmatmul.mubr.msk.f32.gmra.mrb[8].mxu0 %vm235_vm2, %v1797_v63  ;;  %v8178_v4 = vpack.c.bf16 %v3264_v50, %v3262_v59  ;;  %v3761_v59 = vld [vmem:[%s10032_s3 + $0x38] sm:$0xff]  ;;  %v3887_v63 = vld [vmem:[%s10032_s3 + $0x428] sm:$0xff] }
 0x179   :  { %1893 = vmatprep.mubr.f32.mxu0 %v7271_v3  ;;  %v6626_v62 = vpack.c.bf16 %v3761_v59, %v3760_v35  ;;  %v6750_v0 = vpack.c.bf16 %v3887_v63, %v3886_v41  ;;  %v3779_v50 = vld [vmem:[%s10032_s3 + $0xc8] sm:$0xff]  ;;  %v3962_v35 = vld [vmem:[%s10032_s3 + $0x680] sm:$0xff] }
 0x17a   :  { %v3963_v59 = vld [vmem:[%s10032_s3 + $0x688] sm:$0xff] }
 0x17b   :  { %v6804_v41 = vpack.c.bf16 %v3963_v59, %v3962_v35 }
 0x17c   :  { %5732 = vmatmul.mubr.msk.f32.gmra.mrb[10].mxu0 %vm235_vm2, %v1798_v5  ;;  %v3905_v5 = vld [vmem:[%s10032_s3 + $0x4b8] sm:$0xff] }
 0x17d   :  { %2085 = vmatprep.mubr.f32.mxu0 %v7271_v3 }
 0x180   :  { %5737 = vmatmul.mubr.msk.f32.vlgmr.msra.gmra.mrb[4].mxu0 %vm235_vm2, %v2005_v6  ;;  %v3762_v6 = vld [vmem:[%s10032_s3 + $0x40] sm:$0xff] }
 0x181   :  { %6551 = vmatpush1.bf16.msra.mxu0 %v8054_v49  ;;  %2091 = vmatprep.mubr.f32.mxu0 %v7271_v3  ;;  %v2008_v49 = vld [vmem:[%s10030_s2 + $0x138] sm:$0xff] }
 0x182   :  { %6561 = vmatprep.subr.bf16.mxu0 %v8071_v61  ;;  %v2215_v61 = vld [vmem:[%s10030_s2 + $0x140] sm:$0xff] }
 0x184   :  { %5738 = vmatmul.mubr.msk.f32.gmra.mrb[6].mxu0 %vm235_vm2, %v2006_v7  ;;  %v3763_v7 = vld [vmem:[%s10032_s3 + $0x48] sm:$0xff] }
 0x185   :  { %2097 = vmatprep.mubr.f32.mxu0 %v7271_v3 }
 0x188   :  { %5739 = vmatmul.mubr.msk.f32.gmra.mrb[8].mxu0 %vm235_vm2, %v2007_v8 }
 0x189   :  { %2103 = vmatprep.mubr.f32.mxu0 %v7271_v3 }
 0x18c   :  { %5740 = vmatmul.mubr.msk.f32.gmra.mrb[10].mxu0 %vm235_vm2, %v2008_v49  ;;  %v6630_v49 = vpack.c.bf16 %v3763_v7, %v3762_v6 }
 0x18d   :  { %2295 = vmatprep.mubr.f32.mxu0 %v7271_v3 }
 0x190   :  { %5745 = vmatmul.mubr.msk.f32.vlgmr.msra.gmra.mrb[4].mxu0 %vm235_vm2, %v2215_v61  ;;  %v3888_v61 = vld [vmem:[%s10032_s3 + $0x430] sm:$0xff] }
 0x191   :  { %6563 = vmatpush1.bf16.msra.mxu0 %v8068_v60  ;;  %2301 = vmatprep.mubr.f32.mxu0 %v7271_v3  ;;  %v2218_v60 = vld [vmem:[%s10030_s2 + $0x158] sm:$0xff] }
 0x192   :  { %6573 = vmatprep.subr.bf16.mxu0 %v8090_v10  ;;  %v2425_v10 = vld [vmem:[%s10030_s2 + $0x160] sm:$0xff] }
 0x194   :  { %5746 = vmatmul.mubr.msk.f32.gmra.mrb[6].mxu0 %vm235_vm2, %v2216_v11  ;;  %v3889_v11 = vld [vmem:[%s10032_s3 + $0x438] sm:$0xff] }
 0x195   :  { %2307 = vmatprep.mubr.f32.mxu0 %v7271_v3 }
 0x198   :  { %5747 = vmatmul.mubr.msk.f32.gmra.mrb[8].mxu0 %vm235_vm2, %v2217_v12  ;;  %v6754_v12 = vpack.c.bf16 %v3889_v11, %v3888_v61 }
 0x199   :  { %2313 = vmatprep.mubr.f32.mxu0 %v7271_v3 }
 0x19c   :  { %5748 = vmatmul.mubr.msk.f32.gmra.mrb[10].mxu0 %vm235_vm2, %v2218_v60  ;;  %v3780_v60 = vld [vmem:[%s10032_s3 + $0xd0] sm:$0xff] }
 0x19d   :  { %2505 = vmatprep.mubr.f32.mxu0 %v7271_v3 }
 0x1a0   :  { %5753 = vmatmul.mubr.msk.f32.vlgmr.msra.gmra.mrb[4].mxu0 %vm235_vm2, %v2425_v10  ;;  %v3781_v10 = vld [vmem:[%s10032_s3 + $0xd8] sm:$0xff] }
 0x1a1   :  { %6575 = vmatpush1.bf16.msra.mxu0 %v8088_v9  ;;  %2511 = vmatprep.mubr.f32.mxu0 %v7271_v3  ;;  %v2428_v9 = vld [vmem:[%s10030_s2 + $0x178] sm:$0xff] }
 0x1a2   :  { %6585 = vmatprep.subr.bf16.mxu0 %v8107_v23  ;;  %v2848_v23 = vld [vmem:[%s10030_s2 + $0x1b8] sm:$0xff] }
 0x1a4   :  { %5754 = vmatmul.mubr.msk.f32.gmra.mrb[6].mxu0 %vm235_vm2, %v2426_v13  ;;  %v3906_v13 = vld [vmem:[%s10032_s3 + $0x4c0] sm:$0xff] }
 0x1a5   :  { %2517 = vmatprep.mubr.f32.mxu0 %v7271_v3 }
 0x1a8   :  { %5755 = vmatmul.mubr.msk.f32.gmra.mrb[8].mxu0 %vm235_vm2, %v2427_v14  ;;  %v6632_v14 = vpack.c.bf16 %v3781_v10, %v3780_v60 }
 0x1a9   :  { %2523 = vmatprep.mubr.f32.mxu0 %v7271_v3 }
 0x1ac   :  { %5756 = vmatmul.mubr.msk.f32.gmra.mrb[10].mxu0 %vm235_vm2, %v2428_v9  ;;  %v3907_v9 = vld [vmem:[%s10032_s3 + $0x4c8] sm:$0xff] }
 0x1ad   :  { %2715 = vmatprep.mubr.f32.mxu0 %v7271_v3 }
 0x1b0   :  { %5761 = vmatmul.mubr.msk.f32.vlgmr.msra.gmra.mrb[4].mxu0 %vm235_vm2, %v2635_v15  ;;  %v6756_v15 = vpack.c.bf16 %v3907_v9, %v3906_v13 }
 0x1b1   :  { %6587 = vmatpush1.bf16.msra.mxu0 %v8104_v21  ;;  %2721 = vmatprep.mubr.f32.mxu0 %v7271_v3  ;;  %v2847_v21 = vld [vmem:[%s10030_s2 + $0x1b0] sm:$0xff] }
 0x1b2   :  { %6597 = vmatprep.subr.bf16.mxu0 %v8131_v40  ;;  %v3775_v40 = vld [vmem:[%s10032_s3 + $0xa8] sm:$0xff] }
 0x1b3   :  { %v6620_v43 = vpack.c.bf16 %v3775_v40, %v3774_v39  ;;  %v3911_v40 = vld [vmem:[%s10032_s3 + $0x4e8] sm:$0xff] }
 0x1b4   :  { %5762 = vmatmul.mubr.msk.f32.gmra.mrb[6].mxu0 %vm235_vm2, %v2636_v16  ;;  %v3764_v16 = vld [vmem:[%s10032_s3 + $0x50] sm:$0xff] }
 0x1b5   :  { %2727 = vmatprep.mubr.f32.mxu0 %v7271_v3  ;;  %6621 = vmatprep.subr.bf16.mxu1 %v6620_v43  ;;  %v3769_v43 = vld [vmem:[%s10032_s3 + $0x78] sm:$0xff] }
 0x1b6   :  { %6623 = vmatpush3.bf16.msra.mxu1 %v6622_v48  ;;  %v6642_v45 = vpack.c.bf16 %v3769_v43, %v3768_v42 }
 0x1b7   :  { %6625 = vmatprep.subr.bf16.mxu1 %v6624_v57  ;;  %v3896_v57 = vld [vmem:[%s10032_s3 + $0x470] sm:$0xff] }
 0x1b8   :  { %5763 = vmatmul.mubr.msk.f32.gmra.mrb[8].mxu0 %vm235_vm2, %v2637_v17  ;;  %v3765_v17 = vld [vmem:[%s10032_s3 + $0x58] sm:$0xff] }
 0x1b9   :  { %2733 = vmatprep.mubr.f32.mxu0 %v7271_v3 }
 0x1ba   :  { %6627 = vmatpush3.bf16.msra.mxu1 %v6626_v62  ;;  %v7273_v62 = vmov 1983009808  }
 0x1bb   :  { %v3421_v63 = vunpack.c.l.s4 %v7273_v62 }
 0x1bc   :  { %5764 = vmatmul.mubr.msk.f32.gmra.mrb[10].mxu0 %vm235_vm2, %v2638_v18  ;;  %v3890_v18 = vld [vmem:[%s10032_s3 + $0x440] sm:$0xff] }
 0x1bd   :  { %2925 = vmatprep.mubr.f32.mxu0 %v7271_v3 }
 0x1c0   :  { %5769 = vmatmul.mubr.msk.f32.vlgmr.msra.gmra.mrb[4].mxu0 %vm235_vm2, %v2845_v19  ;;  %v6634_v19 = vpack.c.bf16 %v3765_v17, %v3764_v16 }
 0x1c1   :  { %6599 = vmatpush1.bf16.msra.mxu0 %v8123_v36  ;;  %2931 = vmatprep.mubr.f32.mxu0 %v7271_v3  ;;  %v3266_v36 = vld [vmem:[%s10030_s2 + $0x1e8] sm:$0xff] }
 0x1c2   :  { %6609 = vmatprep.subr.bf16.mxu0 %v8178_v4  ;;  %v6628_v4 = vpack.c.bf16 %v3779_v50, %v3778_v1  ;;  %v3422_v1 = vunpack.c.0.s8 %v3421_v63 }
 0x1c3   :  { %v3395_v17 = vpop.permute.xlu1 %3394 }
 0x1c4   :  { %5770 = vmatmul.mubr.msk.f32.gmra.mrb[6].mxu0 %vm235_vm2, %v2846_v20  ;;  %6629 = vmatprep.subr.bf16.mxu1 %v6628_v4  ;;  %v3891_v20 = vld [vmem:[%s10032_s3 + $0x448] sm:$0xff] }
 0x1c5   :  { %2937 = vmatprep.mubr.f32.mxu0 %v7271_v3  ;;  %6631 = vmatpush3.bf16.msra.mxu1 %v6630_v49 }
 0x1c6   :  { %6633 = vmatprep.subr.bf16.mxu1 %v6632_v14 }
 0x1c8   :  { %5771 = vmatmul.mubr.msk.f32.gmra.mrb[8].mxu0 %vm235_vm2, %v2847_v21  ;;  %v6758_v21 = vpack.c.bf16 %v3891_v20, %v3890_v18 }
 0x1c9   :  { %2943 = vmatprep.mubr.f32.mxu0 %v7271_v3  ;;  %6635 = vmatpush3.bf16.msra.mxu1 %v6634_v19 }
 0x1cc   :  { %5772 = vmatmul.mubr.msk.f32.gmra.mrb[10].mxu0 %vm235_vm2, %v2848_v23  ;;  %v3782_v23 = vld [vmem:[%s10032_s3 + $0xe0] sm:$0xff] }
 0x1cd   :  { %3135 = vmatprep.mubr.f32.mxu0 %v7271_v3 }
 0x1d0   :  { %5777 = vmatmul.mubr.msk.f32.vlgmr.msra.gmra.mrb[4].mxu0 %vm235_vm2, %v3055_v25  ;;  %v6636_v25 = vpack.c.bf16 %v3783_v22, %v3782_v23 }
 0x1d1   :  { %6611 = vmatpush1.bf16.msra.mxu0 %v8175_v2  ;;  %3141 = vmatprep.mubr.f32.mxu0 %v7271_v3  ;;  %v3904_v2 = vld [vmem:[%s10032_s3 + $0x4b0] sm:$0xff] }
 0x1d2   :  { %6741 = vmatprep.subr.bf16.mxu0 %v6740_v26  ;;  %v6752_v8 = vpack.c.bf16 %v3905_v5, %v3904_v2  ;;  %v3909_v26 = vld [vmem:[%s10032_s3 + $0x4d8] sm:$0xff]  ;;  %6637 = vmatprep.subr.bf16.mxu1 %v6636_v25  ;;  %v3385_v2 = vpop.permute.xlu0 %3384 }
 0x1d4   :  { %5778 = vmatmul.mubr.msk.f32.gmra.mrb[6].mxu0 %vm235_vm2, %v3056_v27  ;;  %v3766_v27 = vld [vmem:[%s10032_s3 + $0x60] sm:$0xff] }
 0x1d5   :  { %3147 = vmatprep.mubr.f32.mxu0 %v7271_v3 }
 0x1d6   :  { %v3390_v11 = vpop.permute.xlu0 %3389 }
 0x1d8   :  { %5779 = vmatmul.mubr.msk.f32.gmra.mrb[8].mxu0 %vm235_vm2, %v3057_v28  ;;  %v3767_v28 = vld [vmem:[%s10032_s3 + $0x68] sm:$0xff] }
 0x1d9   :  { %3153 = vmatprep.mubr.f32.mxu0 %v7271_v3  ;;  %v6638_v31 = vpack.c.bf16 %v3767_v28, %v3766_v27 }
 0x1db   :  { %6639 = vmatpush3.bf16.msra.mxu1 %v6638_v31 }
 0x1dc   :  { %5780 = vmatmul.mubr.msk.f32.gmra.mrb[10].mxu0 %vm235_vm2, %v3058_v29  ;;  %v6760_v29 = vpack.c.bf16 %v3909_v26, %v3908_v24 }
 0x1dd   :  { %3345 = vmatprep.mubr.f32.mxu0 %v7271_v3 }
 0x1e0   :  { %5785 = vmatmul.mubr.msk.f32.vlgmr.msra.gmra.mrb[4].mxu0 %vm235_vm2, %v3265_v33  ;;  %v3893_v33 = vld [vmem:[%s10032_s3 + $0x458] sm:$0xff] }
 0x1e1   :  { %3351 = vmatprep.mubr.f32.mxu0 %v7271_v3  ;;  %6743 = vmatpush3.bf16.msra.mxu0 %v6742_v34  ;;  %v6762_v34 = vpack.c.bf16 %v3893_v33, %v3892_v32 }
 0x1e2   :  { %6745 = vmatprep.subr.bf16.mxu0 %v6744_v47  ;;  %v3895_v47 = vld [vmem:[%s10032_s3 + $0x468] sm:$0xff] }
 0x1e3   :  { %v6766_v48 = vpack.c.bf16 %v3895_v47, %v3894_v46  ;;  %v3400_v47 = vpop.permute.xlu1 %3399 }
 0x1e4   :  { %5786 = vmatmul.mubr.msk.f32.gmra.mrb[6].mxu0 %vm235_vm2, %v3266_v36  ;;  %v3784_v36 = vld [vmem:[%s10032_s3 + $0xf0] sm:$0xff] }
 0x1e5   :  { %3357 = vmatprep.mubr.f32.mxu0 %v7271_v3  ;;  %6747 = vmatpush3.bf16.msra.mxu0 %v6746_v53  ;;  %v3912_v53 = vld [vmem:[%s10032_s3 + $0x4f0] sm:$0xff] }
 0x1e6   :  { %6749 = vmatprep.subr.bf16.mxu0 %v6748_v58  ;;  %v6768_v56 = vpack.c.bf16 %v3913_v55, %v3912_v53  ;;  %v6770_v58 = vpack.c.bf16 %v3897_v30, %v3896_v57 }
 0x1e8   :  { %5787 = vmatmul.mubr.msk.f32.gmra.mrb[8].mxu0 %vm235_vm2, %v3267_v37  ;;  %v3785_v37 = vld [vmem:[%s10032_s3 + $0xf8] sm:$0xff] }
 0x1e9   :  { %3363 = vmatprep.mubr.f32.mxu0 %v7271_v3  ;;  %6751 = vmatpush3.bf16.msra.mxu0 %v6750_v0  ;;  %v6640_v39 = vpack.c.bf16 %v3785_v37, %v3784_v36  ;;  %v3423_v0 = vlaneseq }
 0x1ea   :  { %6753 = vmatprep.subr.bf16.mxu0 %v6752_v8 }
 0x1eb   :  { %6641 = vmatprep.subr.bf16.mxu1 %v6640_v39  ;;  %v3424_v50 = vshrl.u32 %v3423_v0, 7 }
 0x1ec   :  { %5788 = vmatmul.mubr.msk.f32.gmra.mrb[10].mxu0 %vm235_vm2, %v3268_v38  ;;  %v3910_v38 = vld [vmem:[%s10032_s3 + $0x4e0] sm:$0xff]  ;;  %6643 = vmatpush3.bf16.msra.mxu1 %v6642_v45 }
 0x1ed   :  { %6755 = vmatpush3.bf16.msra.mxu0 %v6754_v12  ;;  %v6764_v44 = vpack.c.bf16 %v3911_v40, %v3910_v38  ;;  %6645 = vmatprep.subr.bf16.mxu1 %v6644_v54  ;;  %v8516_v6 = vsub.s32 %v3422_v1, %v3424_v50 }
 0x1ee   :  { %6757 = vmatprep.subr.bf16.mxu0 %v6756_v15 }
 0x1f1   :  { %6759 = vmatpush3.bf16.msra.mxu0 %v6758_v21 }
 0x1f2   :  { %6761 = vmatprep.subr.bf16.mxu0 %v6760_v29 }
 0x1f5   :  { %6763 = vmatpush3.bf16.msra.mxu0 %v6762_v34 }
 0x1f6   :  { %6765 = vmatprep.subr.bf16.mxu0 %v6764_v44 }
 0x1f9   :  { %6767 = vmatpush3.bf16.msra.mxu0 %v6766_v48 }
 0x1fa   :  { %6769 = vmatprep.subr.bf16.mxu0 %v6768_v56 }
 0x1fd   :  { %6771 = vmatpush3.bf16.msra.mxu0 %v6770_v58 }
 0x1fe   :  { %6805 = vmatprep.subr.bf16.mxu0 %v6804_v41 }
 0x2b3   :  { %v3347_v4 = vpop.f32.mrb[4].mxu0 }
 0x2b4   :  { %v3402_v5 = vadd.f32 %v3385_v2, %v3347_v4  ;;  %v3349_v7 = vpop.f32.mrb[5].mxu0 }
 0x2b5   :  { %v3403_v8 = vadd.f32 %v3385_v2, %v3349_v7 }
 0x2b6   :  { %v3410_v49 = vmax.f32 %v3402_v5, 0.0 }
 0x2b7   :  { %v3411_v61 = vmax.f32 %v3403_v8, 0.0  ;;  %v3353_v12 = vpop.f32.mrb[6].mxu0 }
 0x2b8   :  { %3418 = vst [vmem:[#allocation2] sm:$0x1] %v3410_v49  ;;  %v3426_v60 = vrot.slane %v3410_v49, %v8516_v6  ;;  %v3438_v10 = vcombine.high %v3410_v49, %v3410_v49  ;;  %v3404_v13 = vadd.f32 %v3390_v11, %v3353_v12  ;;  %v3355_v14 = vpop.f32.mrb[7].mxu0 }
 0x2b9   :  { %3582 = vst [vmem:[#allocation2 + $0x1] sm:$0x1] %v3411_v61  ;;  %v3590_v9 = vrot.slane %v3411_v61, %v8516_v6  ;;  %v3602_v15 = vcombine.high %v3411_v61, %v3411_v61  ;;  %v3405_v16 = vadd.f32 %v3390_v11, %v3355_v14 }
 0x2ba   :  { %v5789_v18 = vrot.slane %v3426_v60, 9  ;;  %v3431_v19 = vcombine.high %v3426_v60, %v3426_v60  ;;  %v3445_v20 = vrot.slane %v3438_v10, %v8516_v6  ;;  %5791 = vst.sshfl [vmem:[#allocation2 + $0x8] sm:$0x1 pattern:$0x76325410] %v3438_v10  ;;  %v3412_v21 = vmax.f32 %v3404_v13, 0.0 }
 0x2bb   :  { %v5809_v23 = vrot.slane %v3590_v9, 9  ;;  %v3595_v22 = vcombine.high %v3590_v9, %v3590_v9  ;;  %v3609_v24 = vrot.slane %v3602_v15, %v8516_v6  ;;  %5811 = vst.sshfl [vmem:[#allocation2 + $0x9] sm:$0x1 pattern:$0x76325410] %v3602_v15  ;;  %v3413_v25 = vmax.f32 %v3405_v16, 0.0 }
 0x2bc   :  { %v3359_v26 = vpop.f32.mrb[8].mxu0  ;;  %3430 = vst [vmem:[#allocation2 + $0x2] sm:$0x1] %v5789_v18  ;;  %3433 = vst [vmem:[#allocation2 + $0x4] sm:$0x1] %v3431_v19  ;;  %v5790_v27 = vrot.slane %v3431_v19, 9  ;;  %v3452_v29 = vcombine.high %v3445_v20, %v3445_v20  ;;  %v3467_v31 = vrot.slane %v3412_v21, %v8516_v6  ;;  %v3479_v37 = vcombine.high %v3412_v21, %v3412_v21 }
 0x2bd   :  { %v5792_v28 = vrot.slane %v3445_v20, 9  ;;  %3459 = vst [vmem:[#allocation2 + $0x10] sm:$0x1] %v3412_v21  ;;  %v3361_v32 = vpop.f32.mrb[9].mxu0  ;;  %3594 = vst [vmem:[#allocation2 + $0x3] sm:$0x1] %v5809_v23  ;;  %v3616_v36 = vcombine.high %v3609_v24, %v3609_v24  ;;  %v3631_v42 = vrot.slane %v3413_v25, %v8516_v6  ;;  %v3643_v45 = vcombine.high %v3413_v25, %v3413_v25 }
 0x2be   :  { %3597 = vst [vmem:[#allocation2 + $0x5] sm:$0x1] %v3595_v22  ;;  %v5810_v33 = vrot.slane %v3595_v22, 9  ;;  %v5812_v34 = vrot.slane %v3609_v24, 9  ;;  %3623 = vst [vmem:[#allocation2 + $0x11] sm:$0x1] %v3413_v25  ;;  %v3472_v40 = vcombine.high %v3467_v31, %v3467_v31  ;;  %v3486_v44 = vrot.slane %v3479_v37, %v8516_v6 }
 0x2bf   :  { %3437 = vst [vmem:[#allocation2 + $0x6] sm:$0x1] %v5790_v27  ;;  %3451 = vst [vmem:[#allocation2 + $0xa] sm:$0x1] %v5792_v28  ;;  %v5793_v38 = vrot.slane %v3452_v29, 9  ;;  %v5794_v39 = vrot.slane %v3467_v31, 9  ;;  %v3406_v46 = vadd.f32 %v3395_v17, %v3359_v26  ;;  %v3636_v53 = vcombine.high %v3631_v42, %v3631_v42 }
 0x2c0   :  { %3454 = vst [vmem:[#allocation2 + $0xc] sm:$0x1] %v3452_v29  ;;  %3601 = vst [vmem:[#allocation2 + $0x7] sm:$0x1] %v5810_v33  ;;  %v5813_v43 = vrot.slane %v3616_v36, 9  ;;  %v3365_v48 = vpop.f32.mrb[10].mxu0  ;;  %v3407_v54 = vadd.f32 %v3395_v17, %v3361_v32  ;;  %v3493_v57 = vcombine.high %v3486_v44, %v3486_v44  ;;  %v3650_v30 = vrot.slane %v3643_v45, %v8516_v6 }
 0x2c1   :  { %3615 = vst [vmem:[#allocation2 + $0xb] sm:$0x1] %v5812_v34  ;;  %3618 = vst [vmem:[#allocation2 + $0xd] sm:$0x1] %v3616_v36  ;;  %v5795_v51 = vrot.slane %v3472_v40, 9  ;;  %v5814_v52 = vrot.slane %v3631_v42, 9  ;;  %v3408_v41 = vadd.f32 %v3400_v47, %v3365_v48 }
 0x2c2   :  { %5796 = vst.sshfl [vmem:[#allocation2 + $0x18] sm:$0x1 pattern:$0x76325410] %v3479_v37  ;;  %3458 = vst [vmem:[#allocation2 + $0xe] sm:$0x1] %v5793_v38  ;;  %v3657_v1 = vcombine.high %v3650_v30, %v3650_v30 }
 0x2c3   :  { %3471 = vst [vmem:[#allocation2 + $0x12] sm:$0x1] %v5794_v39  ;;  %3474 = vst [vmem:[#allocation2 + $0x14] sm:$0x1] %v3472_v40  ;;  %v3367_v55 = vpop.f32.mrb[11].mxu0  ;;  %v5797_v56 = vrot.slane %v3486_v44, 9 }
 0x2c4   :  { %3622 = vst [vmem:[#allocation2 + $0xf] sm:$0x1] %v5813_v43  ;;  %5816 = vst.sshfl [vmem:[#allocation2 + $0x19] sm:$0x1 pattern:$0x76325410] %v3643_v45  ;;  %v3409_v62 = vadd.f32 %v3400_v47, %v3367_v55 }
 0x2c5   :  { %v3414_v58 = vmax.f32 %v3406_v46, 0.0  ;;  %3478 = vst [vmem:[#allocation2 + $0x16] sm:$0x1] %v5795_v51  ;;  %3635 = vst [vmem:[#allocation2 + $0x13] sm:$0x1] %v5814_v52  ;;  %v5815_v35 = vrot.slane %v3636_v53, 9 }
 0x2c6   :  { %3638 = vst [vmem:[#allocation2 + $0x15] sm:$0x1] %v3636_v53  ;;  %v3415_v59 = vmax.f32 %v3407_v54, 0.0  ;;  %3492 = vst [vmem:[#allocation2 + $0x1a] sm:$0x1] %v5797_v56  ;;  %v5798_v63 = vrot.slane %v3493_v57, 9 }
 0x2c7   :  { %3495 = vst [vmem:[#allocation2 + $0x1c] sm:$0x1] %v3493_v57  ;;  %v5817_v0 = vrot.slane %v3650_v30, 9  ;;  %3500 = vst [vmem:[#allocation2 + $0x20] sm:$0x1] %v3414_v58  ;;  %v3508_v50 = vrot.slane %v3414_v58, %v8516_v6  ;;  %v3520_v2 = vcombine.high %v3414_v58, %v3414_v58  ;;  %v3416_v7 = vmax.f32 %v3408_v41, 0.0 }
 0x2c8   :  { %3642 = vst [vmem:[#allocation2 + $0x17] sm:$0x1] %v5815_v35  ;;  %3664 = vst [vmem:[#allocation2 + $0x21] sm:$0x1] %v3415_v59  ;;  %v3672_v4 = vrot.slane %v3415_v59, %v8516_v6  ;;  %v3684_v5 = vcombine.high %v3415_v59, %v3415_v59  ;;  %v5818_v8 = vrot.slane %v3657_v1, 9  ;;  %v3417_v11 = vmax.f32 %v3409_v62, 0.0 }
 0x2c9   :  { %3499 = vst [vmem:[#allocation2 + $0x1e] sm:$0x1] %v5798_v63  ;;  %3656 = vst [vmem:[#allocation2 + $0x1b] sm:$0x1] %v5817_v0  ;;  %v5799_v49 = vrot.slane %v3508_v50, 9  ;;  %v3513_v61 = vcombine.high %v3508_v50, %v3508_v50  ;;  %v3527_v12 = vrot.slane %v3520_v2, %v8516_v6  ;;  %v3549_v9 = vrot.slane %v3416_v7, %v8516_v6  ;;  %v3746_v25 = vld [vmem:[#allocation2] sm:$0xff] }
 0x2ca   :  { %3659 = vst [vmem:[#allocation2 + $0x1d] sm:$0x1] %v3657_v1  ;;  %5801 = vst.sshfl [vmem:[#allocation2 + $0x28] sm:$0x1 pattern:$0x76325410] %v3520_v2  ;;  %v3677_v10 = vcombine.high %v3672_v4, %v3672_v4  ;;  %v3691_v13 = vrot.slane %v3684_v5, %v8516_v6  ;;  %v3561_v15 = vcombine.high %v3416_v7, %v3416_v7 }
 0x2cb   :  { %v5819_v60 = vrot.slane %v3672_v4, 9  ;;  %5821 = vst.sshfl [vmem:[#allocation2 + $0x29] sm:$0x1 pattern:$0x76325410] %v3684_v5  ;;  %v5800_v14 = vrot.slane %v3513_v61, 9  ;;  %v3713_v16 = vrot.slane %v3417_v11, %v8516_v6  ;;  %v3534_v18 = vcombine.high %v3527_v12, %v3527_v12 }
 0x2cc   :  { %3541 = vst [vmem:[#allocation2 + $0x30] sm:$0x1] %v3416_v7  ;;  %3663 = vst [vmem:[#allocation2 + $0x1f] sm:$0x1] %v5818_v8  ;;  %v5802_v17 = vrot.slane %v3527_v12, 9  ;;  %v5820_v19 = vrot.slane %v3677_v10, 9  ;;  %v3698_v21 = vcombine.high %v3691_v13, %v3691_v13  ;;  %v3554_v22 = vcombine.high %v3549_v9, %v3549_v9 }
 0x2cd   :  { %3512 = vst [vmem:[#allocation2 + $0x22] sm:$0x1] %v5799_v49  ;;  %3515 = vst [vmem:[#allocation2 + $0x24] sm:$0x1] %v3513_v61  ;;  %v5822_v20 = vrot.slane %v3691_v13, 9  ;;  %v5804_v23 = vrot.slane %v3549_v9, 9  ;;  %v3568_v24 = vrot.slane %v3561_v15, %v8516_v6  ;;  %v3718_v28 = vcombine.high %v3713_v16, %v3713_v16 }
 0x2ce   :  { %3705 = vst [vmem:[#allocation2 + $0x31] sm:$0x1] %v3417_v11  ;;  %3676 = vst [vmem:[#allocation2 + $0x23] sm:$0x1] %v5819_v60  ;;  %v5803_v26 = vrot.slane %v3534_v18, 9  ;;  %v5824_v27 = vrot.slane %v3713_v16, 9  ;;  %v3725_v29 = vcombine.high %v3417_v11, %v3417_v11  ;;  %v4286_v42 = vrot.slane %v3746_v25, %v8516_v6 }
 0x2cf   :  { %3679 = vst [vmem:[#allocation2 + $0x25] sm:$0x1] %v3677_v10  ;;  %3519 = vst [vmem:[#allocation2 + $0x26] sm:$0x1] %v5800_v14  ;;  %v3786_v31 = vld [vmem:[%s10032_s3 + $0x100] sm:$0xff]  ;;  %v3787_v32 = vld [vmem:[%s10032_s3 + $0x108] sm:$0xff]  ;;  %v3575_v37 = vcombine.high %v3568_v24, %v3568_v24  ;;  %v4279_v43 = vcombine.high %v3746_v25, %v3746_v25 }
 0x2d0   :  { %5806 = vst.sshfl [vmem:[#allocation2 + $0x38] sm:$0x1 pattern:$0x76325410] %v3561_v15  ;;  %3533 = vst [vmem:[#allocation2 + $0x2a] sm:$0x1] %v5802_v17  ;;  %v3732_v40 = vrot.slane %v3725_v29, %v8516_v6  ;;  %v6646_v47 = vpack.c.bf16 %v3787_v32, %v3786_v31  ;;  %v4294_v55 = vcombine.high %v4286_v42, %v4286_v42 }
 0x2d1   :  { %3536 = vst [vmem:[#allocation2 + $0x2c] sm:$0x1] %v3534_v18  ;;  %3683 = vst [vmem:[#allocation2 + $0x27] sm:$0x1] %v5820_v19  ;;  %v5823_v33 = vrot.slane %v3698_v21, 9  ;;  %v5805_v34 = vrot.slane %v3554_v22, 9  ;;  %v8555_v56 = vrot.slane %v4279_v43, %v8516_v6 }
 0x2d2   :  { %3697 = vst [vmem:[#allocation2 + $0x2b] sm:$0x1] %v5822_v20  ;;  %3700 = vst [vmem:[#allocation2 + $0x2d] sm:$0x1] %v3698_v21  ;;  %v5807_v36 = vrot.slane %v3568_v24, 9  ;;  %v3748_v38 = vld [vmem:[#allocation2 + $0x10] sm:$0xff]  ;;  %v3739_v54 = vcombine.high %v3732_v40, %v3732_v40  ;;  %4511 = vmatprep.mubr.f32.mxu1 %v4294_v55 }
 0x2d3   :  { %3553 = vst [vmem:[#allocation2 + $0x32] sm:$0x1] %v5804_v23  ;;  %3556 = vst [vmem:[#allocation2 + $0x34] sm:$0x1] %v3554_v22  ;;  %v5825_v39 = vrot.slane %v3718_v28, 9  ;;  %v3804_v44 = vld [vmem:[%s10032_s3 + $0x190] sm:$0xff]  ;;  %v4320_v48 = vrot.slane %v3748_v38, %v8516_v6  ;;  %v4295_v1 = vcombine.high %v8555_v56, %v8555_v56  ;;  %v4313_v5 = vcombine.high %v3748_v38, %v3748_v38 }
 0x2d4   :  { %3540 = vst [vmem:[#allocation2 + $0x2e] sm:$0x1] %v5803_v26  ;;  %3717 = vst [vmem:[#allocation2 + $0x33] sm:$0x1] %v5824_v27  ;;  %v3805_v45 = vld [vmem:[%s10032_s3 + $0x198] sm:$0xff]  ;;  %v5808_v46 = vrot.slane %v3575_v37, 9  ;;  %4512 = vmatmul.mubr.f32.vlgmr.msra.gmra.mrb[60].mxu1 %v4286_v42 }
 0x2d5   :  { %3720 = vst [vmem:[#allocation2 + $0x35] sm:$0x1] %v3718_v28  ;;  %5826 = vst.sshfl [vmem:[#allocation2 + $0x39] sm:$0x1 pattern:$0x76325410] %v3725_v29  ;;  %v6648_v35 = vpack.c.bf16 %v3805_v45, %v3804_v44  ;;  %v4328_v59 = vcombine.high %v4320_v48, %v4320_v48  ;;  %6647 = vmatpush3.bf16.msra.mxu1 %v6646_v47  ;;  %4581 = vmatprep.mubr.f32.mxu1 %v4295_v1 }
 0x2d6   :  { %3704 = vst [vmem:[#allocation2 + $0x2f] sm:$0x1] %v5823_v33  ;;  %3560 = vst [vmem:[#allocation2 + $0x36] sm:$0x1] %v5805_v34  ;;  %v3946_v51 = vld [vmem:[%s10032_s3 + $0x600] sm:$0xff]  ;;  %v3947_v52 = vld [vmem:[%s10032_s3 + $0x608] sm:$0xff]  ;;  %v8598_v10 = vrot.slane %v4313_v5, %v8516_v6 }
 0x2d7   :  { %3574 = vst [vmem:[#allocation2 + $0x3a] sm:$0x1] %v5807_v36  ;;  %3577 = vst [vmem:[#allocation2 + $0x3c] sm:$0x1] %v3575_v37  ;;  %v5827_v53 = vrot.slane %v3732_v40, 9  ;;  %v8557_v57 = vld [vmem:[#allocation2 + $0x18] sm:$0xff]  ;;  %v6806_v50 = vpack.c.bf16 %v3947_v52, %v3946_v51  ;;  %4791 = vmatprep.mubr.f32.mxu0 %v4328_v59  ;;  %6649 = vmatprep.subr.bf16.mxu1 %v6648_v35 }
 0x2d8   :  { %3724 = vst [vmem:[#allocation2 + $0x37] sm:$0x1] %v5825_v39  ;;  %v3964_v30 = vld [vmem:[%s10032_s3 + $0x690] sm:$0xff]  ;;  %v3965_v58 = vld [vmem:[%s10032_s3 + $0x698] sm:$0xff]  ;;  %3581 = vst [vmem:[#allocation2 + $0x3e] sm:$0x1] %v5808_v46  ;;  %v8573_v63 = vrot.slane %v8557_v57, %v8516_v6  ;;  %4792 = vmatmul.mubr.f32.vlgmr.msra.gmra.mrb[12].mxu0 %v4320_v48  ;;  %v4330_v40 = vcombine.high %v8557_v57, %v8557_v57 }
 0x2d9   :  { %v3788_v41 = vld [vmem:[%s10032_s3 + $0x110] sm:$0xff]  ;;  %v3789_v62 = vld [vmem:[%s10032_s3 + $0x118] sm:$0xff]  ;;  %3738 = vst [vmem:[#allocation2 + $0x3b] sm:$0x1] %v5827_v53  ;;  %3741 = vst [vmem:[#allocation2 + $0x3d] sm:$0x1] %v3739_v54  ;;  %v6808_v8 = vpack.c.bf16 %v3965_v58, %v3964_v30  ;;  %6807 = vmatpush3.bf16.msra.mxu0 %v6806_v50 }
 0x2da   :  { %v5828_v0 = vrot.slane %v3739_v54, 9  ;;  %v3806_v2 = vld [vmem:[%s10032_s3 + $0x1a0] sm:$0xff]  ;;  %v3807_v4 = vld [vmem:[%s10032_s3 + $0x1a8] sm:$0xff]  ;;  %v4345_v7 = vcombine.high %v8573_v63, %v8573_v63  ;;  %v3948_v49 = vld [vmem:[%s10032_s3 + $0x610] sm:$0xff]  ;;  %v6650_v11 = vpack.c.bf16 %v3789_v62, %v3788_v41  ;;  %v8669_v51 = vrot.slane %v4330_v40, %v8516_v6 }
 0x2db   :  { %v3949_v61 = vld [vmem:[%s10032_s3 + $0x618] sm:$0xff]  ;;  %v3966_v12 = vld [vmem:[%s10032_s3 + $0x6a0] sm:$0xff]  ;;  %v3967_v60 = vld [vmem:[%s10032_s3 + $0x6a8] sm:$0xff]  ;;  %v6652_v13 = vpack.c.bf16 %v3807_v4, %v3806_v2  ;;  %6809 = vmatprep.subr.bf16.mxu0 %v6808_v8 }
 0x2dc   :  { %3745 = vst [vmem:[#allocation2 + $0x3f] sm:$0x1] %v5828_v0  ;;  %v3790_v14 = vld [vmem:[%s10032_s3 + $0x120] sm:$0xff]  ;;  %v3791_v9 = vld [vmem:[%s10032_s3 + $0x128] sm:$0xff]  ;;  %4931 = vmatprep.mubr.f32.mxu0 %v4345_v7  ;;  %v6810_v15 = vpack.c.bf16 %v3949_v61, %v3948_v49  ;;  %v3808_v16 = vld [vmem:[%s10032_s3 + $0x1b0] sm:$0xff]  ;;  %v6812_v18 = vpack.c.bf16 %v3967_v60, %v3966_v12  ;;  %6651 = vmatpush3.bf16.msra.mxu1 %v6650_v11 }
 0x2dd   :  { %v3809_v17 = vld [vmem:[%s10032_s3 + $0x1b8] sm:$0xff]  ;;  %v3950_v19 = vld [vmem:[%s10032_s3 + $0x620] sm:$0xff]  ;;  %v3951_v20 = vld [vmem:[%s10032_s3 + $0x628] sm:$0xff]  ;;  %v6654_v21 = vpack.c.bf16 %v3791_v9, %v3790_v14  ;;  %6653 = vmatprep.subr.bf16.mxu1 %v6652_v13 }
 0x2de   :  { %v3968_v23 = vld [vmem:[%s10032_s3 + $0x6b0] sm:$0xff]  ;;  %v3969_v22 = vld [vmem:[%s10032_s3 + $0x6b8] sm:$0xff]  ;;  %v6656_v24 = vpack.c.bf16 %v3809_v17, %v3808_v16  ;;  %6811 = vmatpush3.bf16.msra.mxu0 %v6810_v15  ;;  %v6814_v27 = vpack.c.bf16 %v3951_v20, %v3950_v19  ;;  %v3810_v28 = vld [vmem:[%s10032_s3 + $0x1c0] sm:$0xff] }
 0x2df   :  { %v3792_v25 = vld [vmem:[%s10032_s3 + $0x130] sm:$0xff]  ;;  %v3793_v26 = vld [vmem:[%s10032_s3 + $0x138] sm:$0xff]  ;;  %v3811_v29 = vld [vmem:[%s10032_s3 + $0x1c8] sm:$0xff]  ;;  %6813 = vmatprep.subr.bf16.mxu0 %v6812_v18  ;;  %v6816_v31 = vpack.c.bf16 %v3969_v22, %v3968_v23 }
 0x2e0   :  { %v3794_v32 = vld [vmem:[%s10032_s3 + $0x140] sm:$0xff]  ;;  %v3952_v33 = vld [vmem:[%s10032_s3 + $0x630] sm:$0xff]  ;;  %v3953_v34 = vld [vmem:[%s10032_s3 + $0x638] sm:$0xff]  ;;  %6655 = vmatpush3.bf16.msra.mxu1 %v6654_v21  ;;  %v6658_v36 = vpack.c.bf16 %v3793_v26, %v3792_v25  ;;  %v6660_v42 = vpack.c.bf16 %v3811_v29, %v3810_v28 }
 0x2e1   :  { %v3795_v37 = vld [vmem:[%s10032_s3 + $0x148] sm:$0xff]  ;;  %v3970_v38 = vld [vmem:[%s10032_s3 + $0x6c0] sm:$0xff]  ;;  %6657 = vmatprep.subr.bf16.mxu1 %v6656_v24  ;;  %v3812_v43 = vld [vmem:[%s10032_s3 + $0x1d0] sm:$0xff]  ;;  %v6818_v46 = vpack.c.bf16 %v3953_v34, %v3952_v33 }
 0x2e2   :  { %v3971_v39 = vld [vmem:[%s10032_s3 + $0x6c8] sm:$0xff]  ;;  %v8659_v44 = vld [vmem:[#allocation2 + $0x20] sm:$0xff]  ;;  %6815 = vmatpush3.bf16.msra.mxu0 %v6814_v27  ;;  %v3813_v47 = vld [vmem:[%s10032_s3 + $0x1d8] sm:$0xff]  ;;  %v6662_v57 = vpack.c.bf16 %v3795_v37, %v3794_v32 }
 0x2e3   :  { %v8661_v45 = vld [vmem:[#allocation2 + $0x28] sm:$0xff]  ;;  %v8666_v48 = vld [vmem:[#allocation2 + $0x30] sm:$0xff]  ;;  %v8671_v52 = vld [vmem:[#allocation2 + $0x38] sm:$0xff]  ;;  %6817 = vmatprep.subr.bf16.mxu0 %v6816_v31  ;;  %v6820_v53 = vpack.c.bf16 %v3971_v39, %v3970_v38  ;;  %v4347_v35 = vcombine.high %v8659_v44, %v8659_v44  ;;  %v6664_v41 = vpack.c.bf16 %v3813_v47, %v3812_v43 }
 0x2e4   :  { %v3954_v54 = vld [vmem:[%s10032_s3 + $0x640] sm:$0xff]  ;;  %v3955_v55 = vld [vmem:[%s10032_s3 + $0x648] sm:$0xff]  ;;  %6659 = vmatpush3.bf16.msra.mxu1 %v6658_v36  ;;  %v3972_v30 = vld [vmem:[%s10032_s3 + $0x6d0] sm:$0xff]  ;;  %v4364_v59 = vcombine.high %v8661_v45, %v8661_v45  ;;  %v4381_v1 = vcombine.high %v8666_v48, %v8666_v48  ;;  %v4398_v50 = vcombine.high %v8671_v52, %v8671_v52 }
 0x2e5   :  { %v3973_v58 = vld [vmem:[%s10032_s3 + $0x6d8] sm:$0xff]  ;;  %6661 = vmatprep.subr.bf16.mxu1 %v6660_v42  ;;  %v3796_v62 = vld [vmem:[%s10032_s3 + $0x150] sm:$0xff]  ;;  %v6822_v2 = vpack.c.bf16 %v3955_v55, %v3954_v54  ;;  %v3814_v4 = vld [vmem:[%s10032_s3 + $0x1e0] sm:$0xff]  ;;  %v8706_v7 = vrot.slane %v4347_v35, %v8516_v6 }
 0x2e6   :  { %v3797_v0 = vld [vmem:[%s10032_s3 + $0x158] sm:$0xff]  ;;  %6819 = vmatpush3.bf16.msra.mxu0 %v6818_v46  ;;  %v3815_v5 = vld [vmem:[%s10032_s3 + $0x1e8] sm:$0xff]  ;;  %v8709_v8 = vrot.slane %v4364_v59, %v8516_v6  ;;  %v6824_v49 = vpack.c.bf16 %v3973_v58, %v3972_v30  ;;  %v3956_v61 = vld [vmem:[%s10032_s3 + $0x650] sm:$0xff]  ;;  %v8718_v12 = vrot.slane %v4381_v1, %v8516_v6  ;;  %v8721_v60 = vrot.slane %v4398_v50, %v8516_v6 }
 0x2e7   :  { %6821 = vmatprep.subr.bf16.mxu0 %v6820_v53  ;;  %v3957_v11 = vld [vmem:[%s10032_s3 + $0x658] sm:$0xff]  ;;  %v6666_v13 = vpack.c.bf16 %v3797_v0, %v3796_v62  ;;  %v3974_v14 = vld [vmem:[%s10032_s3 + $0x6e0] sm:$0xff]  ;;  %v3975_v9 = vld [vmem:[%s10032_s3 + $0x6e8] sm:$0xff]  ;;  %v6668_v15 = vpack.c.bf16 %v3815_v5, %v3814_v4 }
 0x2e8   :  { %6663 = vmatpush3.bf16.msra.mxu1 %v6662_v57  ;;  %v3798_v16 = vld [vmem:[%s10032_s3 + $0x160] sm:$0xff]  ;;  %v3799_v17 = vld [vmem:[%s10032_s3 + $0x168] sm:$0xff]  ;;  %v6826_v18 = vpack.c.bf16 %v3957_v11, %v3956_v61  ;;  %v3816_v19 = vld [vmem:[%s10032_s3 + $0x1f0] sm:$0xff]  ;;  %v6828_v21 = vpack.c.bf16 %v3975_v9, %v3974_v14 }
 0x2e9   :  { %6665 = vmatprep.subr.bf16.mxu1 %v6664_v41  ;;  %v3817_v20 = vld [vmem:[%s10032_s3 + $0x1f8] sm:$0xff]  ;;  %v3958_v23 = vld [vmem:[%s10032_s3 + $0x660] sm:$0xff]  ;;  %v3959_v22 = vld [vmem:[%s10032_s3 + $0x668] sm:$0xff]  ;;  %v6670_v24 = vpack.c.bf16 %v3799_v17, %v3798_v16  ;;  %v8803_v41 = vrot.slane %v8659_v44, %v8516_v6 }
 0x2ea   :  { %6823 = vmatpush3.bf16.msra.mxu0 %v6822_v2  ;;  %v3976_v25 = vld [vmem:[%s10032_s3 + $0x6f0] sm:$0xff]  ;;  %v3977_v26 = vld [vmem:[%s10032_s3 + $0x6f8] sm:$0xff]  ;;  %v6672_v27 = vpack.c.bf16 %v3817_v20, %v3816_v19  ;;  %v6830_v31 = vpack.c.bf16 %v3959_v22, %v3958_v23  ;;  %v3834_v32 = vld [vmem:[%s10032_s3 + $0x280] sm:$0xff] }
 0x2eb   :  { %6825 = vmatprep.subr.bf16.mxu0 %v6824_v49  ;;  %v3800_v28 = vld [vmem:[%s10032_s3 + $0x170] sm:$0xff]  ;;  %v3801_v29 = vld [vmem:[%s10032_s3 + $0x178] sm:$0xff]  ;;  %v3835_v33 = vld [vmem:[%s10032_s3 + $0x288] sm:$0xff]  ;;  %v6832_v34 = vpack.c.bf16 %v3977_v26, %v3976_v25  ;;  %v4362_v9 = vcombine.high %v8803_v41, %v8803_v41 }
 0x2ec   :  { %6667 = vmatpush3.bf16.msra.mxu1 %v6666_v13  ;;  %v8765_v36 = vld [vmem:[#allocation2 + $0x8] sm:$0xff]  ;;  %v3960_v37 = vld [vmem:[%s10032_s3 + $0x670] sm:$0xff]  ;;  %v3961_v38 = vld [vmem:[%s10032_s3 + $0x678] sm:$0xff]  ;;  %v6674_v39 = vpack.c.bf16 %v3801_v29, %v3800_v28  ;;  %v6676_v43 = vpack.c.bf16 %v3835_v33, %v3834_v32 }
 0x2ed   :  { %6669 = vmatprep.subr.bf16.mxu1 %v6668_v15  ;;  %v4026_v40 = vld [vmem:[%s10032_s3 + $0x880] sm:$0xff]  ;;  %v4027_v42 = vld [vmem:[%s10032_s3 + $0x888] sm:$0xff]  ;;  %v8787_v53 = vrot.slane %v8765_v36, %v8516_v6  ;;  %v6834_v54 = vpack.c.bf16 %v3961_v38, %v3960_v37  ;;  %v3836_v55 = vld [vmem:[%s10032_s3 + $0x290] sm:$0xff] }
 0x2ee   :  { %6827 = vmatpush3.bf16.msra.mxu0 %v6826_v18  ;;  %v3818_v46 = vld [vmem:[%s10032_s3 + $0x200] sm:$0xff]  ;;  %v3819_v47 = vld [vmem:[%s10032_s3 + $0x208] sm:$0xff]  ;;  %v3837_v57 = vld [vmem:[%s10032_s3 + $0x298] sm:$0xff]  ;;  %v6868_v30 = vpack.c.bf16 %v4027_v42, %v4026_v40 }
 0x2ef   :  { %6829 = vmatprep.subr.bf16.mxu0 %v6828_v21  ;;  %v4010_v58 = vld [vmem:[%s10032_s3 + $0x800] sm:$0xff]  ;;  %v4011_v35 = vld [vmem:[%s10032_s3 + $0x808] sm:$0xff]  ;;  %v6678_v59 = vpack.c.bf16 %v3819_v47, %v3818_v46  ;;  %v4028_v62 = vld [vmem:[%s10032_s3 + $0x890] sm:$0xff]  ;;  %v6680_v1 = vpack.c.bf16 %v3837_v57, %v3836_v55  ;;  %v4311_v44 = vcombine.high %v8787_v53, %v8787_v53 }
 0x2f0   :  { %6671 = vmatpush3.bf16.msra.mxu1 %v6670_v24  ;;  %v4029_v0 = vld [vmem:[%s10032_s3 + $0x898] sm:$0xff]  ;;  %v3820_v50 = vld [vmem:[%s10032_s3 + $0x210] sm:$0xff]  ;;  %v6870_v4 = vpack.c.bf16 %v4011_v35, %v4010_v58  ;;  %v3838_v5 = vld [vmem:[%s10032_s3 + $0x2a0] sm:$0xff] }
 0x2f1   :  { %6673 = vmatprep.subr.bf16.mxu1 %v6672_v27  ;;  %v3821_v2 = vld [vmem:[%s10032_s3 + $0x218] sm:$0xff]  ;;  %v3839_v49 = vld [vmem:[%s10032_s3 + $0x2a8] sm:$0xff]  ;;  %v6872_v61 = vpack.c.bf16 %v4029_v0, %v4028_v62  ;;  %v4012_v11 = vld [vmem:[%s10032_s3 + $0x810] sm:$0xff] }
 0x2f2   :  { %6831 = vmatpush3.bf16.msra.mxu0 %v6830_v31  ;;  %v4013_v13 = vld [vmem:[%s10032_s3 + $0x818] sm:$0xff]  ;;  %v6682_v14 = vpack.c.bf16 %v3821_v2, %v3820_v50  ;;  %v4031_v15 = vld [vmem:[%s10032_s3 + $0x8a8] sm:$0xff]  ;;  %v6684_v16 = vpack.c.bf16 %v3839_v49, %v3838_v5  ;;  %v3822_v17 = vld [vmem:[%s10032_s3 + $0x220] sm:$0xff] }
 0x2f3   :  { %6833 = vmatprep.subr.bf16.mxu0 %v6832_v34  ;;  %v3823_v18 = vld [vmem:[%s10032_s3 + $0x228] sm:$0xff]  ;;  %v6874_v19 = vpack.c.bf16 %v4013_v13, %v4012_v11  ;;  %v3840_v20 = vld [vmem:[%s10032_s3 + $0x2b0] sm:$0xff]  ;;  %v4014_v23 = vld [vmem:[%s10032_s3 + $0x820] sm:$0xff] }
 0x2f4   :  { %6675 = vmatpush3.bf16.msra.mxu1 %v6674_v39  ;;  %v4015_v22 = vld [vmem:[%s10032_s3 + $0x828] sm:$0xff]  ;;  %v6686_v24 = vpack.c.bf16 %v3823_v18, %v3822_v17  ;;  %v4032_v25 = vld [vmem:[%s10032_s3 + $0x8b0] sm:$0xff]  ;;  %v4033_v26 = vld [vmem:[%s10032_s3 + $0x8b8] sm:$0xff] }
 0x2f5   :  { %6677 = vmatprep.subr.bf16.mxu1 %v6676_v43  ;;  %v3824_v28 = vld [vmem:[%s10032_s3 + $0x230] sm:$0xff]  ;;  %v3825_v29 = vld [vmem:[%s10032_s3 + $0x238] sm:$0xff]  ;;  %v6878_v31 = vpack.c.bf16 %v4015_v22, %v4014_v23  ;;  %v3842_v32 = vld [vmem:[%s10032_s3 + $0x2c0] sm:$0xff]  ;;  %v6880_v34 = vpack.c.bf16 %v4033_v26, %v4032_v25 }
 0x2f6   :  { %6835 = vmatpush3.bf16.msra.mxu0 %v6834_v54  ;;  %v3843_v33 = vld [vmem:[%s10032_s3 + $0x2c8] sm:$0xff]  ;;  %v4016_v37 = vld [vmem:[%s10032_s3 + $0x830] sm:$0xff]  ;;  %v4017_v38 = vld [vmem:[%s10032_s3 + $0x838] sm:$0xff]  ;;  %v6690_v39 = vpack.c.bf16 %v3825_v29, %v3824_v28 }
 0x2f7   :  { %4582 = vmatmul.mubr.f32.vlgmr.msra.gmra.mrb[62].mxu1 %v8555_v56  ;;  %6869 = vmatprep.subr.bf16.mxu0 %v6868_v30  ;;  %v4030_v56 = vld [vmem:[%s10032_s3 + $0x8a0] sm:$0xff]  ;;  %v4035_v42 = vld [vmem:[%s10032_s3 + $0x8c8] sm:$0xff]  ;;  %v6692_v43 = vpack.c.bf16 %v3843_v33, %v3842_v32  ;;  %v6882_v54 = vpack.c.bf16 %v4017_v38, %v4016_v37  ;;  %v3844_v55 = vld [vmem:[%s10032_s3 + $0x2d0] sm:$0xff]  ;;  %v4296_v32 = vcombine.high %v8765_v36, %v8765_v36 }
 0x2f8   :  { %6679 = vmatpush3.bf16.msra.mxu1 %v6678_v59  ;;  %4651 = vmatprep.mubr.f32.mxu1 %v4311_v44  ;;  %v6876_v21 = vpack.c.bf16 %v4031_v15, %v4030_v56  ;;  %v4034_v40 = vld [vmem:[%s10032_s3 + $0x8c0] sm:$0xff]  ;;  %v3827_v47 = vld [vmem:[%s10032_s3 + $0x248] sm:$0xff]  ;;  %v3845_v57 = vld [vmem:[%s10032_s3 + $0x2d8] sm:$0xff] }
 0x2f9   :  { %6681 = vmatprep.subr.bf16.mxu1 %v6680_v1  ;;  %4932 = vmatmul.mubr.f32.vlgmr.msra.gmra.mrb[14].mxu0 %v8573_v63  ;;  %v3841_v63 = vld [vmem:[%s10032_s3 + $0x2b8] sm:$0xff]  ;;  %v3826_v46 = vld [vmem:[%s10032_s3 + $0x240] sm:$0xff]  ;;  %v6884_v30 = vpack.c.bf16 %v4035_v42, %v4034_v40  ;;  %v4019_v35 = vld [vmem:[%s10032_s3 + $0x848] sm:$0xff]  ;;  %v6696_v1 = vpack.c.bf16 %v3845_v57, %v3844_v55 }
 0x2fa   :  { %6871 = vmatpush3.bf16.msra.mxu0 %v6870_v4  ;;  %5071 = vmatprep.mubr.f32.mxu0 %v4362_v9  ;;  %v6688_v27 = vpack.c.bf16 %v3841_v63, %v3840_v20  ;;  %v4018_v58 = vld [vmem:[%s10032_s3 + $0x840] sm:$0xff]  ;;  %v6694_v59 = vpack.c.bf16 %v3827_v47, %v3826_v46  ;;  %v4036_v62 = vld [vmem:[%s10032_s3 + $0x8d0] sm:$0xff]  ;;  %v4037_v0 = vld [vmem:[%s10032_s3 + $0x8d8] sm:$0xff]  ;;  %v8994_v46 = vrot.slane %v4296_v32, %v8516_v6 }
 0x2fb   :  { %6873 = vmatprep.subr.bf16.mxu0 %v6872_v61  ;;  %v3828_v50 = vld [vmem:[%s10032_s3 + $0x250] sm:$0xff]  ;;  %v3829_v2 = vld [vmem:[%s10032_s3 + $0x258] sm:$0xff]  ;;  %v6886_v44 = vpack.c.bf16 %v4019_v35, %v4018_v58  ;;  %v3846_v4 = vld [vmem:[%s10032_s3 + $0x2e0] sm:$0xff]  ;;  %v6888_v49 = vpack.c.bf16 %v4037_v0, %v4036_v62 }
 0x2fc   :  { %6683 = vmatpush3.bf16.msra.mxu1 %v6682_v14  ;;  %v3847_v5 = vld [vmem:[%s10032_s3 + $0x2e8] sm:$0xff]  ;;  %v4020_v61 = vld [vmem:[%s10032_s3 + $0x850] sm:$0xff]  ;;  %v4021_v11 = vld [vmem:[%s10032_s3 + $0x858] sm:$0xff]  ;;  %v6698_v13 = vpack.c.bf16 %v3829_v2, %v3828_v50 }
 0x2fd   :  { %6685 = vmatprep.subr.bf16.mxu1 %v6684_v16  ;;  %v4038_v14 = vld [vmem:[%s10032_s3 + $0x8e0] sm:$0xff]  ;;  %v4039_v9 = vld [vmem:[%s10032_s3 + $0x8e8] sm:$0xff]  ;;  %v6700_v56 = vpack.c.bf16 %v3847_v5, %v3846_v4  ;;  %v6890_v17 = vpack.c.bf16 %v4021_v11, %v4020_v61  ;;  %v3848_v18 = vld [vmem:[%s10032_s3 + $0x2f0] sm:$0xff] }
 0x2fe   :  { %6875 = vmatpush3.bf16.msra.mxu0 %v6874_v19  ;;  %v3830_v15 = vld [vmem:[%s10032_s3 + $0x260] sm:$0xff]  ;;  %v3831_v16 = vld [vmem:[%s10032_s3 + $0x268] sm:$0xff]  ;;  %v3849_v19 = vld [vmem:[%s10032_s3 + $0x2f8] sm:$0xff]  ;;  %v6892_v20 = vpack.c.bf16 %v4039_v9, %v4038_v14 }
 0x2ff   :  { %6877 = vmatprep.subr.bf16.mxu0 %v6876_v21  ;;  %v4022_v63 = vld [vmem:[%s10032_s3 + $0x860] sm:$0xff]  ;;  %v4023_v21 = vld [vmem:[%s10032_s3 + $0x868] sm:$0xff]  ;;  %v6702_v23 = vpack.c.bf16 %v3831_v16, %v3830_v15  ;;  %v4040_v22 = vld [vmem:[%s10032_s3 + $0x8f0] sm:$0xff]  ;;  %v6704_v25 = vpack.c.bf16 %v3849_v19, %v3848_v18 }
 0x300   :  { %6687 = vmatpush3.bf16.msra.mxu1 %v6686_v24  ;;  %v4041_v24 = vld [vmem:[%s10032_s3 + $0x8f8] sm:$0xff]  ;;  %v3832_v26 = vld [vmem:[%s10032_s3 + $0x270] sm:$0xff]  ;;  %v6894_v28 = vpack.c.bf16 %v4023_v21, %v4022_v63  ;;  %v3866_v29 = vld [vmem:[%s10032_s3 + $0x380] sm:$0xff] }
 0x301   :  { %6689 = vmatprep.subr.bf16.mxu1 %v6688_v27  ;;  %v3833_v27 = vld [vmem:[%s10032_s3 + $0x278] sm:$0xff]  ;;  %v6896_v33 = vpack.c.bf16 %v4041_v24, %v4040_v22  ;;  %v4091_v36 = vld [vmem:[%s10032_s3 + $0xa88] sm:$0xff]  ;;  %v3850_v42 = vld [vmem:[%s10032_s3 + $0x300] sm:$0xff] }
 0x302   :  { %6879 = vmatpush3.bf16.msra.mxu0 %v6878_v31  ;;  %v3867_v31 = vld [vmem:[%s10032_s3 + $0x388] sm:$0xff]  ;;  %v4025_v37 = vld [vmem:[%s10032_s3 + $0x878] sm:$0xff]  ;;  %v6706_v38 = vpack.c.bf16 %v3833_v27, %v3832_v26  ;;  %v4092_v62 = vld [vmem:[%s10032_s3 + $0xa90] sm:$0xff] }
 0x303   :  { %6881 = vmatprep.subr.bf16.mxu0 %v6880_v34  ;;  %v4024_v34 = vld [vmem:[%s10032_s3 + $0x870] sm:$0xff]  ;;  %v6708_v40 = vpack.c.bf16 %v3867_v31, %v3866_v29  ;;  %v3869_v55 = vld [vmem:[%s10032_s3 + $0x398] sm:$0xff]  ;;  %v4075_v58 = vld [vmem:[%s10032_s3 + $0xa08] sm:$0xff] }
 0x304   :  { %6691 = vmatpush3.bf16.msra.mxu1 %v6690_v39  ;;  %v4090_v39 = vld [vmem:[%s10032_s3 + $0xa80] sm:$0xff]  ;;  %v6898_v47 = vpack.c.bf16 %v4025_v37, %v4024_v34  ;;  %v4093_v0 = vld [vmem:[%s10032_s3 + $0xa98] sm:$0xff]  ;;  %v3852_v50 = vld [vmem:[%s10032_s3 + $0x310] sm:$0xff] }
 0x305   :  { %6693 = vmatprep.subr.bf16.mxu1 %v6692_v43  ;;  %v3851_v43 = vld [vmem:[%s10032_s3 + $0x308] sm:$0xff]  ;;  %v6932_v57 = vpack.c.bf16 %v4091_v36, %v4090_v39  ;;  %v3853_v2 = vld [vmem:[%s10032_s3 + $0x318] sm:$0xff]  ;;  %v3870_v4 = vld [vmem:[%s10032_s3 + $0x3a0] sm:$0xff] }
 0x306   :  { %6883 = vmatpush3.bf16.msra.mxu0 %v6882_v54  ;;  %v3868_v54 = vld [vmem:[%s10032_s3 + $0x390] sm:$0xff]  ;;  %v6710_v35 = vpack.c.bf16 %v3851_v43, %v3850_v42  ;;  %v3871_v5 = vld [vmem:[%s10032_s3 + $0x3a8] sm:$0xff]  ;;  %v4077_v11 = vld [vmem:[%s10032_s3 + $0xa18] sm:$0xff] }
 0x307   :  { %6885 = vmatprep.subr.bf16.mxu0 %v6884_v30  ;;  %v4074_v30 = vld [vmem:[%s10032_s3 + $0xa00] sm:$0xff]  ;;  %v4076_v61 = vld [vmem:[%s10032_s3 + $0xa10] sm:$0xff]  ;;  %v4095_v9 = vld [vmem:[%s10032_s3 + $0xaa8] sm:$0xff] }
 0x308   :  { %6695 = vmatpush3.bf16.msra.mxu1 %v6694_v59  ;;  %v9010_v59 = vrot.slane %v8661_v45, %v8516_v6  ;;  %v4312_v45 = vcombine.high %v8994_v46, %v8994_v46  ;;  %v3854_v15 = vld [vmem:[%s10032_s3 + $0x320] sm:$0xff]  ;;  %v3855_v16 = vld [vmem:[%s10032_s3 + $0x328] sm:$0xff]  ;;  %v3872_v18 = vld [vmem:[%s10032_s3 + $0x3b0] sm:$0xff] }
 0x309   :  { %6697 = vmatprep.subr.bf16.mxu1 %v6696_v1  ;;  %v6712_v1 = vpack.c.bf16 %v3869_v55, %v3868_v54  ;;  %v4079_v63 = vld [vmem:[%s10032_s3 + $0xa28] sm:$0xff]  ;;  %v6718_v21 = vpack.c.bf16 %v3855_v16, %v3854_v15  ;;  %v4097_v22 = vld [vmem:[%s10032_s3 + $0xab8] sm:$0xff]  ;;  %v4080_v32 = vld [vmem:[%s10032_s3 + $0xa30] sm:$0xff] }
 0x30a   :  { %6887 = vmatpush3.bf16.msra.mxu0 %v6886_v44  ;;  %v6934_v44 = vpack.c.bf16 %v4075_v58, %v4074_v30  ;;  %v4379_v14 = vcombine.high %v9010_v59, %v9010_v59  ;;  %v3857_v26 = vld [vmem:[%s10032_s3 + $0x338] sm:$0xff]  ;;  %v3875_v29 = vld [vmem:[%s10032_s3 + $0x3c8] sm:$0xff]  ;;  %v4098_v37 = vld [vmem:[%s10032_s3 + $0xac0] sm:$0xff] }
 0x30b   :  { %6889 = vmatprep.subr.bf16.mxu0 %v6888_v49  ;;  %v6936_v49 = vpack.c.bf16 %v4093_v0, %v4092_v62  ;;  %v3858_v36 = vld [vmem:[%s10032_s3 + $0x340] sm:$0xff]  ;;  %v3876_v43 = vld [vmem:[%s10032_s3 + $0x3d0] sm:$0xff]  ;;  %v3881_v15 = vld [vmem:[%s10032_s3 + $0x3f8] sm:$0xff] }
 0x30c   :  { %6699 = vmatpush3.bf16.msra.mxu1 %v6698_v13  ;;  %v6714_v13 = vpack.c.bf16 %v3853_v2, %v3852_v50  ;;  %v4082_v55 = vld [vmem:[%s10032_s3 + $0xa40] sm:$0xff]  ;;  %v4100_v58 = vld [vmem:[%s10032_s3 + $0xad0] sm:$0xff] }
 0x30d   :  { %6701 = vmatprep.subr.bf16.mxu1 %v6700_v56  ;;  %v6716_v56 = vpack.c.bf16 %v3871_v5, %v3870_v4  ;;  %v3860_v0 = vld [vmem:[%s10032_s3 + $0x350] sm:$0xff]  ;;  %v3878_v2 = vld [vmem:[%s10032_s3 + $0x3e0] sm:$0xff]  ;;  %v4085_v5 = vld [vmem:[%s10032_s3 + $0xa58] sm:$0xff] }
 0x30e   :  { %6891 = vmatpush3.bf16.msra.mxu0 %v6890_v17  ;;  %v6938_v17 = vpack.c.bf16 %v4077_v11, %v4076_v61  ;;  %v4084_v4 = vld [vmem:[%s10032_s3 + $0xa50] sm:$0xff]  ;;  %v4102_v61 = vld [vmem:[%s10032_s3 + $0xae0] sm:$0xff]  ;;  %v4103_v11 = vld [vmem:[%s10032_s3 + $0xae8] sm:$0xff] }
 0x30f   :  { %6893 = vmatprep.subr.bf16.mxu0 %v6892_v20  ;;  %v4078_v20 = vld [vmem:[%s10032_s3 + $0xa20] sm:$0xff]  ;;  %v6956_v16 = vpack.c.bf16 %v4103_v11, %v4102_v61  ;;  %v3919_v11 = vld [vmem:[%s10032_s3 + $0x528] sm:$0xff] }
 0x310   :  { %6703 = vmatpush3.bf16.msra.mxu1 %v6702_v23  ;;  %v4096_v23 = vld [vmem:[%s10032_s3 + $0xab0] sm:$0xff]  ;;  %v6942_v27 = vpack.c.bf16 %v4079_v63, %v4078_v20  ;;  %v4105_v20 = vld [vmem:[%s10032_s3 + $0xaf8] sm:$0xff]  ;;  %v3918_v61 = vld [vmem:[%s10032_s3 + $0x520] sm:$0xff] }
 0x311   :  { %6705 = vmatprep.subr.bf16.mxu1 %v6704_v25  ;;  %v3856_v25 = vld [vmem:[%s10032_s3 + $0x330] sm:$0xff]  ;;  %v6944_v31 = vpack.c.bf16 %v4097_v22, %v4096_v23  ;;  %v3865_v23 = vld [vmem:[%s10032_s3 + $0x378] sm:$0xff] }
 0x312   :  { %6895 = vmatpush3.bf16.msra.mxu0 %v6894_v28  ;;  %v3874_v28 = vld [vmem:[%s10032_s3 + $0x3c0] sm:$0xff]  ;;  %v6722_v34 = vpack.c.bf16 %v3857_v26, %v3856_v25  ;;  %v3931_v25 = vld [vmem:[%s10032_s3 + $0x588] sm:$0xff] }
 0x313   :  { %6897 = vmatprep.subr.bf16.mxu0 %v6896_v33  ;;  %v4081_v33 = vld [vmem:[%s10032_s3 + $0xa38] sm:$0xff]  ;;  %v6724_v39 = vpack.c.bf16 %v3875_v29, %v3874_v28 }
 0x314   :  { %6707 = vmatpush3.bf16.msra.mxu1 %v6706_v38  ;;  %v4099_v38 = vld [vmem:[%s10032_s3 + $0xac8] sm:$0xff]  ;;  %v6946_v42 = vpack.c.bf16 %v4081_v33, %v4080_v32  ;;  %v4089_v28 = vld [vmem:[%s10032_s3 + $0xa78] sm:$0xff] }
 0x315   :  { %6709 = vmatprep.subr.bf16.mxu1 %v6708_v40  ;;  %v3859_v40 = vld [vmem:[%s10032_s3 + $0x348] sm:$0xff]  ;;  %v6948_v54 = vpack.c.bf16 %v4099_v38, %v4098_v37 }
 0x316   :  { %6899 = vmatpush3.bf16.msra.mxu0 %v6898_v47  ;;  %v3877_v47 = vld [vmem:[%s10032_s3 + $0x3d8] sm:$0xff]  ;;  %v6726_v30 = vpack.c.bf16 %v3859_v40, %v3858_v36  ;;  %v4155_v32 = vld [vmem:[%s10032_s3 + $0xc88] sm:$0xff] }
 0x317   :  { %4652 = vmatmul.mubr.f32.vlgmr.msra.gmra.mrb[64].mxu1 %v8787_v53  ;;  %6933 = vmatprep.subr.bf16.mxu0 %v6932_v57  ;;  %v4094_v53 = vld [vmem:[%s10032_s3 + $0xaa0] sm:$0xff]  ;;  %v4083_v57 = vld [vmem:[%s10032_s3 + $0xa48] sm:$0xff]  ;;  %v6728_v62 = vpack.c.bf16 %v3877_v47, %v3876_v43  ;;  %v3933_v36 = vld [vmem:[%s10032_s3 + $0x598] sm:$0xff] }
 0x318   :  { %6711 = vmatpush3.bf16.msra.mxu1 %v6710_v35  ;;  %4721 = vmatprep.mubr.f32.mxu1 %v4312_v45  ;;  %v6940_v19 = vpack.c.bf16 %v4095_v9, %v4094_v53  ;;  %v4101_v35 = vld [vmem:[%s10032_s3 + $0xad8] sm:$0xff]  ;;  %v6950_v50 = vpack.c.bf16 %v4083_v57, %v4082_v55  ;;  %v3879_v45 = vld [vmem:[%s10032_s3 + $0x3e8] sm:$0xff]  ;;  %v6954_v9 = vpack.c.bf16 %v4085_v5, %v4084_v4  ;;  %v4156_v55 = vld [vmem:[%s10032_s3 + $0xc90] sm:$0xff] }
 0x319   :  { %6713 = vmatprep.subr.bf16.mxu1 %v6712_v1  ;;  %5072 = vmatmul.mubr.f32.vlgmr.msra.gmra.mrb[16].mxu0 %v8803_v41  ;;  %v3873_v41 = vld [vmem:[%s10032_s3 + $0x3b8] sm:$0xff]  ;;  %v3863_v53 = vld [vmem:[%s10032_s3 + $0x368] sm:$0xff] }
 0x31a   :  { %6935 = vmatpush3.bf16.msra.mxu0 %v6934_v44  ;;  %5211 = vmatprep.mubr.f32.mxu0 %v4379_v14  ;;  %v6720_v24 = vpack.c.bf16 %v3873_v41, %v3872_v18  ;;  %v3861_v1 = vld [vmem:[%s10032_s3 + $0x358] sm:$0xff]  ;;  %v6952_v44 = vpack.c.bf16 %v4101_v35, %v4100_v58  ;;  %v3862_v14 = vld [vmem:[%s10032_s3 + $0x360] sm:$0xff]  ;;  %v4087_v18 = vld [vmem:[%s10032_s3 + $0xa68] sm:$0xff] }
 0x31b   :  { %6937 = vmatprep.subr.bf16.mxu0 %v6936_v49  ;;  %v6730_v49 = vpack.c.bf16 %v3861_v1, %v3860_v0  ;;  %v6734_v41 = vpack.c.bf16 %v3863_v53, %v3862_v14  ;;  %v3915_v37 = vld [vmem:[%s10032_s3 + $0x508] sm:$0xff]  ;;  %v4157_v57 = vld [vmem:[%s10032_s3 + $0xc98] sm:$0xff]  ;;  %v3916_v58 = vld [vmem:[%s10032_s3 + $0x510] sm:$0xff] }
 0x31c   :  { %6715 = vmatpush3.bf16.msra.mxu1 %v6714_v13  ;;  %v6732_v13 = vpack.c.bf16 %v3879_v45, %v3878_v2  ;;  %v4139_v43 = vld [vmem:[%s10032_s3 + $0xc08] sm:$0xff]  ;;  %v3917_v35 = vld [vmem:[%s10032_s3 + $0x518] sm:$0xff]  ;;  %v3934_v0 = vld [vmem:[%s10032_s3 + $0x5a0] sm:$0xff] }
 0x31d   :  { %6717 = vmatprep.subr.bf16.mxu1 %v6716_v56  ;;  %v3880_v56 = vld [vmem:[%s10032_s3 + $0x3f0] sm:$0xff]  ;;  %v3935_v1 = vld [vmem:[%s10032_s3 + $0x5a8] sm:$0xff]  ;;  %v4141_v45 = vld [vmem:[%s10032_s3 + $0xc18] sm:$0xff] }
 0x31e   :  { %6939 = vmatpush3.bf16.msra.mxu0 %v6938_v17  ;;  %v4086_v17 = vld [vmem:[%s10032_s3 + $0xa60] sm:$0xff]  ;;  %v6736_v63 = vpack.c.bf16 %v3881_v15, %v3880_v56  ;;  %v4140_v2 = vld [vmem:[%s10032_s3 + $0xc10] sm:$0xff]  ;;  %v4159_v5 = vld [vmem:[%s10032_s3 + $0xca8] sm:$0xff]  ;;  %v6782_v15 = vpack.c.bf16 %v3919_v11, %v3918_v61 }
 0x31f   :  { %6941 = vmatprep.subr.bf16.mxu0 %v6940_v19  ;;  %v4104_v19 = vld [vmem:[%s10032_s3 + $0xaf0] sm:$0xff]  ;;  %v6958_v22 = vpack.c.bf16 %v4087_v18, %v4086_v17  ;;  %v4143_v56 = vld [vmem:[%s10032_s3 + $0xc28] sm:$0xff]  ;;  %v4161_v17 = vld [vmem:[%s10032_s3 + $0xcb8] sm:$0xff] }
 0x320   :  { %6719 = vmatpush3.bf16.msra.mxu1 %v6718_v21  ;;  %v3864_v21 = vld [vmem:[%s10032_s3 + $0x370] sm:$0xff]  ;;  %v6960_v26 = vpack.c.bf16 %v4105_v20, %v4104_v19  ;;  %v3921_v19 = vld [vmem:[%s10032_s3 + $0x538] sm:$0xff]  ;;  %v4150_v61 = vld [vmem:[%s10032_s3 + $0xc60] sm:$0xff] }
 0x321   :  { %6721 = vmatprep.subr.bf16.mxu1 %v6720_v24  ;;  %v3930_v24 = vld [vmem:[%s10032_s3 + $0x580] sm:$0xff]  ;;  %v6738_v29 = vpack.c.bf16 %v3865_v23, %v3864_v21  ;;  %v3936_v14 = vld [vmem:[%s10032_s3 + $0x5b0] sm:$0xff]  ;;  %v3939_v21 = vld [vmem:[%s10032_s3 + $0x5c8] sm:$0xff] }
 0x322   :  { %6943 = vmatpush3.bf16.msra.mxu0 %v6942_v27  ;;  %v4088_v27 = vld [vmem:[%s10032_s3 + $0xa70] sm:$0xff]  ;;  %v6772_v33 = vpack.c.bf16 %v3931_v25, %v3930_v24  ;;  %v4145_v24 = vld [vmem:[%s10032_s3 + $0xc38] sm:$0xff]  ;;  %v4151_v11 = vld [vmem:[%s10032_s3 + $0xc68] sm:$0xff] }
 0x323   :  { %6945 = vmatprep.subr.bf16.mxu0 %v6944_v31  ;;  %v4154_v31 = vld [vmem:[%s10032_s3 + $0xc80] sm:$0xff]  ;;  %v6962_v38 = vpack.c.bf16 %v4089_v28, %v4088_v27  ;;  %v4163_v27 = vld [vmem:[%s10032_s3 + $0xcc8] sm:$0xff] }
 0x324   :  { %6723 = vmatpush3.bf16.msra.mxu1 %v6722_v34  ;;  %v3914_v34 = vld [vmem:[%s10032_s3 + $0x500] sm:$0xff]  ;;  %v6996_v40 = vpack.c.bf16 %v4155_v32, %v4154_v31  ;;  %v3923_v31 = vld [vmem:[%s10032_s3 + $0x548] sm:$0xff] }
 0x325   :  { %6725 = vmatprep.subr.bf16.mxu1 %v6724_v39  ;;  %v3932_v39 = vld [vmem:[%s10032_s3 + $0x590] sm:$0xff]  ;;  %v6774_v47 = vpack.c.bf16 %v3915_v37, %v3914_v34  ;;  %v3941_v34 = vld [vmem:[%s10032_s3 + $0x5d8] sm:$0xff] }
 0x326   :  { %6947 = vmatpush3.bf16.msra.mxu0 %v6946_v42  ;;  %v4138_v42 = vld [vmem:[%s10032_s3 + $0xc00] sm:$0xff] }
 0x327   :  { %6949 = vmatprep.subr.bf16.mxu0 %v6948_v54  ;;  %v9212_v54 = vrot.slane %v8666_v48, %v8516_v6  ;;  %v4329_v48 = vcombine.high %v8598_v10, %v8598_v10 }
 0x328   :  { %6727 = vmatpush3.bf16.msra.mxu1 %v6726_v30  ;;  %v6776_v30 = vpack.c.bf16 %v3933_v36, %v3932_v39  ;;  %v4147_v39 = vld [vmem:[%s10032_s3 + $0xc48] sm:$0xff] }
 0x329   :  { %6729 = vmatprep.subr.bf16.mxu1 %v6728_v62  ;;  %v6998_v62 = vpack.c.bf16 %v4139_v43, %v4138_v42  ;;  %v4396_v4 = vcombine.high %v9212_v54, %v9212_v54  ;;  %v4165_v42 = vld [vmem:[%s10032_s3 + $0xcd8] sm:$0xff] }
 0x32a   :  { %6951 = vmatpush3.bf16.msra.mxu0 %v6950_v50  ;;  %v7000_v50 = vpack.c.bf16 %v4157_v57, %v4156_v55  ;;  %v3925_v55 = vld [vmem:[%s10032_s3 + $0x558] sm:$0xff] }
 0x32b   :  { %6953 = vmatprep.subr.bf16.mxu0 %v6952_v44  ;;  %v6778_v44 = vpack.c.bf16 %v3917_v35, %v3916_v58  ;;  %v3943_v58 = vld [vmem:[%s10032_s3 + $0x5e8] sm:$0xff] }
 0x32c   :  { %6731 = vmatpush3.bf16.msra.mxu1 %v6730_v49  ;;  %v6780_v49 = vpack.c.bf16 %v3935_v1, %v3934_v0  ;;  %v4166_v1 = vld [vmem:[%s10032_s3 + $0xce0] sm:$0xff] }
 0x32d   :  { %6733 = vmatprep.subr.bf16.mxu1 %v6732_v13  ;;  %v7002_v13 = vpack.c.bf16 %v4141_v45, %v4140_v2  ;;  %v3926_v45 = vld [vmem:[%s10032_s3 + $0x560] sm:$0xff] }
 0x32e   :  { %6955 = vmatpush3.bf16.msra.mxu0 %v6954_v9  ;;  %v4142_v9 = vld [vmem:[%s10032_s3 + $0xc20] sm:$0xff] }
 0x32f   :  { %6957 = vmatprep.subr.bf16.mxu0 %v6956_v16  ;;  %v4160_v16 = vld [vmem:[%s10032_s3 + $0xcb0] sm:$0xff]  ;;  %v7006_v20 = vpack.c.bf16 %v4143_v56, %v4142_v9  ;;  %v3929_v56 = vld [vmem:[%s10032_s3 + $0x578] sm:$0xff] }
 0x330   :  { %6735 = vmatpush3.bf16.msra.mxu1 %v6734_v41  ;;  %v3920_v41 = vld [vmem:[%s10032_s3 + $0x530] sm:$0xff]  ;;  %v7008_v23 = vpack.c.bf16 %v4161_v17, %v4160_v16  ;;  %v3994_v16 = vld [vmem:[%s10032_s3 + $0x780] sm:$0xff]  ;;  %v3995_v17 = vld [vmem:[%s10032_s3 + $0x788] sm:$0xff] }
 0x331   :  { %6737 = vmatprep.subr.bf16.mxu1 %v6736_v63  ;;  %v3938_v63 = vld [vmem:[%s10032_s3 + $0x5c0] sm:$0xff]  ;;  %v6786_v25 = vpack.c.bf16 %v3921_v19, %v3920_v41  ;;  %v3928_v9 = vld [vmem:[%s10032_s3 + $0x570] sm:$0xff]  ;;  %v4153_v19 = vld [vmem:[%s10032_s3 + $0xc78] sm:$0xff] }
 0x332   :  { %6959 = vmatpush3.bf16.msra.mxu0 %v6958_v22  ;;  %v4144_v22 = vld [vmem:[%s10032_s3 + $0xc30] sm:$0xff]  ;;  %v6788_v28 = vpack.c.bf16 %v3939_v21, %v3938_v63  ;;  %v4218_v63 = vld [vmem:[%s10032_s3 + $0xe80] sm:$0xff]  ;;  %v4219_v21 = vld [vmem:[%s10032_s3 + $0xe88] sm:$0xff] }
 0x333   :  { %6961 = vmatprep.subr.bf16.mxu0 %v6960_v26  ;;  %v4162_v26 = vld [vmem:[%s10032_s3 + $0xcc0] sm:$0xff]  ;;  %v7010_v32 = vpack.c.bf16 %v4145_v24, %v4144_v22  ;;  %v4152_v41 = vld [vmem:[%s10032_s3 + $0xc70] sm:$0xff]  ;;  %v3979_v24 = vld [vmem:[%s10032_s3 + $0x708] sm:$0xff] }
 0x334   :  { %6739 = vmatpush3.bf16.msra.mxu1 %v6738_v29  ;;  %v3922_v29 = vld [vmem:[%s10032_s3 + $0x540] sm:$0xff]  ;;  %v7012_v37 = vpack.c.bf16 %v4163_v27, %v4162_v26  ;;  %v3996_v26 = vld [vmem:[%s10032_s3 + $0x790] sm:$0xff]  ;;  %v3997_v27 = vld [vmem:[%s10032_s3 + $0x798] sm:$0xff] }
 0x335   :  { %6773 = vmatprep.subr.bf16.mxu1 %v6772_v33  ;;  %v3940_v33 = vld [vmem:[%s10032_s3 + $0x5d0] sm:$0xff]  ;;  %v6790_v36 = vpack.c.bf16 %v3923_v31, %v3922_v29  ;;  %v3978_v22 = vld [vmem:[%s10032_s3 + $0x700] sm:$0xff]  ;;  %v4203_v31 = vld [vmem:[%s10032_s3 + $0xe08] sm:$0xff] }
 0x336   :  { %6963 = vmatpush3.bf16.msra.mxu0 %v6962_v38  ;;  %v4146_v38 = vld [vmem:[%s10032_s3 + $0xc40] sm:$0xff]  ;;  %v6792_v43 = vpack.c.bf16 %v3941_v34, %v3940_v33  ;;  %v9414_v33 = vrot.slane %v8671_v52, %v8516_v6  ;;  %v4220_v34 = vld [vmem:[%s10032_s3 + $0xe90] sm:$0xff]  ;;  %v4346_v6 = vcombine.high %v8669_v51, %v8669_v51 }
 0x337   :  { %4722 = vmatmul.mubr.f32.vlgmr.msra.gmra.mrb[66].mxu1 %v8994_v46  ;;  %6997 = vmatprep.subr.bf16.mxu0 %v6996_v40  ;;  %v4158_v46 = vld [vmem:[%s10032_s3 + $0xca0] sm:$0xff]  ;;  %v4164_v40 = vld [vmem:[%s10032_s3 + $0xcd0] sm:$0xff]  ;;  %v7014_v57 = vpack.c.bf16 %v4147_v39, %v4146_v38  ;;  %v6840_v38 = vpack.c.bf16 %v3997_v27, %v3996_v26  ;;  %v4229_v26 = vld [vmem:[%s10032_s3 + $0xed8] sm:$0xff] }
 0x338   :  { %6775 = vmatpush3.bf16.msra.mxu1 %v6774_v47  ;;  %4861 = vmatprep.mubr.f32.mxu1 %v4329_v48  ;;  %v7004_v53 = vpack.c.bf16 %v4159_v5, %v4158_v46  ;;  %v3924_v47 = vld [vmem:[%s10032_s3 + $0x550] sm:$0xff]  ;;  %v7016_v35 = vpack.c.bf16 %v4165_v42, %v4164_v40  ;;  %v3945_v5 = vld [vmem:[%s10032_s3 + $0x5f8] sm:$0xff]  ;;  %v4202_v29 = vld [vmem:[%s10032_s3 + $0xe00] sm:$0xff] }
 0x339   :  { %6777 = vmatprep.subr.bf16.mxu1 %v6776_v30  ;;  %5212 = vmatmul.mubr.f32.vlgmr.msra.gmra.mrb[18].mxu0 %v9010_v59  ;;  %v3937_v59 = vld [vmem:[%s10032_s3 + $0x5b8] sm:$0xff]  ;;  %v3942_v30 = vld [vmem:[%s10032_s3 + $0x5e0] sm:$0xff]  ;;  %v4148_v48 = vld [vmem:[%s10032_s3 + $0xc50] sm:$0xff]  ;;  %v6794_v0 = vpack.c.bf16 %v3925_v55, %v3924_v47  ;;  %v7062_v52 = vpack.c.bf16 %v4203_v31, %v4202_v29 }
 0x33a   :  { %6999 = vmatpush3.bf16.msra.mxu0 %v6998_v62  ;;  %5351 = vmatprep.mubr.f32.mxu0 %v4396_v4  ;;  %v6784_v18 = vpack.c.bf16 %v3937_v59, %v3936_v14  ;;  %v4149_v62 = vld [vmem:[%s10032_s3 + $0xc58] sm:$0xff]  ;;  %v6796_v2 = vpack.c.bf16 %v3943_v58, %v3942_v30  ;;  %v3944_v46 = vld [vmem:[%s10032_s3 + $0x5f0] sm:$0xff]  ;;  %v3998_v40 = vld [vmem:[%s10032_s3 + $0x7a0] sm:$0xff]  ;;  %v4413_v30 = vcombine.high %v9414_v33, %v9414_v33 }
 0x33b   :  { %7001 = vmatprep.subr.bf16.mxu0 %v7000_v50  ;;  %v4167_v50 = vld [vmem:[%s10032_s3 + $0xce8] sm:$0xff]  ;;  %v7018_v4 = vpack.c.bf16 %v4149_v62, %v4148_v48  ;;  %v4168_v14 = vld [vmem:[%s10032_s3 + $0xcf0] sm:$0xff]  ;;  %v4169_v59 = vld [vmem:[%s10032_s3 + $0xcf8] sm:$0xff] }
 0x33c   :  { %6779 = vmatpush3.bf16.msra.mxu1 %v6778_v44  ;;  %v3927_v44 = vld [vmem:[%s10032_s3 + $0x568] sm:$0xff]  ;;  %v3980_v39 = vld [vmem:[%s10032_s3 + $0x710] sm:$0xff]  ;;  %v4205_v55 = vld [vmem:[%s10032_s3 + $0xe18] sm:$0xff] }
 0x33d   :  { %6781 = vmatprep.subr.bf16.mxu1 %v6780_v49  ;;  %v7020_v49 = vpack.c.bf16 %v4167_v50, %v4166_v1  ;;  %v3999_v42 = vld [vmem:[%s10032_s3 + $0x7a8] sm:$0xff]  ;;  %v4204_v47 = vld [vmem:[%s10032_s3 + $0xe10] sm:$0xff]  ;;  %v3982_v48 = vld [vmem:[%s10032_s3 + $0x720] sm:$0xff] }
 0x33e   :  { %7003 = vmatpush3.bf16.msra.mxu0 %v7002_v13  ;;  %v6798_v13 = vpack.c.bf16 %v3927_v44, %v3926_v45  ;;  %v4223_v58 = vld [vmem:[%s10032_s3 + $0xea8] sm:$0xff]  ;;  %v4000_v1 = vld [vmem:[%s10032_s3 + $0x7b0] sm:$0xff]  ;;  %v3989_v29 = vld [vmem:[%s10032_s3 + $0x758] sm:$0xff] }
 0x33f   :  { %7005 = vmatprep.subr.bf16.mxu0 %v7004_v53  ;;  %v6800_v53 = vpack.c.bf16 %v3945_v5, %v3944_v46  ;;  %v3983_v62 = vld [vmem:[%s10032_s3 + $0x728] sm:$0xff]  ;;  %v4225_v46 = vld [vmem:[%s10032_s3 + $0xeb8] sm:$0xff] }
 0x340   :  { %6783 = vmatpush3.bf16.msra.mxu1 %v6782_v15  ;;  %v7022_v15 = vpack.c.bf16 %v4151_v11, %v4150_v61  ;;  %v4207_v45 = vld [vmem:[%s10032_s3 + $0xe28] sm:$0xff]  ;;  %v6846_v44 = vpack.c.bf16 %v3983_v62, %v3982_v48  ;;  %v3985_v61 = vld [vmem:[%s10032_s3 + $0x738] sm:$0xff]  ;;  %v4232_v48 = vld [vmem:[%s10032_s3 + $0xef0] sm:$0xff] }
 0x341   :  { %6785 = vmatprep.subr.bf16.mxu1 %v6784_v18  ;;  %v7024_v18 = vpack.c.bf16 %v4169_v59, %v4168_v14  ;;  %v4003_v14 = vld [vmem:[%s10032_s3 + $0x7c8] sm:$0xff]  ;;  %v4233_v62 = vld [vmem:[%s10032_s3 + $0xef8] sm:$0xff] }
 0x342   :  { %7007 = vmatpush3.bf16.msra.mxu0 %v7006_v20  ;;  %v6802_v20 = vpack.c.bf16 %v3929_v56, %v3928_v9  ;;  %v4209_v9 = vld [vmem:[%s10032_s3 + $0xe38] sm:$0xff] }
 0x343   :  { %7009 = vmatprep.subr.bf16.mxu0 %v7008_v23  ;;  %v6836_v23 = vpack.c.bf16 %v3995_v17, %v3994_v16  ;;  %v4227_v16 = vld [vmem:[%s10032_s3 + $0xec8] sm:$0xff] }
 0x344   :  { %6787 = vmatpush3.bf16.msra.mxu1 %v6786_v25  ;;  %v7026_v25 = vpack.c.bf16 %v4153_v19, %v4152_v41  ;;  %v3987_v41 = vld [vmem:[%s10032_s3 + $0x748] sm:$0xff] }
 0x345   :  { %6789 = vmatprep.subr.bf16.mxu1 %v6788_v28  ;;  %v7060_v28 = vpack.c.bf16 %v4219_v21, %v4218_v63  ;;  %v4005_v63 = vld [vmem:[%s10032_s3 + $0x7d8] sm:$0xff] }
 0x346   :  { %7011 = vmatpush3.bf16.msra.mxu0 %v7010_v32  ;;  %v6838_v32 = vpack.c.bf16 %v3979_v24, %v3978_v22  ;;  %v4211_v22 = vld [vmem:[%s10032_s3 + $0xe48] sm:$0xff] }
 0x347   :  { %7013 = vmatprep.subr.bf16.mxu0 %v7012_v37  ;;  %v4221_v37 = vld [vmem:[%s10032_s3 + $0xe98] sm:$0xff] }
 0x348   :  { %6791 = vmatpush3.bf16.msra.mxu1 %v6790_v36  ;;  %v3981_v36 = vld [vmem:[%s10032_s3 + $0x718] sm:$0xff] }
 0x349   :  { %6793 = vmatprep.subr.bf16.mxu1 %v6792_v43  ;;  %v7064_v43 = vpack.c.bf16 %v4221_v37, %v4220_v34  ;;  %v4007_v34 = vld [vmem:[%s10032_s3 + $0x7e8] sm:$0xff] }
 0x34a   :  { %7015 = vmatpush3.bf16.msra.mxu0 %v7014_v57  ;;  %v6842_v57 = vpack.c.bf16 %v3981_v36, %v3980_v39  ;;  %v4213_v39 = vld [vmem:[%s10032_s3 + $0xe58] sm:$0xff] }
 0x34b   :  { %7017 = vmatprep.subr.bf16.mxu0 %v7016_v35  ;;  %v6844_v35 = vpack.c.bf16 %v3999_v42, %v3998_v40  ;;  %v3990_v42 = vld [vmem:[%s10032_s3 + $0x760] sm:$0xff] }
 0x34c   :  { %6795 = vmatpush3.bf16.msra.mxu1 %v6794_v0  ;;  %v7066_v0 = vpack.c.bf16 %v4205_v55, %v4204_v47  ;;  %v4008_v55 = vld [vmem:[%s10032_s3 + $0x7f0] sm:$0xff] }
 0x34d   :  { %6797 = vmatprep.subr.bf16.mxu1 %v6796_v2  ;;  %v4206_v2 = vld [vmem:[%s10032_s3 + $0xe20] sm:$0xff] }
 0x34e   :  { %7019 = vmatpush3.bf16.msra.mxu0 %v7018_v4  ;;  %v4224_v4 = vld [vmem:[%s10032_s3 + $0xeb0] sm:$0xff]  ;;  %v7070_v11 = vpack.c.bf16 %v4207_v45, %v4206_v2  ;;  %v4058_v2 = vld [vmem:[%s10032_s3 + $0x980] sm:$0xff]  ;;  %v4059_v45 = vld [vmem:[%s10032_s3 + $0x988] sm:$0xff] }
 0x34f   :  { %7021 = vmatprep.subr.bf16.mxu0 %v7020_v49  ;;  %v3984_v49 = vld [vmem:[%s10032_s3 + $0x730] sm:$0xff]  ;;  %v7072_v59 = vpack.c.bf16 %v4225_v46, %v4224_v4  ;;  %v4217_v46 = vld [vmem:[%s10032_s3 + $0xe78] sm:$0xff] }
 0x350   :  { %6799 = vmatpush3.bf16.msra.mxu1 %v6798_v13  ;;  %v4002_v13 = vld [vmem:[%s10032_s3 + $0x7c0] sm:$0xff]  ;;  %v6850_v56 = vpack.c.bf16 %v3985_v61, %v3984_v49  ;;  %v4216_v4 = vld [vmem:[%s10032_s3 + $0xe70] sm:$0xff]  ;;  %v6900_v49 = vpack.c.bf16 %v4059_v45, %v4058_v2  ;;  %v4125_v45 = vld [vmem:[%s10032_s3 + $0xb98] sm:$0xff] }
 0x351   :  { %6801 = vmatprep.subr.bf16.mxu1 %v6800_v53  ;;  %v4208_v53 = vld [vmem:[%s10032_s3 + $0xe30] sm:$0xff]  ;;  %v6852_v17 = vpack.c.bf16 %v4003_v14, %v4002_v13  ;;  %v4042_v61 = vld [vmem:[%s10032_s3 + $0x900] sm:$0xff]  ;;  %v7090_v13 = vpack.c.bf16 %v4217_v46, %v4216_v4 }
 0x352   :  { %7023 = vmatpush3.bf16.msra.mxu0 %v7022_v15  ;;  %v4226_v15 = vld [vmem:[%s10032_s3 + $0xec0] sm:$0xff]  ;;  %v7074_v19 = vpack.c.bf16 %v4209_v9, %v4208_v53  ;;  %v4060_v14 = vld [vmem:[%s10032_s3 + $0x990] sm:$0xff] }
 0x353   :  { %7025 = vmatprep.subr.bf16.mxu0 %v7024_v18  ;;  %v3986_v18 = vld [vmem:[%s10032_s3 + $0x740] sm:$0xff]  ;;  %v7076_v21 = vpack.c.bf16 %v4227_v16, %v4226_v15  ;;  %v4045_v15 = vld [vmem:[%s10032_s3 + $0x918] sm:$0xff]  ;;  %v4363_v16 = vcombine.high %v8706_v7, %v8706_v7  ;;  %v4124_v2 = vld [vmem:[%s10032_s3 + $0xb90] sm:$0xff] }
 0x354   :  { %6803 = vmatpush3.bf16.msra.mxu1 %v6802_v20  ;;  %v4004_v20 = vld [vmem:[%s10032_s3 + $0x7d0] sm:$0xff]  ;;  %v6854_v24 = vpack.c.bf16 %v3987_v41, %v3986_v18  ;;  %v4063_v18 = vld [vmem:[%s10032_s3 + $0x9a8] sm:$0xff]  ;;  %v6968_v4 = vpack.c.bf16 %v4125_v45, %v4124_v2  ;;  %v4173_v2 = vld [vmem:[%s10032_s3 + $0xd18] sm:$0xff]  ;;  %v4397_v45 = vcombine.high %v8718_v12, %v8718_v12 }
 0x355   :  { %6837 = vmatprep.subr.bf16.mxu1 %v6836_v23  ;;  %v4210_v23 = vld [vmem:[%s10032_s3 + $0xe40] sm:$0xff]  ;;  %v6856_v27 = vpack.c.bf16 %v4005_v63, %v4004_v20  ;;  %v4047_v63 = vld [vmem:[%s10032_s3 + $0x928] sm:$0xff]  ;;  %v4108_v46 = vld [vmem:[%s10032_s3 + $0xb10] sm:$0xff] }
 0x356   :  { %7027 = vmatpush3.bf16.msra.mxu0 %v7026_v25  ;;  %v4228_v25 = vld [vmem:[%s10032_s3 + $0xed0] sm:$0xff]  ;;  %v7078_v31 = vpack.c.bf16 %v4211_v22, %v4210_v23  ;;  %v4046_v20 = vld [vmem:[%s10032_s3 + $0x920] sm:$0xff] }
 0x357   :  { %4862 = vmatmul.mubr.f32.vlgmr.msra.gmra.mrb[68].mxu1 %v8598_v10  ;;  %7061 = vmatprep.subr.bf16.mxu0 %v7060_v28  ;;  %v4222_v10 = vld [vmem:[%s10032_s3 + $0xea0] sm:$0xff]  ;;  %v3988_v28 = vld [vmem:[%s10032_s3 + $0x750] sm:$0xff]  ;;  %v7080_v37 = vpack.c.bf16 %v4229_v26, %v4228_v25  ;;  %v6910_v23 = vpack.c.bf16 %v4047_v63, %v4046_v20  ;;  %v4067_v26 = vld [vmem:[%s10032_s3 + $0x9c8] sm:$0xff] }
 0x358   :  { %6839 = vmatpush3.bf16.msra.mxu1 %v6838_v32  ;;  %5001 = vmatprep.mubr.f32.mxu1 %v4346_v6  ;;  %v7068_v50 = vpack.c.bf16 %v4223_v58, %v4222_v10  ;;  %v4006_v32 = vld [vmem:[%s10032_s3 + $0x7e0] sm:$0xff]  ;;  %v6858_v36 = vpack.c.bf16 %v3989_v29, %v3988_v28  ;;  %v4215_v58 = vld [vmem:[%s10032_s3 + $0xe68] sm:$0xff]  ;;  %v4048_v22 = vld [vmem:[%s10032_s3 + $0x930] sm:$0xff] }
 0x359   :  { %6841 = vmatprep.subr.bf16.mxu1 %v6840_v38  ;;  %5352 = vmatmul.mubr.f32.vlgmr.msra.gmra.mrb[20].mxu0 %v9212_v54  ;;  %v4001_v54 = vld [vmem:[%s10032_s3 + $0x7b8] sm:$0xff]  ;;  %v4212_v38 = vld [vmem:[%s10032_s3 + $0xe50] sm:$0xff]  ;;  %v4230_v6 = vld [vmem:[%s10032_s3 + $0xee0] sm:$0xff]  ;;  %v6860_v40 = vpack.c.bf16 %v4007_v34, %v4006_v32 }
 0x35a   :  { %7063 = vmatpush3.bf16.msra.mxu0 %v7062_v52  ;;  %5491 = vmatprep.mubr.f32.mxu0 %v4413_v30  ;;  %v6848_v5 = vpack.c.bf16 %v4001_v54, %v4000_v1  ;;  %v4231_v52 = vld [vmem:[%s10032_s3 + $0xee8] sm:$0xff]  ;;  %v7082_v47 = vpack.c.bf16 %v4213_v39, %v4212_v38  ;;  %v4214_v10 = vld [vmem:[%s10032_s3 + $0xe60] sm:$0xff]  ;;  %v3992_v1 = vld [vmem:[%s10032_s3 + $0x770] sm:$0xff] }
 0x35b   :  { %7065 = vmatprep.subr.bf16.mxu0 %v7064_v43  ;;  %v3991_v43 = vld [vmem:[%s10032_s3 + $0x768] sm:$0xff]  ;;  %v7084_v30 = vpack.c.bf16 %v4231_v52, %v4230_v6  ;;  %v3993_v54 = vld [vmem:[%s10032_s3 + $0x778] sm:$0xff]  ;;  %v4066_v25 = vld [vmem:[%s10032_s3 + $0x9c0] sm:$0xff] }
 0x35c   :  { %6843 = vmatpush3.bf16.msra.mxu1 %v6842_v57  ;;  %v4009_v57 = vld [vmem:[%s10032_s3 + $0x7f8] sm:$0xff]  ;;  %v6916_v28 = vpack.c.bf16 %v4067_v26, %v4066_v25  ;;  %v4050_v29 = vld [vmem:[%s10032_s3 + $0x940] sm:$0xff]  ;;  %v4068_v32 = vld [vmem:[%s10032_s3 + $0x9d0] sm:$0xff] }
 0x35d   :  { %6845 = vmatprep.subr.bf16.mxu1 %v6844_v35  ;;  %v6862_v35 = vpack.c.bf16 %v3991_v43, %v3990_v42  ;;  %v4069_v34 = vld [vmem:[%s10032_s3 + $0x9d8] sm:$0xff]  ;;  %v4052_v39 = vld [vmem:[%s10032_s3 + $0x950] sm:$0xff]  ;;  %v4070_v6 = vld [vmem:[%s10032_s3 + $0x9e0] sm:$0xff] }
 0x35e   :  { %7067 = vmatpush3.bf16.msra.mxu0 %v7066_v0  ;;  %v6864_v0 = vpack.c.bf16 %v4009_v57, %v4008_v55  ;;  %v6920_v38 = vpack.c.bf16 %v4069_v34, %v4068_v32  ;;  %v4071_v52 = vld [vmem:[%s10032_s3 + $0x9e8] sm:$0xff]  ;;  %v4054_v43 = vld [vmem:[%s10032_s3 + $0x960] sm:$0xff]  ;;  %v4072_v55 = vld [vmem:[%s10032_s3 + $0x9f0] sm:$0xff] }
 0x35f   :  { %7069 = vmatprep.subr.bf16.mxu0 %v7068_v50  ;;  %v7086_v50 = vpack.c.bf16 %v4215_v58, %v4214_v10  ;;  %v6924_v42 = vpack.c.bf16 %v4071_v52, %v4070_v6  ;;  %v4073_v57 = vld [vmem:[%s10032_s3 + $0x9f8] sm:$0xff]  ;;  %v4056_v58 = vld [vmem:[%s10032_s3 + $0x970] sm:$0xff]  ;;  %v4114_v63 = vld [vmem:[%s10032_s3 + $0xb40] sm:$0xff] }
 0x360   :  { %6847 = vmatpush3.bf16.msra.mxu1 %v6846_v44  ;;  %v7088_v44 = vpack.c.bf16 %v4233_v62, %v4232_v48  ;;  %v6928_v10 = vpack.c.bf16 %v4073_v57, %v4072_v55  ;;  %v4122_v48 = vld [vmem:[%s10032_s3 + $0xb80] sm:$0xff]  ;;  %v4123_v62 = vld [vmem:[%s10032_s3 + $0xb88] sm:$0xff]  ;;  %v4117_v25 = vld [vmem:[%s10032_s3 + $0xb58] sm:$0xff] }
 0x361   :  { %6849 = vmatprep.subr.bf16.mxu1 %v6848_v5  ;;  %v6866_v5 = vpack.c.bf16 %v3993_v54, %v3992_v1  ;;  %v6964_v1 = vpack.c.bf16 %v4123_v62, %v4122_v48  ;;  %v4106_v54 = vld [vmem:[%s10032_s3 + $0xb00] sm:$0xff]  ;;  %v4119_v32 = vld [vmem:[%s10032_s3 + $0xb68] sm:$0xff]  ;;  %v4188_v62 = vld [vmem:[%s10032_s3 + $0xd90] sm:$0xff] }
 0x362   :  { %7071 = vmatpush3.bf16.msra.mxu0 %v7070_v11  ;;  %v4043_v11 = vld [vmem:[%s10032_s3 + $0x908] sm:$0xff]  ;;  %v4134_v26 = vld [vmem:[%s10032_s3 + $0xbe0] sm:$0xff] }
 0x363   :  { %7073 = vmatprep.subr.bf16.mxu0 %v7072_v59  ;;  %v4061_v59 = vld [vmem:[%s10032_s3 + $0x998] sm:$0xff]  ;;  %v6902_v53 = vpack.c.bf16 %v4043_v11, %v4042_v61  ;;  %v4126_v61 = vld [vmem:[%s10032_s3 + $0xba0] sm:$0xff]  ;;  %v4127_v11 = vld [vmem:[%s10032_s3 + $0xba8] sm:$0xff] }
 0x364   :  { %6851 = vmatpush3.bf16.msra.mxu1 %v6850_v56  ;;  %v6904_v9 = vpack.c.bf16 %v4061_v59, %v4060_v14  ;;  %v4044_v56 = vld [vmem:[%s10032_s3 + $0x910] sm:$0xff]  ;;  %v6972_v14 = vpack.c.bf16 %v4127_v11, %v4126_v61  ;;  %v4110_v59 = vld [vmem:[%s10032_s3 + $0xb20] sm:$0xff]  ;;  %v4171_v48 = vld [vmem:[%s10032_s3 + $0xd08] sm:$0xff] }
 0x365   :  { %6853 = vmatprep.subr.bf16.mxu1 %v6852_v17  ;;  %v4062_v17 = vld [vmem:[%s10032_s3 + $0x9a0] sm:$0xff]  ;;  %v6906_v41 = vpack.c.bf16 %v4045_v15, %v4044_v56  ;;  %v4175_v61 = vld [vmem:[%s10032_s3 + $0xd28] sm:$0xff]  ;;  %v4192_v11 = vld [vmem:[%s10032_s3 + $0xdb0] sm:$0xff] }
 0x366   :  { %7075 = vmatpush3.bf16.msra.mxu0 %v7074_v19  ;;  %v6908_v19 = vpack.c.bf16 %v4063_v18, %v4062_v17  ;;  %v4113_v17 = vld [vmem:[%s10032_s3 + $0xb38] sm:$0xff]  ;;  %v4130_v18 = vld [vmem:[%s10032_s3 + $0xbc0] sm:$0xff] }
 0x367   :  { %7077 = vmatprep.subr.bf16.mxu0 %v7076_v21  ;;  %v4064_v21 = vld [vmem:[%s10032_s3 + $0x9b0] sm:$0xff]  ;;  %v4186_v57 = vld [vmem:[%s10032_s3 + $0xd80] sm:$0xff] }
 0x368   :  { %6855 = vmatpush3.bf16.msra.mxu1 %v6854_v24  ;;  %v4049_v24 = vld [vmem:[%s10032_s3 + $0x938] sm:$0xff] }
 0x369   :  { %6857 = vmatprep.subr.bf16.mxu1 %v6856_v27  ;;  %v6914_v27 = vpack.c.bf16 %v4049_v24, %v4048_v22  ;;  %v4116_v24 = vld [vmem:[%s10032_s3 + $0xb50] sm:$0xff] }
 0x36a   :  { %7079 = vmatpush3.bf16.msra.mxu0 %v7078_v31  ;;  %v4051_v31 = vld [vmem:[%s10032_s3 + $0x948] sm:$0xff] }
 0x36b   :  { %7081 = vmatprep.subr.bf16.mxu0 %v7080_v37  ;;  %v6918_v37 = vpack.c.bf16 %v4051_v31, %v4050_v29  ;;  %v4118_v31 = vld [vmem:[%s10032_s3 + $0xb60] sm:$0xff] }
 0x36c   :  { %6859 = vmatpush3.bf16.msra.mxu1 %v6858_v36  ;;  %v4053_v36 = vld [vmem:[%s10032_s3 + $0x958] sm:$0xff]  ;;  %v6990_v52 = vpack.c.bf16 %v4119_v32, %v4118_v31 }
 0x36d   :  { %6861 = vmatprep.subr.bf16.mxu1 %v6860_v40  ;;  %v6922_v40 = vpack.c.bf16 %v4053_v36, %v4052_v39 }
 0x36e   :  { %7083 = vmatpush3.bf16.msra.mxu0 %v7082_v47  ;;  %v4055_v47 = vld [vmem:[%s10032_s3 + $0x968] sm:$0xff] }
 0x36f   :  { %7085 = vmatprep.subr.bf16.mxu0 %v7084_v30  ;;  %v6926_v30 = vpack.c.bf16 %v4055_v47, %v4054_v43  ;;  %v4120_v43 = vld [vmem:[%s10032_s3 + $0xb70] sm:$0xff]  ;;  %v4121_v47 = vld [vmem:[%s10032_s3 + $0xb78] sm:$0xff] }
 0x370   :  { %6863 = vmatpush3.bf16.msra.mxu1 %v6862_v35  ;;  %v4057_v35 = vld [vmem:[%s10032_s3 + $0x978] sm:$0xff] }
 0x371   :  { %6865 = vmatprep.subr.bf16.mxu1 %v6864_v0  ;;  %v6930_v0 = vpack.c.bf16 %v4057_v35, %v4056_v58  ;;  %v4170_v35 = vld [vmem:[%s10032_s3 + $0xd00] sm:$0xff] }
 0x372   :  { %7087 = vmatpush3.bf16.msra.mxu0 %v7086_v50  ;;  %v4107_v50 = vld [vmem:[%s10032_s3 + $0xb08] sm:$0xff] }
 0x373   :  { %7089 = vmatprep.subr.bf16.mxu0 %v7088_v44  ;;  %v6966_v44 = vpack.c.bf16 %v4107_v50, %v4106_v54  ;;  %v4172_v50 = vld [vmem:[%s10032_s3 + $0xd10] sm:$0xff] }
 0x374   :  { %6867 = vmatpush3.bf16.msra.mxu1 %v6866_v5  ;;  %v4109_v5 = vld [vmem:[%s10032_s3 + $0xb18] sm:$0xff] }
 0x375   :  { %6901 = vmatprep.subr.bf16.mxu1 %v6900_v49  ;;  %v4380_v49 = vcombine.high %v8709_v8, %v8709_v8 }
 0x376   :  { %7091 = vmatpush3.bf16.msra.mxu0 %v7090_v13  ;;  %v6970_v13 = vpack.c.bf16 %v4109_v5, %v4108_v46  ;;  %v7034_v46 = vpack.c.bf16 %v4173_v2, %v4172_v50  ;;  %v4414_v50 = vcombine.high %v8721_v60, %v8721_v60  ;;  %v4254_v2 = vld [vmem:[%s10032_s3 + $0xfa0] sm:$0xff] }
 0x377   :  { %5002 = vmatmul.mubr.f32.vlgmr.msra.gmra.mrb[70].mxu1 %v8669_v51  ;;  %v4065_v51 = vld [vmem:[%s10032_s3 + $0x9b8] sm:$0xff] }
 0x378   :  { %6903 = vmatpush3.bf16.msra.mxu1 %v6902_v53  ;;  %5141 = vmatprep.mubr.f32.mxu1 %v4363_v16  ;;  %v4111_v53 = vld [vmem:[%s10032_s3 + $0xb28] sm:$0xff]  ;;  %v4112_v16 = vld [vmem:[%s10032_s3 + $0xb30] sm:$0xff] }
 0x379   :  { %6905 = vmatprep.subr.bf16.mxu1 %v6904_v9  ;;  %5492 = vmatmul.mubr.f32.vlgmr.msra.gmra.mrb[22].mxu0 %v9414_v33  ;;  %v6912_v33 = vpack.c.bf16 %v4065_v51, %v4064_v21  ;;  %v4128_v9 = vld [vmem:[%s10032_s3 + $0xbb0] sm:$0xff]  ;;  %v6974_v56 = vpack.c.bf16 %v4111_v53, %v4110_v59  ;;  %v4115_v21 = vld [vmem:[%s10032_s3 + $0xb48] sm:$0xff]  ;;  %v4177_v53 = vld [vmem:[%s10032_s3 + $0xd38] sm:$0xff] }
 0x37a   :  { %v4132_v51 = vld [vmem:[%s10032_s3 + $0xbd0] sm:$0xff]  ;;  %6417 = vmatprep.mubr.msk.f32.mxu0 %vm7275_vm3, %v7271_v3 }
 0x37b   :  { %v4176_v59 = vld [vmem:[%s10032_s3 + $0xd30] sm:$0xff] }
 0x37c   :  { %6907 = vmatpush3.bf16.msra.mxu1 %v6906_v41  ;;  %v4131_v41 = vld [vmem:[%s10032_s3 + $0xbc8] sm:$0xff] }
 0x37d   :  { %6909 = vmatprep.subr.bf16.mxu1 %v6908_v19  ;;  %v6978_v19 = vpack.c.bf16 %v4113_v17, %v4112_v16  ;;  %v6980_v20 = vpack.c.bf16 %v4131_v41, %v4130_v18  ;;  %v4178_v16 = vld [vmem:[%s10032_s3 + $0xd40] sm:$0xff]  ;;  %v4179_v17 = vld [vmem:[%s10032_s3 + $0xd48] sm:$0xff]  ;;  %v4196_v18 = vld [vmem:[%s10032_s3 + $0xdd0] sm:$0xff] }
 0x37e   :  { %v4197_v41 = vld [vmem:[%s10032_s3 + $0xdd8] sm:$0xff] }
 0x380   :  { %6911 = vmatpush3.bf16.msra.mxu1 %v6910_v23  ;;  %v4133_v23 = vld [vmem:[%s10032_s3 + $0xbd8] sm:$0xff] }
 0x381   :  { %6913 = vmatprep.subr.bf16.mxu1 %v6912_v33  ;;  %v6982_v33 = vpack.c.bf16 %v4115_v21, %v4114_v63  ;;  %v6984_v22 = vpack.c.bf16 %v4133_v23, %v4132_v51  ;;  %v4180_v63 = vld [vmem:[%s10032_s3 + $0xd50] sm:$0xff]  ;;  %v4181_v21 = vld [vmem:[%s10032_s3 + $0xd58] sm:$0xff]  ;;  %v4198_v51 = vld [vmem:[%s10032_s3 + $0xde0] sm:$0xff] }
 0x382   :  { %v4199_v23 = vld [vmem:[%s10032_s3 + $0xde8] sm:$0xff] }
 0x384   :  { %6915 = vmatpush3.bf16.msra.mxu1 %v6914_v27  ;;  %v4135_v27 = vld [vmem:[%s10032_s3 + $0xbe8] sm:$0xff] }
 0x385   :  { %6917 = vmatprep.subr.bf16.mxu1 %v6916_v28  ;;  %v6986_v28 = vpack.c.bf16 %v4117_v25, %v4116_v24  ;;  %v6988_v29 = vpack.c.bf16 %v4135_v27, %v4134_v26  ;;  %v7052_v24 = vpack.c.bf16 %v4199_v23, %v4198_v51  ;;  %v4182_v25 = vld [vmem:[%s10032_s3 + $0xd60] sm:$0xff]  ;;  %v4183_v26 = vld [vmem:[%s10032_s3 + $0xd68] sm:$0xff] }
 0x386   :  { %v4246_v23 = vld [vmem:[%s10032_s3 + $0xf60] sm:$0xff] }
 0x388   :  { %6919 = vmatpush3.bf16.msra.mxu1 %v6918_v37  ;;  %v4136_v37 = vld [vmem:[%s10032_s3 + $0xbf0] sm:$0xff] }
 0x389   :  { %6921 = vmatprep.subr.bf16.mxu1 %v6920_v38  ;;  %v4137_v38 = vld [vmem:[%s10032_s3 + $0xbf8] sm:$0xff] }
 0x38c   :  { %6923 = vmatpush3.bf16.msra.mxu1 %v6922_v40 }
 0x38d   :  { %6925 = vmatprep.subr.bf16.mxu1 %v6924_v42  ;;  %v6992_v42 = vpack.c.bf16 %v4137_v38, %v4136_v37  ;;  %v7054_v38 = vpack.c.bf16 %v4183_v26, %v4182_v25  ;;  %v4265_v25 = vld [vmem:[%s10032_s3 + $0xff8] sm:$0xff] }
 0x390   :  { %6927 = vmatpush3.bf16.msra.mxu1 %v6926_v30  ;;  %v4187_v30 = vld [vmem:[%s10032_s3 + $0xd88] sm:$0xff] }
 0x391   :  { %6929 = vmatprep.subr.bf16.mxu1 %v6928_v10  ;;  %v6994_v10 = vpack.c.bf16 %v4121_v47, %v4120_v43  ;;  %v7028_v58 = vpack.c.bf16 %v4187_v30, %v4186_v57  ;;  %v4251_v47 = vld [vmem:[%s10032_s3 + $0xf88] sm:$0xff] }
 0x394   :  { %6931 = vmatpush3.bf16.msra.mxu1 %v6930_v0  ;;  %v4189_v0 = vld [vmem:[%s10032_s3 + $0xd98] sm:$0xff] }
 0x395   :  { %6965 = vmatprep.subr.bf16.mxu1 %v6964_v1  ;;  %v7030_v1 = vpack.c.bf16 %v4171_v48, %v4170_v35  ;;  %v7032_v54 = vpack.c.bf16 %v4189_v0, %v4188_v62  ;;  %v4252_v35 = vld [vmem:[%s10032_s3 + $0xf90] sm:$0xff]  ;;  %v4253_v48 = vld [vmem:[%s10032_s3 + $0xf98] sm:$0xff] }
 0x396   :  { %v7096_v0 = vpack.c.bf16 %v4253_v48, %v4252_v35 }
 0x397   :  { %5142 = vmatmul.mubr.f32.vlgmr.msra.gmra.mrb[72].mxu1 %v8706_v7  ;;  %v4129_v7 = vld [vmem:[%s10032_s3 + $0xbb8] sm:$0xff] }
 0x398   :  { %6967 = vmatpush3.bf16.msra.mxu1 %v6966_v44  ;;  %5281 = vmatprep.mubr.f32.mxu1 %v4380_v49  ;;  %v6976_v15 = vpack.c.bf16 %v4129_v7, %v4128_v9  ;;  %v4190_v44 = vld [vmem:[%s10032_s3 + $0xda0] sm:$0xff]  ;;  %v4195_v7 = vld [vmem:[%s10032_s3 + $0xdc8] sm:$0xff] }
 0x399   :  { %6969 = vmatprep.subr.bf16.mxu1 %v6968_v4  ;;  %v4191_v4 = vld [vmem:[%s10032_s3 + $0xda8] sm:$0xff]  ;;  %v4174_v49 = vld [vmem:[%s10032_s3 + $0xd20] sm:$0xff] }
 0x39a   :  { %v7036_v5 = vpack.c.bf16 %v4191_v4, %v4190_v44  ;;  %v4194_v9 = vld [vmem:[%s10032_s3 + $0xdc0] sm:$0xff] }
 0x39c   :  { %6971 = vmatpush3.bf16.msra.mxu1 %v6970_v13  ;;  %v7038_v13 = vpack.c.bf16 %v4175_v61, %v4174_v49  ;;  %v4256_v49 = vld [vmem:[%s10032_s3 + $0xfb0] sm:$0xff] }
 0x39d   :  { %6973 = vmatprep.subr.bf16.mxu1 %v6972_v14 }
 0x3a0   :  { %6975 = vmatpush3.bf16.msra.mxu1 %v6974_v56  ;;  %v7042_v56 = vpack.c.bf16 %v4177_v53, %v4176_v59  ;;  %v4259_v59 = vld [vmem:[%s10032_s3 + $0xfc8] sm:$0xff] }
 0x3a1   :  { %6977 = vmatprep.subr.bf16.mxu1 %v6976_v15  ;;  %v7044_v15 = vpack.c.bf16 %v4195_v7, %v4194_v9  ;;  %v4242_v7 = vld [vmem:[%s10032_s3 + $0xf40] sm:$0xff] }
 0x3a4   :  { %6979 = vmatpush3.bf16.msra.mxu1 %v6978_v19  ;;  %v7046_v19 = vpack.c.bf16 %v4179_v17, %v4178_v16  ;;  %v4261_v16 = vld [vmem:[%s10032_s3 + $0xfd8] sm:$0xff] }
 0x3a5   :  { %6981 = vmatprep.subr.bf16.mxu1 %v6980_v20  ;;  %v7048_v20 = vpack.c.bf16 %v4197_v41, %v4196_v18  ;;  %v4244_v41 = vld [vmem:[%s10032_s3 + $0xf50] sm:$0xff] }
 0x3a7   :  { %v5864_v34 = vpop.f32.mrb[60].mxu1 }
 0x3a8   :  { %6983 = vmatpush3.bf16.msra.mxu1 %v6982_v33  ;;  %v5865_v39 = vpop.f32.mrb[61].mxu1  ;;  %v7050_v33 = vpack.c.bf16 %v4181_v21, %v4180_v63  ;;  %v4263_v63 = vld [vmem:[%s10032_s3 + $0xfe8] sm:$0xff] }
 0x3a9   :  { %6985 = vmatprep.subr.bf16.mxu1 %v6984_v22  ;;  %v9777_v36 = vadd.f32 %v5865_v39, %v5864_v34  ;;  %v5829_v22 = vld [vmem:[%s10031_s5 + $0x20] ss:$0 sm:$0xff] }
 0x3ab   :  { %v6004_v6 = vpop.f32.mrb[12].mxu0  ;;  %v4514_v32 = vadd.f32 %v9777_v36, %v5829_v22  ;;  %v4250_v36 = vld [vmem:[%s10032_s3 + $0xf80] sm:$0xff] }
 0x3ac   :  { %6987 = vmatpush3.bf16.msra.mxu1 %v6986_v28  ;;  %v6005_v40 = vpop.f32.mrb[13].mxu0  ;;  %v4200_v28 = vld [vmem:[%s10032_s3 + $0xdf0] sm:$0xff]  ;;  %v7092_v30 = vpack.c.bf16 %v4251_v47, %v4250_v36 }
 0x3ad   :  { %6989 = vmatprep.subr.bf16.mxu1 %v6988_v29  ;;  %v9785_v55 = vadd.f32 %v6005_v40, %v6004_v6  ;;  %v4201_v29 = vld [vmem:[%s10032_s3 + $0xdf8] sm:$0xff] }
 0x3ae   :  { %v7056_v6 = vpack.c.bf16 %v4201_v29, %v4200_v28  ;;  %v4185_v40 = vld [vmem:[%s10032_s3 + $0xd78] sm:$0xff] }
 0x3b0   :  { %6991 = vmatpush3.bf16.msra.mxu1 %v6990_v52  ;;  %v4184_v52 = vld [vmem:[%s10032_s3 + $0xd70] sm:$0xff] }
 0x3b1   :  { %6993 = vmatprep.subr.bf16.mxu1 %v6992_v42  ;;  %v7058_v57 = vpack.c.bf16 %v4185_v40, %v4184_v52 }
 0x3b4   :  { %6995 = vmatpush3.bf16.msra.mxu1 %v6994_v10  ;;  %v4234_v10 = vld [vmem:[%s10032_s3 + $0xf00] sm:$0xff] }
 0x3b5   :  { %7029 = vmatprep.subr.bf16.mxu1 %v7028_v58  ;;  %v4235_v58 = vld [vmem:[%s10032_s3 + $0xf08] sm:$0xff] }
 0x3b6   :  { %v7094_v62 = vpack.c.bf16 %v4235_v58, %v4234_v10 }
 0x3b7   :  { %5282 = vmatmul.mubr.f32.vlgmr.msra.gmra.mrb[74].mxu1 %v8709_v8  ;;  %v4193_v8 = vld [vmem:[%s10032_s3 + $0xdb8] sm:$0xff] }
 0x3b8   :  { %7031 = vmatpush3.bf16.msra.mxu1 %v7030_v1  ;;  %5421 = vmatprep.mubr.f32.mxu1 %v4397_v45  ;;  %v7040_v14 = vpack.c.bf16 %v4193_v8, %v4192_v11  ;;  %v4236_v1 = vld [vmem:[%s10032_s3 + $0xf10] sm:$0xff]  ;;  %v4255_v45 = vld [vmem:[%s10032_s3 + $0xfa8] sm:$0xff] }
 0x3b9   :  { %7033 = vmatprep.subr.bf16.mxu1 %v7032_v54  ;;  %v4237_v54 = vld [vmem:[%s10032_s3 + $0xf18] sm:$0xff]  ;;  %v7100_v4 = vpack.c.bf16 %v4255_v45, %v4254_v2  ;;  %v4240_v8 = vld [vmem:[%s10032_s3 + $0xf30] sm:$0xff]  ;;  %v5569_v2 = vld [vmem:[%s10033_s4 + $0x8] sm:$0xff] }
 0x3ba   :  { %v7098_v44 = vpack.c.bf16 %v4237_v54, %v4236_v1 }
 0x3bc   :  { %7035 = vmatpush3.bf16.msra.mxu1 %v7034_v46  ;;  %v4238_v46 = vld [vmem:[%s10032_s3 + $0xf20] sm:$0xff] }
 0x3bd   :  { %7037 = vmatprep.subr.bf16.mxu1 %v7036_v5  ;;  %v4239_v5 = vld [vmem:[%s10032_s3 + $0xf28] sm:$0xff] }
 0x3be   :  { %v7102_v61 = vpack.c.bf16 %v4239_v5, %v4238_v46 }
 0x3c0   :  { %7039 = vmatpush3.bf16.msra.mxu1 %v7038_v13  ;;  %v4241_v13 = vld [vmem:[%s10032_s3 + $0xf38] sm:$0xff] }
 0x3c1   :  { %7041 = vmatprep.subr.bf16.mxu1 %v7040_v14  ;;  %v4258_v14 = vld [vmem:[%s10032_s3 + $0xfc0] sm:$0xff]  ;;  %v7106_v53 = vpack.c.bf16 %v4241_v13, %v4240_v8 }
 0x3c2   :  { %v7108_v9 = vpack.c.bf16 %v4259_v59, %v4258_v14  ;;  %v5573_v59 = vld [vmem:[%s10033_s4 + $0x28] sm:$0xff] }
 0x3c4   :  { %7043 = vmatpush3.bf16.msra.mxu1 %v7042_v56  ;;  %v4243_v56 = vld [vmem:[%s10032_s3 + $0xf48] sm:$0xff] }
 0x3c5   :  { %7045 = vmatprep.subr.bf16.mxu1 %v7044_v15  ;;  %v4260_v15 = vld [vmem:[%s10032_s3 + $0xfd0] sm:$0xff]  ;;  %v7110_v17 = vpack.c.bf16 %v4243_v56, %v4242_v7  ;;  %v5575_v7 = vld [vmem:[%s10033_s4 + $0x38] sm:$0xff] }
 0x3c6   :  { %v7112_v18 = vpack.c.bf16 %v4261_v16, %v4260_v15 }
 0x3c8   :  { %7047 = vmatpush3.bf16.msra.mxu1 %v7046_v19  ;;  %v4245_v19 = vld [vmem:[%s10032_s3 + $0xf58] sm:$0xff] }
 0x3c9   :  { %7049 = vmatprep.subr.bf16.mxu1 %v7048_v20  ;;  %v4262_v20 = vld [vmem:[%s10032_s3 + $0xfe0] sm:$0xff]  ;;  %v7114_v21 = vpack.c.bf16 %v4245_v19, %v4244_v41 }
 0x3ca   :  { %v5899_v27 = vpop.f32.mrb[62].mxu1  ;;  %v7116_v51 = vpack.c.bf16 %v4263_v63, %v4262_v20 }
 0x3cb   :  { %v5900_v31 = vpop.f32.mrb[63].mxu1 }
 0x3cc   :  { %v5901_v34 = vadd.f32 %v5900_v31, %v5899_v27  ;;  %7051 = vmatpush3.bf16.msra.mxu1 %v7050_v33  ;;  %v6074_v37 = vpop.f32.mrb[14].mxu0  ;;  %v4247_v33 = vld [vmem:[%s10032_s3 + $0xf68] sm:$0xff] }
 0x3cd   :  { %v6075_v39 = vpop.f32.mrb[15].mxu0  ;;  %7053 = vmatprep.subr.bf16.mxu1 %v7052_v24  ;;  %v4264_v24 = vld [vmem:[%s10032_s3 + $0xff0] sm:$0xff]  ;;  %v7118_v29 = vpack.c.bf16 %v4247_v33, %v4246_v23 }
 0x3ce   :  { %v9890_v42 = vadd.f32 %v5901_v34, %v4514_v32  ;;  %v9892_v43 = vadd.f32 %v6075_v39, %v6074_v37  ;;  %v7120_v32 = vpack.c.bf16 %v4265_v25, %v4264_v24  ;;  %v4248_v34 = vld [vmem:[%s10032_s3 + $0xf70] sm:$0xff]  ;;  %v4249_v37 = vld [vmem:[%s10032_s3 + $0xf78] sm:$0xff] }
 0x3d0   :  { %7055 = vmatpush3.bf16.msra.mxu1 %v7054_v38 }
 0x3d1   :  { %7057 = vmatprep.subr.bf16.mxu1 %v7056_v6  ;;  %v7122_v6 = vpack.c.bf16 %v4249_v37, %v4248_v34 }
 0x3d4   :  { %7059 = vmatpush3.bf16.msra.mxu1 %v7058_v57 }
 0x3d5   :  { %7093 = vmatprep.subr.bf16.mxu1 %v7092_v30 }
 0x3d7   :  { %5422 = vmatmul.mubr.f32.vlgmr.msra.gmra.mrb[76].mxu1 %v8718_v12  ;;  %v4257_v12 = vld [vmem:[%s10032_s3 + $0xfb8] sm:$0xff] }
 0x3d8   :  { %7095 = vmatpush3.bf16.msra.mxu1 %v7094_v62  ;;  %5561 = vmatprep.mubr.f32.mxu1 %v4414_v50  ;;  %v7104_v11 = vpack.c.bf16 %v4257_v12, %v4256_v49  ;;  %v7274_v50 = vmov 0.0|0.0  }
 0x3d9   :  { %7097 = vmatprep.subr.bf16.mxu1 %v7096_v0  ;;  %7124 = vmatprep.subr.bf16.mxu0 %v7274_v50 }
 0x3dc   :  { %7099 = vmatpush3.bf16.msra.mxu1 %v7098_v44 }
 0x3dd   :  { %7101 = vmatprep.subr.bf16.mxu1 %v7100_v4  ;;  %v5571_v4 = vld [vmem:[%s10033_s4 + $0x18] sm:$0xff] }
 0x3e0   :  { %7103 = vmatpush3.bf16.msra.mxu1 %v7102_v61 }
 0x3e1   :  { %7105 = vmatprep.subr.bf16.mxu1 %v7104_v11 }
 0x3e4   :  { %7107 = vmatpush3.bf16.msra.mxu1 %v7106_v53  ;;  %v5574_v53 = vld [vmem:[%s10033_s4 + $0x30] sm:$0xff] }
 0x3e5   :  { %7109 = vmatprep.subr.bf16.mxu1 %v7108_v9  ;;  %v7134_v56 = vpack.c.bf16 %v5575_v7, %v5574_v53 }
 0x3e8   :  { %7111 = vmatpush3.bf16.msra.mxu1 %v7110_v17 }
 0x3e9   :  { %7113 = vmatprep.subr.bf16.mxu1 %v7112_v18 }
 0x3ea   :  { %v5934_v22 = vpop.f32.mrb[64].mxu1 }
 0x3eb   :  { %v5935_v26 = vpop.f32.mrb[65].mxu1 }
 0x3ec   :  { %v5936_v27 = vadd.f32 %v5935_v26, %v5934_v22  ;;  %7115 = vmatpush3.bf16.msra.mxu1 %v7114_v21  ;;  %v6144_v28 = vpop.f32.mrb[16].mxu0 }
 0x3ed   :  { %v6145_v31 = vpop.f32.mrb[17].mxu0  ;;  %7117 = vmatprep.subr.bf16.mxu1 %v7116_v51 }
 0x3ee   :  { %v4654_v38 = vadd.f32 %v5936_v27, %v9890_v42  ;;  %v6146_v39 = vadd.f32 %v6145_v31, %v6144_v28  ;;  %v5830_v31 = vld [vmem:[%s10031_s5 + $0x21] ss:$0 sm:$0xff] }
 0x3f0   :  { %7119 = vmatpush3.bf16.msra.mxu1 %v7118_v29 }
 0x3f1   :  { %7121 = vmatprep.subr.bf16.mxu1 %v7120_v32 }
 0x3f4   :  { %7123 = vmatpush3.bf16.msra.mxu1 %v7122_v6 }
 0x3f7   :  { %5562 = vmatmul.mubr.f32.vlgmr.msra.gmra.mrb[78].mxu1 %v8721_v60  ;;  %v5568_v60 = vld [vmem:[%s10033_s4] sm:$0xff] }
 0x3f8   :  { %v7125_v44 = vpack.c.bf16 %v5569_v2, %v5568_v60 }
 0x3fa   :  { %7126 = vmatpush3.bf16.msra.mxu0 %v7125_v44 }
 0x3fb   :  { %7127 = vmatprep.subr.bf16.mxu0 %v7274_v50 }
 0x40a   :  { %v5969_v52 = vpop.f32.mrb[66].mxu1 }
 0x40b   :  { %v5970_v40 = vpop.f32.mrb[67].mxu1 }
 0x40c   :  { %v5971_v36 = vadd.f32 %v5970_v40, %v5969_v52  ;;  %v6214_v47 = vpop.f32.mrb[18].mxu0 }
 0x40d   :  { %v6215_v57 = vpop.f32.mrb[19].mxu0 }
 0x40e   :  { %v4724_v30 = vadd.f32 %v5971_v36, %v4654_v38  ;;  %v6216_v10 = vadd.f32 %v6215_v57, %v6214_v47 }
 0x410   :  { %v4794_v58 = vadd.f32 %v9785_v55, %v4724_v30  ;;  %v5570_v55 = vld [vmem:[%s10033_s4 + $0x10] sm:$0xff] }
 0x411   :  { %v7128_v46 = vpack.c.bf16 %v5571_v4, %v5570_v55 }
 0x413   :  { %7129 = vmatpush3.bf16.msra.mxu0 %v7128_v46 }
 0x414   :  { %7130 = vmatprep.subr.bf16.mxu0 %v7274_v50 }
 0x42a   :  { %v6039_v35 = vpop.f32.mrb[68].mxu1 }
 0x42b   :  { %v6040_v48 = vpop.f32.mrb[69].mxu1 }
 0x42c   :  { %v6041_v62 = vadd.f32 %v6040_v48, %v6039_v35  ;;  %v6284_v42 = vpop.f32.mrb[20].mxu0 }
 0x42d   :  { %v6285_v0 = vpop.f32.mrb[21].mxu0 }
 0x42e   :  { %v4864_v1 = vadd.f32 %v6041_v62, %v4794_v58  ;;  %v6286_v54 = vadd.f32 %v6285_v0, %v6284_v42 }
 0x430   :  { %v4934_v45 = vadd.f32 %v9892_v43, %v4864_v1  ;;  %v5572_v43 = vld [vmem:[%s10033_s4 + $0x20] sm:$0xff] }
 0x431   :  { %v7131_v9 = vpack.c.bf16 %v5573_v59, %v5572_v43 }
 0x433   :  { %7132 = vmatpush3.bf16.msra.mxu0 %v7131_v9 }
 0x434   :  { %7133 = vmatprep.subr.bf16.mxu0 %v7274_v50 }
 0x437   :  { %7135 = vmatpush3.bf16.msra.mxu0 %v7134_v56 }
 0x44a   :  { %v6109_v5 = vpop.f32.mrb[70].mxu1 }
 0x44b   :  { %v6110_v49 = vpop.f32.mrb[71].mxu1 }
 0x44c   :  { %v6111_v12 = vadd.f32 %v6110_v49, %v6109_v5  ;;  %v6354_v61 = vpop.f32.mrb[22].mxu0 }
 0x44d   :  { %v6355_v11 = vpop.f32.mrb[23].mxu0 }
 0x44e   :  { %v5004_v8 = vadd.f32 %v6111_v12, %v4934_v45  ;;  %v6356_v13 = vadd.f32 %v6355_v11, %v6354_v61 }
 0x450   :  { %v5074_v14 = vadd.f32 %v6146_v39, %v5004_v8 }
 0x46a   :  { %v6179_v15 = vpop.f32.mrb[72].mxu1 }
 0x46b   :  { %v6180_v16 = vpop.f32.mrb[73].mxu1 }
 0x46c   :  { %v6181_v17 = vadd.f32 %v6180_v16, %v6179_v15 }
 0x46e   :  { %v5144_v18 = vadd.f32 %v6181_v17, %v5074_v14 }
 0x470   :  { %v5214_v41 = vadd.f32 %v6216_v10, %v5144_v18 }
 0x48a   :  { %v6249_v19 = vpop.f32.mrb[74].mxu1 }
 0x48b   :  { %v6250_v20 = vpop.f32.mrb[75].mxu1 }
 0x48c   :  { %v6251_v63 = vadd.f32 %v6250_v20, %v6249_v19 }
 0x48e   :  { %v5284_v21 = vadd.f32 %v6251_v63, %v5214_v41 }
 0x490   :  { %v5354_v51 = vadd.f32 %v6286_v54, %v5284_v21 }
 0x4aa   :  { %v6319_v23 = vpop.f32.mrb[76].mxu1 }
 0x4ab   :  { %v6320_v33 = vpop.f32.mrb[77].mxu1 }
 0x4ac   :  { %v6321_v22 = vadd.f32 %v6320_v33, %v6319_v23 }
 0x4ae   :  { %v5424_v24 = vadd.f32 %v6321_v22, %v5354_v51 }
 0x4b0   :  { %v5494_v25 = vadd.f32 %v6356_v13, %v5424_v24 }
 0x4ca   :  { %v6389_v3 = vpop.f32.mrb[78].mxu1 }
 0x4cb   :  { %v6390_v26 = vpop.f32.mrb[79].mxu1 }
 0x4cc   :  { %v6391_v27 = vadd.f32 %v6390_v26, %v6389_v3 }
 0x4ce   :  { %v5564_v28 = vadd.f32 %v6391_v27, %v5494_v25 }
 0x4d0   :  { %v5567_v29 = vmax.f32 %v5564_v28, 0.0 }
 0x4d2   :  { %6418 = vmatmul.mubr.msk.f32.vlgmr.msra.gmra.mrb[24].mxu0 %vm5581_vm4, %v5567_v29 }
 0x5a5   :  { %v5651_v32 = vpop.f32.mrb[24].mxu0 }
 0x5a6   :  { %v5652_v34 = vadd.f32 %v5830_v31, %v5651_v32  ;;  %v6419_v37 = vpop.f32.mrb[25].mxu0 }
 0x5a8   :  { %v5655_v38 = vmax.f32 %v5652_v34, 0.0 }
 0x5aa   :  { %5656 = vst [vmem:[%s10034_s6] sm:$0x3] %v5655_v38 }

</bundles_post_ra>
